<compile_context>
chip_gen: v6e
topology: v6e:2x2x1
jax: 0.10.0
libtpu: 0.0.40
codegen_flags: <defaults>
</compile_context>

<pallas_src>
import functools

import jax
import jax.numpy as jnp
from jax.experimental import pallas as pl
from jax.experimental.pallas import tpu as pltpu


def _round_up(n, m):
    return ((n + m - 1) // m) * m


def _gated_attn_kernel(x_ref, wab_ref, bab_ref, wc_ref, bc_ref, a_out_ref, *,
                       n_classes, vpu_proj):
    # Cast x to the MXU feed dtype *inside* the kernel (cheap VPU op hidden
    # under the pipeline) instead of paying an extra HBM round trip in the
    # wrapper.  One fused (tm, L) x (L, 2D) MXU matmul, f32 accumulation.
    x = x_ref[...].astype(wab_ref.dtype)
    h = jnp.dot(x, wab_ref[...],
                preferred_element_type=jnp.float32) + bab_ref[...]
    d = h.shape[-1] // 2
    a = jnp.tanh(h[:, :d])
    # sigmoid(z) == 0.5 * (tanh(z/2) + 1): a single EUP push per element.
    b = 0.5 * (jnp.tanh(0.5 * h[:, d:]) + 1.0)
    gated = a * b                                              # (tm, D) f32

    if vpu_proj:
        # wc_ref holds Wc^T: (C, D) with small C.  Per-class VPU multiply +
        # lane reduction avoids a <128-lane-wide MXU matmul that would waste
        # the systolic array.
        cols = [jnp.sum(gated * wc_ref[c:c + 1, :], axis=-1, keepdims=True)
                for c in range(n_classes)]
        A = cols[0] if n_classes == 1 else jnp.concatenate(cols, axis=-1)
        A = A + bc_ref[...]
    else:
        A = jnp.dot(gated, wc_ref[...],
                    preferred_element_type=jnp.float32) + bc_ref[...]
    a_out_ref[...] = A.astype(a_out_ref.dtype)


def fuse_params(wa, ba, wb, bb, wc, bc, *, compute_dtype=jnp.bfloat16):
    """One-time parameter fusion.  Call at parameter-load time, NOT per forward.

    Weights come in pre-transposed (in_features, out_features); biases (1, out).
    Returns (wab, bab, wc_k, bc_k):
      wab : (L, 2D) fused Wa|Wb in `compute_dtype` (the MXU feed dtype)
      bab : (1, 2D) fused ba|bb in f32
      wc_k: (C, D) = Wc^T in f32 if C<=8 (VPU path), else (D, C) (MXU path)
      bc_k: (1, C) in f32
    """
    wab = jnp.concatenate([wa, wb], axis=1).astype(compute_dtype)   # (L, 2D)
    bab = jnp.concatenate([ba, bb], axis=1).astype(jnp.float32)     # (1, 2D)
    C = wc.shape[1]
    if C <= 8:
        wc_k = wc.T.astype(jnp.float32)                             # (C, D)
    else:
        wc_k = wc.astype(jnp.float32)                               # (D, C)
    bc_k = bc.astype(jnp.float32)                                   # (1, C)
    return wab, bab, wc_k, bc_k


def attn_net_gated(x, fused_params, *, tm=256):
    """Pallas Attn_Net_Gated.forward.  Returns (A, x).

    `fused_params` is the tuple from fuse_params().  x is streamed from HBM in
    its own dtype and cast to the MXU feed dtype inside the kernel.
    """
    wab, bab, wc_k, bc_k = fused_params
    N, L = x.shape
    D = wab.shape[1] // 2
    C = bc_k.shape[1]
    vpu_proj = (C <= 8)
    out_dtype = jnp.float32

    # Row tile: multiple of 8; big enough to amortize the ~0.35 us/step
    # pipeline overhead and fill MXU sublanes.  No padding of x -- the ragged
    # last block is handled by Pallas (OOB output writes are masked).
    tm = max(8, min(tm, _round_up(N, 8)))
    tm = _round_up(tm, 8)
    grid = (pl.cdiv(N, tm),)

    cost = pl.CostEstimate(
        flops=2 * N * L * (2 * D) + 2 * N * D * C,
        transcendentals=2 * N * D,                    # two tanh per hidden elem
        bytes_accessed=(N * L * x.dtype.itemsize
                        + wab.size * wab.dtype.itemsize
                        + (bab.size + wc_k.size + bc_k.size) * 4
                        + N * C * 4),
    )

    kernel = functools.partial(_gated_attn_kernel, n_classes=C,
                               vpu_proj=vpu_proj)

    A = pl.pallas_call(
        kernel,
        out_shape=jax.ShapeDtypeStruct((N, C), out_dtype),
        grid_spec=pltpu.PrefetchScalarGridSpec(
            num_scalar_prefetch=0,
            grid=grid,
            in_specs=[
                pl.BlockSpec((tm, L), lambda i: (i, 0)),       # x tile (streamed)
                pl.BlockSpec((L, 2 * D), lambda i: (0, 0)),    # fused Wa|Wb
                pl.BlockSpec((1, 2 * D), lambda i: (0, 0)),    # fused ba|bb
                pl.BlockSpec(wc_k.shape, lambda i: (0, 0)),    # Wc (Wc^T if C<=8)
                pl.BlockSpec((1, C), lambda i: (0, 0)),        # bc
            ],
            out_specs=pl.BlockSpec((tm, C), lambda i: (i, 0)),
        ),
        compiler_params=pltpu.CompilerParams(
            dimension_semantics=("parallel",)),
        cost_estimate=cost,
    )(x, wab, bab, wc_k, bc_k)

    # The module returns the input unchanged as the second element.
    return A, x


def _reference(x, wa, ba, wb, bb, wc, bc):
    hi = jax.lax.Precision.HIGHEST
    a = jnp.tanh(jnp.dot(x, wa, precision=hi) + ba)
    b = jax.nn.sigmoid(jnp.dot(x, wb, precision=hi) + bb)
    return jnp.dot(a * b, wc, precision=hi) + bc


if __name__ == "__main__":
    # Module defaults: L=512 in-features, D=384 hidden, n_classes=1.
    # N is the number of instances in the MIL bag; ragged on purpose (not a
    # multiple of tm) to exercise the masked last block.
    N, L, D, C = 300, 512, 384, 1

    key = jax.random.PRNGKey(0)
    kx, ka, kba, kb, kbb, kc, kbc = jax.random.split(key, 7)

    x = jax.random.normal(kx, (N, L), dtype=jnp.float32)
    # PyTorch stores Linear weights as (out, in); stored pre-transposed here.
    wa = jax.random.normal(ka, (L, D), dtype=jnp.float32) * 0.05
    ba = jax.random.normal(kba, (1, D), dtype=jnp.float32) * 0.05
    wb = jax.random.normal(kb, (L, D), dtype=jnp.float32) * 0.05
    bb = jax.random.normal(kbb, (1, D), dtype=jnp.float32) * 0.05
    wc = jax.random.normal(kc, (D, C), dtype=jnp.float32) * 0.05
    bc = jax.random.normal(kbc, (1, C), dtype=jnp.float32) * 0.05

    A_ref = _reference(x, wa, ba, wb, bb, wc, bc)

    # Default path: bf16 MXU feed (x cast in-kernel), f32 accumulation.
    params_bf16 = fuse_params(wa, ba, wb, bb, wc, bc,
                              compute_dtype=jnp.bfloat16)
    A16, x_out = attn_net_gated(x, params_bf16, tm=256)
    jax.block_until_ready((A16, x_out))
    assert A16.shape == (N, C)
    assert x_out.shape == (N, L)
    assert jnp.array_equal(x_out, x)
    assert jnp.allclose(A16, A_ref, atol=3e-2, rtol=3e-2)

    # f32 MXU feed: tighter check against the reference.
    params_f32 = fuse_params(wa, ba, wb, bb, wc, bc,
                             compute_dtype=jnp.float32)
    A32, _ = attn_net_gated(x, params_f32, tm=256)
    jax.block_until_ready(A32)
    assert A32.shape == (N, C)
    assert jnp.allclose(A32, A_ref, atol=1e-3, rtol=1e-3)

    print("KERNEL_OK")
</pallas_src>

<mosaic_0001>
module attributes {stable_mosaic.version = 11 : i64} {
  func.func @_gated_attn_kernel(%arg0: i32, %arg1: memref<256x512xf32, #tpu.memory_space<vmem>>, %arg2: memref<512x768xbf16, #tpu.memory_space<vmem>>, %arg3: memref<1x768xf32, #tpu.memory_space<vmem>>, %arg4: memref<1x384xf32, #tpu.memory_space<vmem>>, %arg5: memref<1x1xf32, #tpu.memory_space<vmem>>, %arg6: memref<256x1xf32, #tpu.memory_space<vmem>>) attributes {dimension_semantics = [#tpu.dimension_semantics<parallel>], iteration_bounds = array<i64: 2>, scalar_prefetch = 0 : i64, scratch_operands = 0 : i64, tpu.core_type = #tpu.core_type<tc>, window_params = [{transform_indices = @transform_0, window_bounds = array<i64: 256, 512>}, {pipeline_mode = #tpu.pipeline_mode<synchronous>, transform_indices = @transform_1, window_bounds = array<i64: 512, 768>}, {pipeline_mode = #tpu.pipeline_mode<synchronous>, transform_indices = @transform_2, window_bounds = array<i64: 1, 768>}, {pipeline_mode = #tpu.pipeline_mode<synchronous>, transform_indices = @transform_3, window_bounds = array<i64: 1, 384>}, {pipeline_mode = #tpu.pipeline_mode<synchronous>, transform_indices = @transform_4, window_bounds = array<i64: 1, 1>}, {transform_indices = @transform_5, window_bounds = array<i64: 256, 1>}]} {
    %c0 = arith.constant 0 : index
    %c0_0 = arith.constant 0 : index
    %0 = vector.load %arg1[%c0, %c0_0] : memref<256x512xf32, #tpu.memory_space<vmem>>, vector<256x512xf32>
    %1 = arith.truncf %0 : vector<256x512xf32> to vector<256x512xbf16>
    %c0_1 = arith.constant 0 : index
    %c0_2 = arith.constant 0 : index
    %2 = vector.load %arg2[%c0_1, %c0_2] : memref<512x768xbf16, #tpu.memory_space<vmem>>, vector<512x768xbf16>
    %cst = arith.constant dense<0.000000e+00> : vector<256x768xf32>
    %3 = tpu.matmul %1, %2, %cst {dimension_numbers = #tpu.dot_dimension_numbers<[1], [0], [0], [1], [0, 0, 1, 1], [], []>} : vector<256x512xbf16>, vector<512x768xbf16>, vector<256x768xf32> -> vector<256x768xf32>
    %c0_3 = arith.constant 0 : index
    %c0_4 = arith.constant 0 : index
    %4 = vector.load %arg3[%c0_3, %c0_4] : memref<1x768xf32, #tpu.memory_space<vmem>>, vector<1x768xf32>
    %5 = vector.broadcast %4 : vector<1x768xf32> to vector<256x768xf32>
    %6 = arith.addf %3, %5 : vector<256x768xf32>
    %7 = vector.extract_strided_slice %6 {offsets = [0, 0], sizes = [256, 384], strides = [1, 1]} : vector<256x768xf32> to vector<256x384xf32>
    %8 = math.tanh %7 : vector<256x384xf32>
    %9 = vector.extract_strided_slice %6 {offsets = [0, 384], sizes = [256, 384], strides = [1, 1]} : vector<256x768xf32> to vector<256x384xf32>
    %cst_5 = arith.constant 5.000000e-01 : f32
    %10 = vector.broadcast %cst_5 : f32 to vector<256x384xf32>
    %11 = arith.mulf %10, %9 : vector<256x384xf32>
    %12 = math.tanh %11 : vector<256x384xf32>
    %cst_6 = arith.constant 1.000000e+00 : f32
    %13 = vector.broadcast %cst_6 : f32 to vector<256x384xf32>
    %14 = arith.addf %12, %13 : vector<256x384xf32>
    %cst_7 = arith.constant 5.000000e-01 : f32
    %15 = vector.broadcast %cst_7 : f32 to vector<256x384xf32>
    %16 = arith.mulf %15, %14 : vector<256x384xf32>
    %17 = arith.mulf %8, %16 : vector<256x384xf32>
    %c0_8 = arith.constant 0 : index
    %c0_9 = arith.constant 0 : index
    %18 = vector.load %arg4[%c0_8, %c0_9] : memref<1x384xf32, #tpu.memory_space<vmem>>, vector<1x384xf32>
    %19 = vector.broadcast %18 : vector<1x384xf32> to vector<256x384xf32>
    %20 = arith.mulf %17, %19 : vector<256x384xf32>
    %cst_10 = arith.constant dense<0.000000e+00> : vector<256xf32>
    %21 = vector.multi_reduction <add>, %20, %cst_10 [1] : vector<256x384xf32> to vector<256xf32>
    %22 = vector.shape_cast %21 : vector<256xf32> to vector<256x1xf32>
    %c0_11 = arith.constant 0 : index
    %c0_12 = arith.constant 0 : index
    %23 = vector.load %arg5[%c0_11, %c0_12] : memref<1x1xf32, #tpu.memory_space<vmem>>, vector<1x1xf32>
    %24 = vector.broadcast %23 : vector<1x1xf32> to vector<256x1xf32>
    %25 = arith.addf %22, %24 : vector<256x1xf32>
    %c0_13 = arith.constant 0 : index
    %c0_14 = arith.constant 0 : index
    %26 = vector.load %arg6[%c0_13, %c0_14] : memref<256x1xf32, #tpu.memory_space<vmem>>, vector<256x1xf32>
    tpu.vector_store %arg6[%c0_13, %c0_14], %25 {strides = array<i32>} : memref<256x1xf32, #tpu.memory_space<vmem>>, vector<256x1xf32>,
    return
  }
  func.func @transform_0(%arg0: i32) -> (i32, i32) {
    %c0_i32 = arith.constant 0 : i32
    %c0_i32_0 = arith.constant 0 : i32
    return %arg0, %c0_i32 : i32, i32
  }
  func.func @transform_1(%arg0: i32) -> (i32, i32) {
    %c0_i32 = arith.constant 0 : i32
    %c0_i32_0 = arith.constant 0 : i32
    %c0_i32_1 = arith.constant 0 : i32
    return %c0_i32, %c0_i32_0 : i32, i32
  }
  func.func @transform_2(%arg0: i32) -> (i32, i32) {
    %c0_i32 = arith.constant 0 : i32
    %c0_i32_0 = arith.constant 0 : i32
    %c0_i32_1 = arith.constant 0 : i32
    return %c0_i32, %c0_i32_0 : i32, i32
  }
  func.func @transform_3(%arg0: i32) -> (i32, i32) {
    %c0_i32 = arith.constant 0 : i32
    %c0_i32_0 = arith.constant 0 : i32
    %c0_i32_1 = arith.constant 0 : i32
    return %c0_i32, %c0_i32_0 : i32, i32
  }
  func.func @transform_4(%arg0: i32) -> (i32, i32) {
    %c0_i32 = arith.constant 0 : i32
    %c0_i32_0 = arith.constant 0 : i32
    %c0_i32_1 = arith.constant 0 : i32
    return %c0_i32, %c0_i32_0 : i32, i32
  }
  func.func @transform_5(%arg0: i32) -> (i32, i32) {
    %c0_i32 = arith.constant 0 : i32
    %c0_i32_0 = arith.constant 0 : i32
    return %arg0, %c0_i32 : i32, i32
  }
}

</mosaic_0001>

<bundles_post_ra>
// kernel: tpu_custom_call.1
= control target key start
LH: loop header
LB: loop body
LE: loop exit
PB: predicated region body
PF: predicated region fallthrough
CT: control target
= control target key end

     0   :  { %s7359_s0 = inlined_call_operand.hbm [shape: f32[300,512], index: 0, kind: input, shape index: {}]   ;;  %s7360_s1 = inlined_call_operand.hbm [shape: bf16[512,768], index: 1, kind: input, shape index: {}]   ;;  %s7361_s2 = inlined_call_operand.hbm [shape: f32[1,768], index: 2, kind: input, shape index: {}]   ;;  %s7362_s3 = inlined_call_operand.vmem [shape: f32[1,384], index: 3, kind: input, shape index: {}]   ;;  %s7363_s4 = inlined_call_operand.<no memory space> [shape: f32[1,1], index: 4, kind: input, shape index: {}]   ;;  %s7364_s5 = inlined_call_operand.vmem [shape: f32[300,1], index: 5, kind: output, shape index: {}]  }
   0x1   :  { %v10_v0 = vstv %s7363_s4 }
   0x2   :  { %11 = vst [vmem:[#allocation2] sm:$0x1] %v10_v0 }
   0x3   :  { %12 = vsyncpa [#allocation4], 0 }
   0x4   :  { %14 = vsyncpa [#allocation4 + $0x1], 0 }
   0x5   :  { %15 = vsyncpa [#allocation6], 0  ;;  %s5332_s20 = smov 0   ;;  %s5334_s21 = smov 0  }
   0x6   :  { %s5336_s22 = smov 0   ;;  %s5338_s23 = smov 0  }
   0x7 LB: > { %s5351_s4 = sadd.s32 4294967295, %s5258_s23   ;;  %s5354_s24 = sadd.s32 1, %s5258_s23   ;;  %s5258_s23 = sphi %s5338_s23, %s7699_s23   ;;  %s5254_s22 = sphi %s5336_s22, %s7698_s22   ;;  %s5250_s21 = sphi %s5334_s21, %s7697_s21   ;;  %s5246_s20 = sphi %s5332_s20, %s7696_s20  }
   0x8   : > { %s25_s25 = ssub.s32 %s5258_s23, %s5354_s24  ;;  %s28_s26 = sadd.s32 1, %s5254_s22 }
   0x9   : > { %p26_p0 = scmp.eq.s32.totalorder %s25_s25, 0  ;;  %p35_p1 = scmp.ne.s32.totalorder %s5254_s22, %s5250_s21 }
   0xa   : > { %p36_p2 = scmp.eq.s32.totalorder %s5258_s23, 0  ;;  %p41_p3 = scmp.ne.s32.totalorder %s5250_s21, %s5246_s20 }
   0xb   : > { %s5364_s27 = scalar_select %p26_p0, %s5254_s22, %s28_s26  }
   0xc   : > { %p5366_p4 = por %p36_p2, %p35_p1  ;;  %p7365_p5 = scmp.eq.s32.totalorder %s5351_s4, 0 }
   0xd   : > { %p149_p6 = scmp.eq.s32.totalorder %s5351_s4, 1  ;;  %p4081_p7 = scmp.ge.s32.totalorder %s5258_s23, 1 }
   0xe   : > { %p5375_p8 = por %p7365_p5, %p41_p3  ;;  %p162_p9 = scmp.lt.s32.totalorder %s5258_s23, 3 }
   0xf   : > { %p5380_p10 = por %p149_p6, %p35_p1  ;;  %s5292_s7 = smov [#allocation5]  }
  0x10   : > { %s7423_s29 = scalar_select %p5375_p8, 1, 0 }
  0x11   : > { %s7424_s30 = scalar_select %p5380_p10, 1, 0 }
  0x12   : > { %p5384_p11 = pnand %p4081_p7, %p162_p9  ;;  %s174_s8 = sshll.u32 %s5292_s7, 4  ;;  %s175_s8 = int_to_ptr.vmem [resolvable:$true] %s174_s8 }
  0x13   : > { %s5293_s10 = smov [#allocation7]   ;;  %s5121_s12 = scalar_lea.vmem %s175_s8, 24576 }
  0x14   : > { %p4324_p12 = pneg %p5384_p11  ;;  %s188_s11 = sshll.u32 %s5293_s10, 4  ;;  %s189_s11 = int_to_ptr.vmem [resolvable:$true] %s188_s11 }
  0x15   : > { %p5122_p1 = scmp.ne.s32.totalorder %s175_s8, %s5121_s12  ;;  %p5129_p6 = scmp.lt.s32.totalorder %s175_s8, %s175_s8 }
  0x16   : > { %p5392_p13 = pnand %p4324_p12, %p7365_p5  ;;  %p5130_p7 = scmp.lt.s32.totalorder %s5121_s12, %s5121_s12 }
  0x18   : > { %p5112_p0 = pneg %p5392_p13  ;;  %p5131_p9 = por %p5130_p7, %p5129_p6 }
  0x1a   : > { %p5124_p2 = pnand %p5122_p1, %p5112_p0 }
  0x1c   : > { %p5125_p3 = pneg %p5124_p2 }
  0x1e   : > { %p5132_p12 = pnand %p5131_p9, %p5125_p3 }
  0x20   : > { %5135 = shalt.err (!%p5132_p12)
}
  0x21   : > { %s5294_s13 = smov 384   ;;  %s5295_s14 = smov 24  }
  0x22   : > { %4327 = dma.hbm_to_vmem [thread:$0]  (!%p5392_p13), %s7360_s1, 24576, %s175_s8, [#allocation6], %s5294_s13, %s5294_s13, %s5295_s14  }
  0x23   : > { %s5147_s17 = scalar_lea.vmem %s189_s11, 96  ;;  %p5155_p10 = scmp.lt.s32.totalorder %s189_s11, %s189_s11 }
  0x24   : > { %p5148_p5 = scmp.ne.s32.totalorder %s189_s11, %s5147_s17  ;;  %p5156_p8 = scmp.lt.s32.totalorder %s5147_s17, %s5147_s17 }
  0x26   : > { %p5150_p1 = pnand %p5148_p5, %p5112_p0  ;;  %p5157_p6 = por %p5156_p8, %p5155_p10 }
  0x28   : > { %p5151_p2 = pneg %p5150_p1 }
  0x2a   : > { %p5158_p3 = pnand %p5157_p6, %p5151_p2 }
  0x2c   : > { %5161 = shalt.err (!%p5158_p3)
}
  0x2d   : > { %4330 = dma.hbm_to_vmem [thread:$0]  (!%p5392_p13), %s7361_s2, 96, %s189_s11, [#allocation6]  }
  0x2e   : > { %p4084_p7 = scmp.ge.s32.totalorder %s5258_s23, 2 }
  0x30   : > { %201 = sbr.rel (%p4084_p7) target bundleno = 85 (0x55), region = 32 }
  0x35   : > { %204 = sbr.rel (!%p5366_p4) target bundleno = 85 (0x55), region = 36  ;;  %s205_s20 = sand.u32 (%p5366_p4), 1, %s5254_s22  }
  0x36   : > { %s4086_s25 = sshll.u32 (%p5366_p4), %s5258_s23, 5  ;;  %s4085_s26 = sshll.u32 (%p5366_p4), %s205_s20, 10 }
  0x37   : > { %s211_s7 = ssub.s32 (%p5366_p4), 38, %s4086_s25  ;;  %s5422_s10 = scalar_lea.sflag (%p5366_p4), [#allocation4], %s205_s20 }
  0x38   : > { %p212_p5 = scmp.lt.s32.totalorder (%p5366_p4), %s211_s7, 32  ;;  %s209_s11 = scalar_lea.vmem (%p5366_p4), [#allocation3], %s4085_s26 }
  0x3a   : > { %s7701_s7 = smov (!%p212_p5, %s211_s7), 32 }
  0x3b   : > { %s5419_s8 = sshll.u32 %s7701_s7, 9 }
  0x3c   : > { %s217_s9 = ssub.s32 16384, %s5419_s8 }
  0x3d   : > { %218 = vsyncadd %s5422_s10, %s217_s9  ;;  %p4089_p4 = scmp.ne.s32.totalorder %s5419_s8, 0  ;;  %s4311_s28 = sshll.u32 %s5258_s23, 14 }
  0x3e   : > { %s5430_s14 = scalar_lea.hbm %s7359_s0, %s4311_s28  ;;  %s224_s15 = sshll.u32 %s209_s11, 4  ;;  %s5432_s15 = int_to_ptr.vmem [resolvable:$true] %s224_s15 }
  0x3f   : > { %s5162_s16 = scalar_lea.hbm %s5430_s14, %s5419_s8  ;;  %s5166_s23 = scalar_lea.hbm %s7359_s0, 19456 }
  0x40   : > { %p5163_p8 = scmp.ne.s32.totalorder %s5430_s14, %s5162_s16  ;;  %p5167_p0 = scmp.lt.s32.totalorder %s5430_s14, %s7359_s0 }
  0x41   : > { %p5168_p9 = scmp.lt.s32.totalorder %s5166_s23, %s5162_s16 }
  0x42   : > { %p5164_p10 = pnand %p5163_p8, %p4089_p4 }
  0x43   : > { %p5169_p12 = por %p5168_p9, %p5167_p0 }
  0x44   : > { %p5165_p13 = pneg %p5164_p10 }
  0x46   : > { %p5170_p1 = pnand %p5169_p12, %p5165_p13 }
  0x48   : > { %5173 = shalt.err (!%p5170_p1)
}
  0x49   : > { %s5174_s25 = scalar_lea.vmem %s5432_s15, %s5419_s8  ;;  %s5296_s26 = smov [#allocation3]  }
  0x4a   : > { %p5175_p2 = scmp.ne.s32.totalorder %s5432_s15, %s5174_s25  ;;  %s5178_s7 = sshll.u32 %s5296_s26, 4  ;;  %s5179_s7 = int_to_ptr.vmem [resolvable:$false] %s5178_s7 }
  0x4b   : > { %s5180_s9 = scalar_lea.vmem %s5179_s7, 32768  ;;  %p5181_p7 = scmp.lt.s32.totalorder %s5432_s15, %s5179_s7 }
  0x4c   : > { %p5176_p6 = pnand %p5175_p2, %p4089_p4  ;;  %p5182_p5 = scmp.lt.s32.totalorder %s5180_s9, %s5174_s25 }
  0x4e   : > { %p5177_p3 = pneg %p5176_p6  ;;  %p5183_p8 = por %p5182_p5, %p5181_p7 }
  0x50   : > { %p5184_p10 = pnand %p5183_p8, %p5177_p3 }
  0x52   : > { %5187 = shalt.err (!%p5184_p10)
}
  0x53   : > { %s5297_s11 = smov 512   ;;  %s5298_s28 = smov 32  }
  0x54   : > { %230 = dma.hbm_to_vmem [thread:$0]  (%p4089_p4), %s5430_s14, %s5419_s8, %s5432_s15, %s5422_s10, %s5297_s11, %s5297_s11, %s5298_s28  }
  0x55 PF: > { %236 = sbr.rel (%p5384_p11) target bundleno = 968 (0x3c8), region = 40 }
  0x5a   : > { %s5461_s12 = sand.u32 1, %s5250_s21   ;;  %p7427_p13 = scmp.ne.s32.totalorder %s7423_s29, 0 }
  0x5b   : > { %s4095_s13 = sshll.u32 %s5461_s12, 10  ;;  %s239_s16 = scalar_lea.sflag [#allocation4], %s5461_s12 }
  0x5c   : > { %s5465_s17 = scalar_lea.vmem [#allocation3], %s4095_s13 }
  0x5d   : > { %5237 = dma.done.wait (%p7427_p13), %s239_s16, 16384  }
  0x5e   : > { %5239 = vsyncadd (%p7427_p13), %s239_s16, 4294950912  ;;  %p7428_p4 = scmp.eq.s32.totalorder %s5351_s4, 0 }
  0x60   : > { %5241 = dma.done.wait (%p7428_p4), [#allocation6], 24672   ;;  %p7429_p11 = pmov %p7428_p4 }
  0x61   : > { %v4437_v1 = vld [vmem:[#allocation5 + $0x154] ss:$24 sps:$4 sm:$0xff]   ;;  %v4441_v3 = vld [vmem:[#allocation5 + $0x150] ss:$24 sps:$4 sm:$0xff]   ;;  %v4443_v5 = vld [vmem:[#allocation5 + $0x124] ss:$24 sps:$4 sm:$0xff]  }
  0x62   : > { %5243 = vsyncadd (%p7429_p11), [#allocation6], 4294942624  ;;  %v4439_v2 = vld [vmem:[#allocation5 + $0x454] ss:$24 sps:$4 sm:$0xff]   ;;  %1663 = vmatprep.subr.bf16.mxu0 %v4437_v1  ;;  %v4442_v4 = vld [vmem:[#allocation5 + $0x450] ss:$24 sps:$4 sm:$0xff]  }
  0x63   : > { %1856 = vmatprep.subr.bf16.mxu1 %v4439_v2  ;;  %1664 = vmatpush1.bf16.msra.mxu0 %v4441_v3  ;;  %v4445_v6 = vld [vmem:[#allocation5 + $0x424] ss:$24 sps:$4 sm:$0xff]   ;;  %v4447_v7 = vld [vmem:[#allocation5 + $0x120] ss:$24 sps:$4 sm:$0xff]   ;;  %v4449_v9 = vld [vmem:[#allocation5 + $0xf4] ss:$24 sps:$4 sm:$0xff]  }
  0x64   : > { %1857 = vmatpush1.bf16.msra.mxu1 %v4442_v4  ;;  %1665 = vmatprep.subr.bf16.mxu0 %v4443_v5  ;;  %v4448_v8 = vld [vmem:[#allocation5 + $0x420] ss:$24 sps:$4 sm:$0xff]   ;;  %v4451_v10 = vld [vmem:[#allocation5 + $0x3f4] ss:$24 sps:$4 sm:$0xff]   ;;  %v4453_v11 = vld [vmem:[#allocation5 + $0xf0] ss:$24 sps:$4 sm:$0xff]  }
  0x65   : > { %1858 = vmatprep.subr.bf16.mxu1 %v4445_v6  ;;  %v4454_v12 = vld [vmem:[#allocation5 + $0x3f0] ss:$24 sps:$4 sm:$0xff]   ;;  %v4455_v13 = vld [vmem:[#allocation5 + $0xc4] ss:$24 sps:$4 sm:$0xff]   ;;  %v4459_v15 = vld [vmem:[#allocation5 + $0xc0] ss:$24 sps:$4 sm:$0xff]  }
  0x66   : > { %v4457_v14 = vld [vmem:[#allocation5 + $0x3c4] ss:$24 sps:$4 sm:$0xff]   ;;  %v4460_v16 = vld [vmem:[#allocation5 + $0x3c0] ss:$24 sps:$4 sm:$0xff]   ;;  %v4461_v17 = vld [vmem:[#allocation5 + $0x94] ss:$24 sps:$4 sm:$0xff]  }
  0x67   : > { %1666 = vmatpush1.bf16.msra.mxu0 %v4447_v7  ;;  %v4463_v18 = vld [vmem:[#allocation5 + $0x394] ss:$24 sps:$4 sm:$0xff]   ;;  %v4465_v19 = vld [vmem:[#allocation5 + $0x90] ss:$24 sps:$4 sm:$0xff]   ;;  %v4467_v21 = vld [vmem:[#allocation5 + $0x64] ss:$24 sps:$4 sm:$0xff]  }
  0x68   : > { %1859 = vmatpush1.bf16.msra.mxu1 %v4448_v8  ;;  %1667 = vmatprep.subr.bf16.mxu0 %v4449_v9  ;;  %v4466_v20 = vld [vmem:[#allocation5 + $0x390] ss:$24 sps:$4 sm:$0xff]   ;;  %v4469_v22 = vld [vmem:[#allocation5 + $0x364] ss:$24 sps:$4 sm:$0xff]   ;;  %v4471_v23 = vld [vmem:[#allocation5 + $0x60] ss:$24 sps:$4 sm:$0xff]  }
  0x69   : > { %1860 = vmatprep.subr.bf16.mxu1 %v4451_v10  ;;  %v4472_v24 = vld [vmem:[#allocation5 + $0x360] ss:$24 sps:$4 sm:$0xff]   ;;  %v4473_v25 = vld [vmem:[#allocation5 + $0x34] ss:$24 sps:$4 sm:$0xff]   ;;  %v4477_v27 = vld [vmem:[#allocation5 + $0x30] ss:$24 sps:$4 sm:$0xff]  }
  0x6a   : > { %v4475_v26 = vld [vmem:[#allocation5 + $0x334] ss:$24 sps:$4 sm:$0xff]   ;;  %v4478_v28 = vld [vmem:[#allocation5 + $0x330] ss:$24 sps:$4 sm:$0xff]   ;;  %v4479_v29 = vld [vmem:[#allocation5 + $0x4] ss:$24 sps:$4 sm:$0xff]  }
  0x6b   : > { %1668 = vmatpush1.bf16.msra.mxu0 %v4453_v11  ;;  %v4481_v30 = vld [vmem:[#allocation5 + $0x304] ss:$24 sps:$4 sm:$0xff]   ;;  %v4483_v31 = vld [vmem:[#allocation5] ss:$24 sps:$4 sm:$0xff]   ;;  %v4485_v33 = vld [vmem:[#allocation5 + $0x2d4] ss:$24 sps:$4 sm:$0xff]  }
  0x6c   : > { %1861 = vmatpush1.bf16.msra.mxu1 %v4454_v12  ;;  %1669 = vmatprep.subr.bf16.mxu0 %v4455_v13  ;;  %v4484_v32 = vld [vmem:[#allocation5 + $0x300] ss:$24 sps:$4 sm:$0xff]   ;;  %v4487_v34 = vld [vmem:[#allocation5 + $0x5d4] ss:$24 sps:$4 sm:$0xff]   ;;  %v4489_v35 = vld [vmem:[#allocation5 + $0x2d0] ss:$24 sps:$4 sm:$0xff]  }
  0x6d   : > { %1862 = vmatprep.subr.bf16.mxu1 %v4457_v14  ;;  %v4490_v36 = vld [vmem:[#allocation5 + $0x5d0] ss:$24 sps:$4 sm:$0xff]   ;;  %v4491_v37 = vld [vmem:[#allocation5 + $0x2a4] ss:$24 sps:$4 sm:$0xff]   ;;  %v4495_v39 = vld [vmem:[#allocation5 + $0x2a0] ss:$24 sps:$4 sm:$0xff]  }
  0x6e   : > { %v4493_v38 = vld [vmem:[#allocation5 + $0x5a4] ss:$24 sps:$4 sm:$0xff]   ;;  %v4496_v40 = vld [vmem:[#allocation5 + $0x5a0] ss:$24 sps:$4 sm:$0xff]   ;;  %v4497_v41 = vld [vmem:[#allocation5 + $0x274] ss:$24 sps:$4 sm:$0xff]  }
  0x6f   : > { %1670 = vmatpush1.bf16.msra.mxu0 %v4459_v15  ;;  %v4499_v42 = vld [vmem:[#allocation5 + $0x574] ss:$24 sps:$4 sm:$0xff]   ;;  %v4501_v43 = vld [vmem:[#allocation5 + $0x270] ss:$24 sps:$4 sm:$0xff]   ;;  %v4503_v45 = vld [vmem:[#allocation5 + $0x244] ss:$24 sps:$4 sm:$0xff]  }
  0x70   : > { %1863 = vmatpush1.bf16.msra.mxu1 %v4460_v16  ;;  %1671 = vmatprep.subr.bf16.mxu0 %v4461_v17  ;;  %v4502_v44 = vld [vmem:[#allocation5 + $0x570] ss:$24 sps:$4 sm:$0xff]   ;;  %v4505_v46 = vld [vmem:[#allocation5 + $0x544] ss:$24 sps:$4 sm:$0xff]   ;;  %v4507_v51 = vld [vmem:[#allocation5 + $0x240] ss:$24 sps:$4 sm:$0xff]  }
  0x71   : > { %1864 = vmatprep.subr.bf16.mxu1 %v4463_v18  ;;  %v288_v47 = vld [vmem:[%s5465_s17 + $0x8] sm:$0xff]  ;;  %v290_v49 = vld [vmem:[%s5465_s17 + $0x18] sm:$0xff]  ;;  %v287_v7 = vld [vmem:[%s5465_s17] sm:$0xff]  ;;  %s4098_s8 = sshll.u32 %s5461_s12, 8  ;;  %vm3677_vm0 = vcmask 7168   ;;  %p7690_p0 = scmp.ne.s32.totalorder %s7424_s30, 0 }
  0x72   : > { %v292_v48 = vld [vmem:[%s5465_s17 + $0x28] sm:$0xff]  ;;  %v294_v50 = vld [vmem:[%s5465_s17 + $0x38] sm:$0xff]  ;;  %v291_v8 = vld [vmem:[%s5465_s17 + $0x20] sm:$0xff]  ;;  %s7120_s10 = scalar_lea.vmem [#allocation8], %s4098_s8   ;;  %s4293_s14 = sshll.u32 (%p7690_p0), %s5351_s4, 5 }
  0x73   : > { %1672 = vmatpush1.bf16.msra.mxu0 %v4465_v19  ;;  %v4508_v52 = vld [vmem:[#allocation5 + $0x540] ss:$24 sps:$4 sm:$0xff]   ;;  %v4509_v53 = vld [vmem:[#allocation5 + $0x214] ss:$24 sps:$4 sm:$0xff]   ;;  %v5479_v54 = vpack.c.bf16 %v292_v48, %v288_v47  ;;  %v5481_v55 = vpack.c.bf16 %v294_v50, %v290_v49  ;;  %v4513_v57 = vld [vmem:[#allocation5 + $0x210] ss:$24 sps:$4 sm:$0xff]   ;;  %v5493_v17 = vpack.c.bf16 %v291_v8, %v287_v7 }
  0x74   : > { %1865 = vmatpush1.bf16.msra.mxu1 %v4466_v20  ;;  %1673 = vmatprep.subr.bf16.mxu0 %v4467_v21  ;;  %v4511_v56 = vld [vmem:[#allocation5 + $0x514] ss:$24 sps:$4 sm:$0xff]   ;;  %v4514_v58 = vld [vmem:[#allocation5 + $0x510] ss:$24 sps:$4 sm:$0xff]   ;;  %v4515_v59 = vld [vmem:[#allocation5 + $0x1e4] ss:$24 sps:$4 sm:$0xff]  }
  0x75   : > { %1866 = vmatprep.subr.bf16.mxu1 %v4469_v22  ;;  %1695 = vmatprep.mubr.bf16.mxu0 %v5479_v54  ;;  %v4517_v60 = vld [vmem:[#allocation5 + $0x4e4] ss:$24 sps:$4 sm:$0xff]   ;;  %v4519_v61 = vld [vmem:[#allocation5 + $0x1e0] ss:$24 sps:$4 sm:$0xff]   ;;  %v4521_v63 = vld [vmem:[#allocation5 + $0x1b4] ss:$24 sps:$4 sm:$0xff]  }
  0x76   : > { %1888 = vmatprep.mubr.bf16.mxu1 %v5481_v55  ;;  %v4520_v62 = vld [vmem:[#allocation5 + $0x4e0] ss:$24 sps:$4 sm:$0xff]   ;;  %v4523_v0 = vld [vmem:[#allocation5 + $0x4b4] ss:$24 sps:$4 sm:$0xff]   ;;  %v4525_v1 = vld [vmem:[#allocation5 + $0x1b0] ss:$24 sps:$4 sm:$0xff]  }
  0x77   : > { %1674 = vmatpush1.bf16.msra.mxu0 %v4471_v23  ;;  %v4526_v2 = vld [vmem:[#allocation5 + $0x4b0] ss:$24 sps:$4 sm:$0xff]   ;;  %v4527_v3 = vld [vmem:[#allocation5 + $0x184] ss:$24 sps:$4 sm:$0xff]   ;;  %v4531_v5 = vld [vmem:[#allocation5 + $0x180] ss:$24 sps:$4 sm:$0xff]  }
  0x78   : > { %1867 = vmatpush1.bf16.msra.mxu1 %v4472_v24  ;;  %1675 = vmatprep.subr.bf16.mxu0 %v4473_v25  ;;  %v4529_v4 = vld [vmem:[#allocation5 + $0x484] ss:$24 sps:$4 sm:$0xff]   ;;  %v4532_v6 = vld [vmem:[#allocation5 + $0x480] ss:$24 sps:$4 sm:$0xff]   ;;  %v289_v9 = vld [vmem:[%s5465_s17 + $0x10] sm:$0xff]  ;;  %7430 = vst [vmem:[#allocation11_spill] sm:$0xff] %v5493_v17 }
  0x79   : > { %1868 = vmatprep.subr.bf16.mxu1 %v4475_v26  ;;  %v293_v10 = vld [vmem:[%s5465_s17 + $0x30] sm:$0xff]  ;;  %v296_v13 = vld [vmem:[%s5465_s17 + $0x48] sm:$0xff]  ;;  %v298_v15 = vld [vmem:[%s5465_s17 + $0x58] sm:$0xff]  ;;  %s4312_s15 = sshll.u32 (%p7690_p0), %s5351_s4, 8  ;;  %s3718_s18 = ssub.s32 (%p7690_p0), 38, %s4293_s14 }
  0x7a   : > { %v4535_v11 = vld [vmem:[#allocation5 + $0x15c] ss:$24 sps:$4 sm:$0xff]   ;;  %v300_v14 = vld [vmem:[%s5465_s17 + $0x68] sm:$0xff]  ;;  %v5495_v18 = vpack.c.bf16 %v293_v10, %v289_v9  ;;  %v4533_v19 = vld [vmem:[#allocation5 + $0x158] ss:$24 sps:$4 sm:$0xff]   ;;  %s7224_s20 = scalar_lea.vmem (%p7690_p0), %s7364_s5, %s4312_s15   ;;  %p3719_p9 = scmp.lt.s32.totalorder (%p7690_p0), %s3718_s18, 32 }
  0x7b   : > { %1676 = vmatpush1.bf16.msra.mxu0 %v4477_v27  ;;  %v4538_v12 = vld [vmem:[#allocation5 + $0x45c] ss:$24 sps:$4 sm:$0xff]   ;;  %v4536_v20 = vld [vmem:[#allocation5 + $0x458] ss:$24 sps:$4 sm:$0xff]   ;;  %v5497_v21 = vpack.c.bf16 %v300_v14, %v296_v13  ;;  %v4541_v23 = vld [vmem:[#allocation5 + $0x12c] ss:$24 sps:$4 sm:$0xff]  }
  0x7c   : > { %1869 = vmatpush1.bf16.msra.mxu1 %v4478_v28  ;;  %1677 = vmatprep.subr.bf16.mxu0 %v4479_v29  ;;  %v302_v16 = vld [vmem:[%s5465_s17 + $0x78] sm:$0xff]  ;;  %7431 = vst [vmem:[#allocation12_spill] sm:$0xff] %v5495_v18  ;;  %v295_v24 = vld [vmem:[%s5465_s17 + $0x40] sm:$0xff]  ;;  %v297_v26 = vld [vmem:[%s5465_s17 + $0x50] sm:$0xff] }
  0x7d   : > { %1870 = vmatprep.subr.bf16.mxu1 %v4481_v30  ;;  %v5499_v22 = vpack.c.bf16 %v302_v16, %v298_v15  ;;  %v299_v25 = vld [vmem:[%s5465_s17 + $0x60] sm:$0xff]  ;;  %v301_v27 = vld [vmem:[%s5465_s17 + $0x70] sm:$0xff]  ;;  %v312_v49 = vld [vmem:[%s5465_s17 + $0xc8] sm:$0xff] }
  0x7e   : > { %v4539_v28 = vld [vmem:[#allocation5 + $0x128] ss:$24 sps:$4 sm:$0xff]   ;;  %v4544_v30 = vld [vmem:[#allocation5 + $0x42c] ss:$24 sps:$4 sm:$0xff]   ;;  %v309_v48 = vld [vmem:[%s5465_s17 + $0xb0] sm:$0xff] }
  0x7f   : > { %1678 = vmatpush1.bf16.msra.mxu0 %v4483_v31  ;;  %v4542_v29 = vld [vmem:[#allocation5 + $0x428] ss:$24 sps:$4 sm:$0xff]   ;;  %v4556_v47 = vld [vmem:[#allocation5 + $0x3cc] ss:$24 sps:$4 sm:$0xff]   ;;  %v322_v9 = vld [vmem:[%s5465_s17 + $0x118] sm:$0xff] }
  0x80   : > { %1871 = vmatpush1.bf16.msra.mxu1 %v4484_v32  ;;  %1679 = vmatprep.subr.bf16.mxu0 %v4485_v33  ;;  %v304_v31 = vld [vmem:[%s5465_s17 + $0x88] sm:$0xff]  ;;  %v306_v33 = vld [vmem:[%s5465_s17 + $0x98] sm:$0xff] }
  0x81   : > { %1872 = vmatprep.subr.bf16.mxu1 %v4487_v34  ;;  %v308_v32 = vld [vmem:[%s5465_s17 + $0xa8] sm:$0xff]  ;;  %v310_v34 = vld [vmem:[%s5465_s17 + $0xb8] sm:$0xff] }
  0x82   : > { %v316_v50 = vld [vmem:[%s5465_s17 + $0xe8] sm:$0xff]  ;;  %v326_v10 = vld [vmem:[%s5465_s17 + $0x138] sm:$0xff] }
  0x83   : > { %1680 = vmatpush2.bf16.msra.mxu0 %v4489_v35  ;;  %v4547_v35 = vld [vmem:[#allocation5 + $0xfc] ss:$24 sps:$4 sm:$0xff]   ;;  %v320_v7 = vld [vmem:[%s5465_s17 + $0x108] sm:$0xff] }
  0x84   : > { %1873 = vmatpush2.bf16.msra.mxu1 %v4490_v36  ;;  %1681 = vmatprep.subr.bf16.mxu0 %v4491_v37  ;;  %v4550_v36 = vld [vmem:[#allocation5 + $0x3fc] ss:$24 sps:$4 sm:$0xff]   ;;  %v5513_v37 = vpack.c.bf16 %v299_v25, %v295_v24  ;;  %v324_v8 = vld [vmem:[%s5465_s17 + $0x128] sm:$0xff]  ;;  %v4572_v24 = vld [vmem:[#allocation5 + $0x338] ss:$24 sps:$4 sm:$0xff]  }
  0x85   : > { %1874 = vmatprep.subr.bf16.mxu1 %v4493_v38  ;;  %v5515_v38 = vpack.c.bf16 %v301_v27, %v297_v26  ;;  %v4571_v13 = vld [vmem:[#allocation5 + $0x3c] ss:$24 sps:$4 sm:$0xff]   ;;  %v319_v25 = vld [vmem:[%s5465_s17 + $0x100] sm:$0xff] }
  0x86   : > { %v4574_v14 = vld [vmem:[#allocation5 + $0x33c] ss:$24 sps:$4 sm:$0xff]   ;;  %v323_v26 = vld [vmem:[%s5465_s17 + $0x120] sm:$0xff] }
  0x87   : > { %1682 = vmatpush2.bf16.msra.mxu0 %v4495_v39  ;;  %v5517_v39 = vpack.c.bf16 %v308_v32, %v304_v31  ;;  %v321_v27 = vld [vmem:[%s5465_s17 + $0x110] sm:$0xff]  ;;  %v328_v31 = vld [vmem:[%s5465_s17 + $0x148] sm:$0xff] }
  0x88   : > { %1875 = vmatpush2.bf16.msra.mxu1 %v4496_v40  ;;  %1683 = vmatprep.subr.bf16.mxu0 %v4497_v41  ;;  %v5519_v40 = vpack.c.bf16 %v310_v34, %v306_v33  ;;  %v4545_v41 = vld [vmem:[#allocation5 + $0xf8] ss:$24 sps:$4 sm:$0xff]   ;;  %v332_v32 = vld [vmem:[%s5465_s17 + $0x168] sm:$0xff] }
  0x89   : > { %1876 = vmatprep.subr.bf16.mxu1 %v4499_v42  ;;  %v4548_v42 = vld [vmem:[#allocation5 + $0x3f8] ss:$24 sps:$4 sm:$0xff]  }
  0x8a   : > { %v330_v33 = vld [vmem:[%s5465_s17 + $0x158] sm:$0xff] }
  0x8b   : > { %1684 = vmatpush2.bf16.msra.mxu0 %v4501_v43  ;;  %v303_v43 = vld [vmem:[%s5465_s17 + $0x80] sm:$0xff]  ;;  %v334_v34 = vld [vmem:[%s5465_s17 + $0x178] sm:$0xff] }
  0x8c   : > { %1877 = vmatpush2.bf16.msra.mxu1 %v4502_v44  ;;  %1685 = vmatprep.subr.bf16.mxu0 %v4503_v45  ;;  %v307_v44 = vld [vmem:[%s5465_s17 + $0xa0] sm:$0xff]  ;;  %v305_v45 = vld [vmem:[%s5465_s17 + $0x90] sm:$0xff] }
  0x8d   : > { %1878 = vmatprep.subr.bf16.mxu1 %v4505_v46  ;;  %v4553_v46 = vld [vmem:[#allocation5 + $0xcc] ss:$24 sps:$4 sm:$0xff]  }
  0x8f   : > { %1686 = vmatpush2.bf16.msra.mxu0 %v4507_v51  ;;  %v314_v51 = vld [vmem:[%s5465_s17 + $0xd8] sm:$0xff] }
  0x90   : > { %1879 = vmatpush2.bf16.msra.mxu1 %v4508_v52  ;;  %1687 = vmatprep.subr.bf16.mxu0 %v4509_v53  ;;  %v318_v52 = vld [vmem:[%s5465_s17 + $0xf8] sm:$0xff]  ;;  %v4551_v53 = vld [vmem:[#allocation5 + $0xc8] ss:$24 sps:$4 sm:$0xff]  }
  0x91   : > { %1880 = vmatprep.subr.bf16.mxu1 %v4511_v56  ;;  %v4554_v56 = vld [vmem:[#allocation5 + $0x3c8] ss:$24 sps:$4 sm:$0xff]  }
  0x93   : > { %1688 = vmatpush2.bf16.msra.mxu0 %v4513_v57  ;;  %v4559_v57 = vld [vmem:[#allocation5 + $0x9c] ss:$24 sps:$4 sm:$0xff]  }
  0x94   : > { %1881 = vmatpush2.bf16.msra.mxu1 %v4514_v58  ;;  %1689 = vmatprep.subr.bf16.mxu0 %v4515_v59  ;;  %v4562_v58 = vld [vmem:[#allocation5 + $0x39c] ss:$24 sps:$4 sm:$0xff]   ;;  %v5533_v59 = vpack.c.bf16 %v307_v44, %v303_v43  ;;  %v5573_v43 = vpack.c.bf16 %v323_v26, %v319_v25  ;;  %v344_v25 = vld [vmem:[%s5465_s17 + $0x1c8] sm:$0xff] }
  0x95   : > { %1882 = vmatprep.subr.bf16.mxu1 %v4517_v60  ;;  %v5535_v60 = vpack.c.bf16 %v309_v48, %v305_v45  ;;  %v5577_v45 = vpack.c.bf16 %v332_v32, %v328_v31  ;;  %v4584_v48 = vld [vmem:[#allocation5 + $0x5d8] ss:$24 sps:$4 sm:$0xff]   ;;  %v348_v26 = vld [vmem:[%s5465_s17 + $0x1e8] sm:$0xff]  ;;  %v4607_v31 = vld [vmem:[#allocation5 + $0x21c] ss:$24 sps:$4 sm:$0xff]  }
  0x97   : > { %1690 = vmatpush2.bf16.msra.mxu0 %v4519_v61  ;;  %v5537_v61 = vpack.c.bf16 %v316_v50, %v312_v49  ;;  %v327_v49 = vld [vmem:[%s5465_s17 + $0x140] sm:$0xff] }
  0x98   : > { %1883 = vmatpush2.bf16.msra.mxu1 %v4520_v62  ;;  %1691 = vmatprep.subr.bf16.mxu0 %v4521_v63  ;;  %v5539_v62 = vpack.c.bf16 %v318_v52, %v314_v51  ;;  %v4557_v63 = vld [vmem:[#allocation5 + $0x98] ss:$24 sps:$4 sm:$0xff]   ;;  %v331_v50 = vld [vmem:[%s5465_s17 + $0x160] sm:$0xff] }
  0x99   : > { %1884 = vmatprep.subr.bf16.mxu1 %v4523_v0  ;;  %v4560_v0 = vld [vmem:[#allocation5 + $0x398] ss:$24 sps:$4 sm:$0xff]  }
  0x9a   : > { %v329_v51 = vld [vmem:[%s5465_s17 + $0x150] sm:$0xff] }
  0x9b   : > { %1692 = vmatpush2.bf16.msra.mxu0 %v4525_v1  ;;  %v311_v1 = vld [vmem:[%s5465_s17 + $0xc0] sm:$0xff]  ;;  %v333_v52 = vld [vmem:[%s5465_s17 + $0x170] sm:$0xff] }
  0x9c   : > { %1885 = vmatpush2.bf16.msra.mxu1 %v4526_v2  ;;  %1693 = vmatprep.subr.bf16.mxu0 %v4527_v3  ;;  %v315_v2 = vld [vmem:[%s5465_s17 + $0xe0] sm:$0xff]  ;;  %v313_v3 = vld [vmem:[%s5465_s17 + $0xd0] sm:$0xff] }
  0x9d   : > { %1886 = vmatprep.subr.bf16.mxu1 %v4529_v4  ;;  %v317_v4 = vld [vmem:[%s5465_s17 + $0xf0] sm:$0xff]  ;;  %v5553_v15 = vpack.c.bf16 %v315_v2, %v311_v1  ;;  %v4587_v1 = vld [vmem:[#allocation5 + $0x2a8] ss:$24 sps:$4 sm:$0xff]  }
  0x9e   : > { %v5555_v16 = vpack.c.bf16 %v317_v4, %v313_v3  ;;  %v4590_v2 = vld [vmem:[#allocation5 + $0x5a8] ss:$24 sps:$4 sm:$0xff]   ;;  %v4595_v3 = vld [vmem:[#allocation5 + $0x27c] ss:$24 sps:$4 sm:$0xff]  }
  0x9f   : > { %1694 = vmatpush2.bf16.msra.mxu0 %v4531_v5  ;;  %v4565_v5 = vld [vmem:[#allocation5 + $0x6c] ss:$24 sps:$4 sm:$0xff]   ;;  %v4598_v4 = vld [vmem:[#allocation5 + $0x57c] ss:$24 sps:$4 sm:$0xff]  }
  0xa0   : > { %1887 = vmatpush2.bf16.msra.mxu1 %v4532_v6  ;;  %2049 = vmatprep.subr.bf16.mxu0 %v4535_v11  ;;  %v4568_v6 = vld [vmem:[#allocation5 + $0x36c] ss:$24 sps:$4 sm:$0xff]   ;;  %v4563_v11 = vld [vmem:[#allocation5 + $0x68] ss:$24 sps:$4 sm:$0xff]  }
  0xa1   : > { %2242 = vmatprep.subr.bf16.mxu1 %v4538_v12  ;;  %v4566_v12 = vld [vmem:[#allocation5 + $0x368] ss:$24 sps:$4 sm:$0xff]  }
  0xa2   : > { %1696 = vmatmul.mubr.bf16.vlgmr.msra.gmra.mxu0 %v5493_v17 }
  0xa3   : > { %1889 = vmatmul.mubr.bf16.vlgmr.msra.gmra.mxu1 %v5495_v18  ;;  %2050 = vmatpush1.bf16.msra.mxu0 %v4533_v19  ;;  %v5557_v19 = vpack.c.bf16 %v324_v8, %v320_v7 }
  0xa4   : > { %2243 = vmatpush1.bf16.msra.mxu1 %v4536_v20  ;;  %1705 = vmatprep.mubr.bf16.mxu0 %v5497_v21  ;;  %v5559_v20 = vpack.c.bf16 %v326_v10, %v322_v9  ;;  %v4593_v9 = vld [vmem:[#allocation5 + $0x278] ss:$24 sps:$4 sm:$0xff]  }
  0xa5   : > { %1898 = vmatprep.mubr.bf16.mxu1 %v5499_v22  ;;  %2051 = vmatprep.subr.bf16.mxu0 %v4541_v23  ;;  %v4569_v23 = vld [vmem:[#allocation5 + $0x38] ss:$24 sps:$4 sm:$0xff]  }
  0xa6   : > { %2244 = vmatprep.subr.bf16.mxu1 %v4544_v30  ;;  %v325_v30 = vld [vmem:[%s5465_s17 + $0x130] sm:$0xff] }
  0xa7   : > { %2052 = vmatpush1.bf16.msra.mxu0 %v4539_v28  ;;  %v4577_v28 = vld [vmem:[#allocation5 + $0xc] ss:$24 sps:$4 sm:$0xff]   ;;  %v5575_v44 = vpack.c.bf16 %v325_v30, %v321_v27  ;;  %v4596_v10 = vld [vmem:[#allocation5 + $0x578] ss:$24 sps:$4 sm:$0xff]   ;;  %v4602_v30 = vld [vmem:[#allocation5 + $0x548] ss:$24 sps:$4 sm:$0xff]  }
  0xa8   : > { %2245 = vmatpush1.bf16.msra.mxu1 %v4542_v29  ;;  %2053 = vmatprep.subr.bf16.mxu0 %v4547_v35  ;;  %v4580_v29 = vld [vmem:[#allocation5 + $0x30c] ss:$24 sps:$4 sm:$0xff]   ;;  %v4575_v35 = vld [vmem:[#allocation5 + $0x8] ss:$24 sps:$4 sm:$0xff]   ;;  %v346_v27 = vld [vmem:[%s5465_s17 + $0x1d8] sm:$0xff] }
  0xa9   : > { %2246 = vmatprep.subr.bf16.mxu1 %v4550_v36  ;;  %v4578_v36 = vld [vmem:[#allocation5 + $0x308] ss:$24 sps:$4 sm:$0xff]  }
  0xaa   : > { %1706 = vmatmul.mubr.bf16.gmra.mxu0 %v5513_v37 }
  0xab   : > { %1899 = vmatmul.mubr.bf16.gmra.mxu1 %v5515_v38  ;;  %1715 = vmatprep.mubr.bf16.mxu0 %v5517_v39 }
  0xac   : > { %1908 = vmatprep.mubr.bf16.mxu1 %v5519_v40  ;;  %2054 = vmatpush1.bf16.msra.mxu0 %v4545_v41  ;;  %v4583_v41 = vld [vmem:[#allocation5 + $0x2dc] ss:$24 sps:$4 sm:$0xff]  }
  0xad   : > { %2247 = vmatpush1.bf16.msra.mxu1 %v4548_v42  ;;  %2055 = vmatprep.subr.bf16.mxu0 %v4553_v46  ;;  %v4586_v42 = vld [vmem:[#allocation5 + $0x5dc] ss:$24 sps:$4 sm:$0xff]   ;;  %v5579_v46 = vpack.c.bf16 %v334_v34, %v330_v33 }
  0xae   : > { %2248 = vmatprep.subr.bf16.mxu1 %v4556_v47  ;;  %v4581_v47 = vld [vmem:[#allocation5 + $0x2d8] ss:$24 sps:$4 sm:$0xff]   ;;  %v4610_v34 = vld [vmem:[#allocation5 + $0x51c] ss:$24 sps:$4 sm:$0xff]  }
  0xb0   : > { %2056 = vmatpush1.bf16.msra.mxu0 %v4551_v53  ;;  %v4589_v53 = vld [vmem:[#allocation5 + $0x2ac] ss:$24 sps:$4 sm:$0xff]  }
  0xb1   : > { %2249 = vmatpush1.bf16.msra.mxu1 %v4554_v56  ;;  %2057 = vmatprep.subr.bf16.mxu0 %v4559_v57  ;;  %v4592_v56 = vld [vmem:[#allocation5 + $0x5ac] ss:$24 sps:$4 sm:$0xff]  }
  0xb2   : > { %2250 = vmatprep.subr.bf16.mxu1 %v4562_v58  ;;  %1716 = vmatmul.mubr.bf16.gmra.mxu0 %v5533_v59  ;;  %v336_v57 = vld [vmem:[%s5465_s17 + $0x188] sm:$0xff] }
  0xb3   : > { %1909 = vmatmul.mubr.bf16.gmra.mxu1 %v5535_v60  ;;  %1725 = vmatprep.mubr.bf16.mxu0 %v5537_v61  ;;  %v340_v58 = vld [vmem:[%s5465_s17 + $0x1a8] sm:$0xff] }
  0xb4   : > { %1918 = vmatprep.mubr.bf16.mxu1 %v5539_v62  ;;  %2058 = vmatpush1.bf16.msra.mxu0 %v4557_v63  ;;  %v338_v63 = vld [vmem:[%s5465_s17 + $0x198] sm:$0xff]  ;;  %v5597_v7 = vpack.c.bf16 %v340_v58, %v336_v57  ;;  %v4611_v58 = vld [vmem:[#allocation5 + $0x1e8] ss:$24 sps:$4 sm:$0xff]  }
  0xb5   : > { %2251 = vmatpush1.bf16.msra.mxu1 %v4560_v0  ;;  %2059 = vmatprep.subr.bf16.mxu0 %v4565_v5  ;;  %v342_v0 = vld [vmem:[%s5465_s17 + $0x1b8] sm:$0xff]  ;;  %v5593_v5 = vpack.c.bf16 %v331_v50, %v327_v49  ;;  %v345_v49 = vld [vmem:[%s5465_s17 + $0x1d0] sm:$0xff] }
  0xb6   : > { %2252 = vmatprep.subr.bf16.mxu1 %v4568_v6  ;;  %v5595_v6 = vpack.c.bf16 %v333_v52, %v329_v51  ;;  %v5599_v8 = vpack.c.bf16 %v342_v0, %v338_v63  ;;  %v349_v50 = vld [vmem:[%s5465_s17 + $0x1f0] sm:$0xff]  ;;  %v352_v51 = vld [vmem:[%s5465_s17 + $0x208] sm:$0xff]  ;;  %v358_v57 = vld [vmem:[%s5465_s17 + $0x238] sm:$0xff] }
  0xb7   : > { %v356_v52 = vld [vmem:[%s5465_s17 + $0x228] sm:$0xff] }
  0xb8   : > { %2060 = vmatpush1.bf16.msra.mxu0 %v4563_v11  ;;  %v335_v11 = vld [vmem:[%s5465_s17 + $0x180] sm:$0xff] }
  0xb9   : > { %2253 = vmatpush1.bf16.msra.mxu1 %v4566_v12  ;;  %2061 = vmatprep.subr.bf16.mxu0 %v4571_v13  ;;  %v339_v12 = vld [vmem:[%s5465_s17 + $0x1a0] sm:$0xff]  ;;  %v337_v13 = vld [vmem:[%s5465_s17 + $0x190] sm:$0xff] }
  0xba   : > { %2254 = vmatprep.subr.bf16.mxu1 %v4574_v14  ;;  %1726 = vmatmul.mubr.bf16.gmra.mxu0 %v5553_v15  ;;  %v4601_v14 = vld [vmem:[#allocation5 + $0x24c] ss:$24 sps:$4 sm:$0xff]   ;;  %v5613_v32 = vpack.c.bf16 %v339_v12, %v335_v11  ;;  %v4614_v63 = vld [vmem:[#allocation5 + $0x4e8] ss:$24 sps:$4 sm:$0xff]   ;;  %v4617_v11 = vld [vmem:[#allocation5 + $0x1b8] ss:$24 sps:$4 sm:$0xff]  }
  0xbb   : > { %1919 = vmatmul.mubr.bf16.gmra.mxu1 %v5555_v16  ;;  %1735 = vmatprep.mubr.bf16.mxu0 %v5557_v19  ;;  %v4616_v0 = vld [vmem:[#allocation5 + $0x4ec] ss:$24 sps:$4 sm:$0xff]   ;;  %v4620_v12 = vld [vmem:[#allocation5 + $0x4b8] ss:$24 sps:$4 sm:$0xff]  }
  0xbc   : > { %1928 = vmatprep.mubr.bf16.mxu1 %v5559_v20  ;;  %2062 = vmatpush1.bf16.msra.mxu0 %v4569_v23  ;;  %v4604_v23 = vld [vmem:[#allocation5 + $0x54c] ss:$24 sps:$4 sm:$0xff]  }
  0xbd   : > { %2255 = vmatpush1.bf16.msra.mxu1 %v4572_v24  ;;  %2063 = vmatprep.subr.bf16.mxu0 %v4577_v28  ;;  %v341_v24 = vld [vmem:[%s5465_s17 + $0x1b0] sm:$0xff]  ;;  %v350_v28 = vld [vmem:[%s5465_s17 + $0x1f8] sm:$0xff] }
  0xbe   : > { %2256 = vmatprep.subr.bf16.mxu1 %v4580_v29  ;;  %v4599_v29 = vld [vmem:[#allocation5 + $0x248] ss:$24 sps:$4 sm:$0xff]   ;;  %v5615_v33 = vpack.c.bf16 %v341_v24, %v337_v13  ;;  %v4622_v13 = vld [vmem:[#allocation5 + $0x4bc] ss:$24 sps:$4 sm:$0xff]  }
  0xbf   : > { %v357_v24 = vld [vmem:[%s5465_s17 + $0x230] sm:$0xff] }
  0xc0   : > { %2064 = vmatpush1.bf16.msra.mxu0 %v4575_v35  ;;  %7432 = vst [vmem:[#allocation13_spill] sm:$0xff] %v5615_v33  ;;  %v5617_v35 = vpack.c.bf16 %v348_v26, %v344_v25  ;;  %v360_v25 = vld [vmem:[%s5465_s17 + $0x248] sm:$0xff] }
  0xc1   : > { %2257 = vmatpush1.bf16.msra.mxu1 %v4578_v36  ;;  %2065 = vmatprep.subr.bf16.mxu0 %v4583_v41  ;;  %v5619_v36 = vpack.c.bf16 %v350_v28, %v346_v27  ;;  %v4605_v41 = vld [vmem:[#allocation5 + $0x218] ss:$24 sps:$4 sm:$0xff]   ;;  %v364_v26 = vld [vmem:[%s5465_s17 + $0x268] sm:$0xff] }
  0xc2   : > { %2258 = vmatprep.subr.bf16.mxu1 %v4586_v42  ;;  %1736 = vmatmul.mubr.bf16.gmra.mxu0 %v5573_v43  ;;  %7433 = vst [vmem:[#allocation14_spill] sm:$0xff] %v5617_v35  ;;  %v4608_v42 = vld [vmem:[#allocation5 + $0x518] ss:$24 sps:$4 sm:$0xff]  }
  0xc3   : > { %1929 = vmatmul.mubr.bf16.gmra.mxu1 %v5575_v44  ;;  %1745 = vmatprep.mubr.bf16.mxu0 %v5577_v45  ;;  %v362_v27 = vld [vmem:[%s5465_s17 + $0x258] sm:$0xff] }
  0xc4   : > { %1938 = vmatprep.mubr.bf16.mxu1 %v5579_v46  ;;  %2066 = vmatpush2.bf16.msra.mxu0 %v4581_v47  ;;  %v343_v47 = vld [vmem:[%s5465_s17 + $0x1c0] sm:$0xff]  ;;  %v366_v28 = vld [vmem:[%s5465_s17 + $0x278] sm:$0xff] }
  0xc5   : > { %2259 = vmatpush2.bf16.msra.mxu1 %v4584_v48  ;;  %2067 = vmatprep.subr.bf16.mxu0 %v4589_v53  ;;  %v347_v48 = vld [vmem:[%s5465_s17 + $0x1e0] sm:$0xff]  ;;  %v354_v53 = vld [vmem:[%s5465_s17 + $0x218] sm:$0xff] }
  0xc6   : > { %2260 = vmatprep.subr.bf16.mxu1 %v4592_v56  ;;  %v4613_v56 = vld [vmem:[#allocation5 + $0x1ec] ss:$24 sps:$4 sm:$0xff]  }
  0xc8   : > { %2068 = vmatpush2.bf16.msra.mxu0 %v4587_v1  ;;  %v5633_v1 = vpack.c.bf16 %v347_v48, %v343_v47  ;;  %v5657_v47 = vpack.c.bf16 %v364_v26, %v360_v25  ;;  %v5659_v48 = vpack.c.bf16 %v366_v28, %v362_v27  ;;  %v376_v25 = vld [vmem:[%s5465_s17 + $0x2c8] sm:$0xff]  ;;  %v378_v27 = vld [vmem:[%s5465_s17 + $0x2d8] sm:$0xff] }
  0xc9   : > { %2261 = vmatpush2.bf16.msra.mxu1 %v4590_v2  ;;  %2069 = vmatprep.subr.bf16.mxu0 %v4595_v3  ;;  %v5635_v2 = vpack.c.bf16 %v349_v50, %v345_v49  ;;  %v5637_v3 = vpack.c.bf16 %v356_v52, %v352_v51  ;;  %v4631_v49 = vld [vmem:[#allocation5 + $0x164] ss:$24 sps:$4 sm:$0xff]   ;;  %v361_v52 = vld [vmem:[%s5465_s17 + $0x250] sm:$0xff]  ;;  %v380_v26 = vld [vmem:[%s5465_s17 + $0x2e8] sm:$0xff] }
  0xca   : > { %2262 = vmatprep.subr.bf16.mxu1 %v4598_v4  ;;  %1746 = vmatmul.mubr.bf16.gmra.mxu0 %v5593_v5  ;;  %v5639_v4 = vpack.c.bf16 %v358_v57, %v354_v53  ;;  %7437 = vst [vmem:[#allocation18_spill] sm:$0xff] %v5657_v47  ;;  %7438 = vst [vmem:[#allocation19_spill] sm:$0xff] %v5659_v48  ;;  %v359_v50 = vld [vmem:[%s5465_s17 + $0x240] sm:$0xff]  ;;  %v365_v53 = vld [vmem:[%s5465_s17 + $0x270] sm:$0xff] }
  0xcb   : > { %1939 = vmatmul.mubr.bf16.gmra.mxu1 %v5595_v6  ;;  %1755 = vmatprep.mubr.bf16.mxu0 %v5597_v7  ;;  %v363_v51 = vld [vmem:[%s5465_s17 + $0x260] sm:$0xff]  ;;  %v368_v57 = vld [vmem:[%s5465_s17 + $0x288] sm:$0xff]  ;;  %v382_v28 = vld [vmem:[%s5465_s17 + $0x2f8] sm:$0xff] }
  0xcc   : > { %1948 = vmatprep.mubr.bf16.mxu1 %v5599_v8  ;;  %2070 = vmatpush2.bf16.msra.mxu0 %v4593_v9  ;;  %7434 = vst [vmem:[#allocation15_spill] sm:$0xff] %v5639_v4  ;;  %v4619_v9 = vld [vmem:[#allocation5 + $0x1bc] ss:$24 sps:$4 sm:$0xff]  }
  0xcd   : > { %2263 = vmatpush2.bf16.msra.mxu1 %v4596_v10  ;;  %2071 = vmatprep.subr.bf16.mxu0 %v4601_v14  ;;  %v351_v10 = vld [vmem:[%s5465_s17 + $0x200] sm:$0xff] }
  0xce   : > { %2264 = vmatprep.subr.bf16.mxu1 %v4604_v23  ;;  %v355_v14 = vld [vmem:[%s5465_s17 + $0x220] sm:$0xff]  ;;  %v353_v23 = vld [vmem:[%s5465_s17 + $0x210] sm:$0xff] }
  0xd0   : > { %2072 = vmatpush2.bf16.msra.mxu0 %v4599_v29  ;;  %v4623_v29 = vld [vmem:[#allocation5 + $0x188] ss:$24 sps:$4 sm:$0xff]  }
  0xd1   : > { %2265 = vmatpush2.bf16.msra.mxu1 %v4602_v30  ;;  %2073 = vmatprep.subr.bf16.mxu0 %v4607_v31  ;;  %v4625_v30 = vld [vmem:[#allocation5 + $0x18c] ss:$24 sps:$4 sm:$0xff]   ;;  %v5653_v31 = vpack.c.bf16 %v355_v14, %v351_v10  ;;  %v5675_v10 = vpack.c.bf16 %v365_v53, %v361_v52  ;;  %v381_v52 = vld [vmem:[%s5465_s17 + $0x2f0] sm:$0xff] }
  0xd2   : > { %2266 = vmatprep.subr.bf16.mxu1 %v4610_v34  ;;  %1756 = vmatmul.mubr.bf16.gmra.mxu0 %v5613_v32  ;;  %v5655_v34 = vpack.c.bf16 %v357_v24, %v353_v23  ;;  %v371_v14 = vld [vmem:[%s5465_s17 + $0x2a0] sm:$0xff]  ;;  %v369_v23 = vld [vmem:[%s5465_s17 + $0x290] sm:$0xff]  ;;  %v384_v53 = vld [vmem:[%s5465_s17 + $0x308] sm:$0xff] }
  0xd3   : > { %1949 = vmatmul.mubr.bf16.gmra.mxu1 %v5615_v33  ;;  %1765 = vmatprep.mubr.bf16.mxu0 %v5617_v35  ;;  %7435 = vst [vmem:[#allocation16_spill] sm:$0xff] %v5653_v31  ;;  %7440 = vst [vmem:[#allocation21_spill] sm:$0xff] %v5675_v10  ;;  %v373_v24 = vld [vmem:[%s5465_s17 + $0x2b0] sm:$0xff] }
  0xd4   : > { %1958 = vmatprep.mubr.bf16.mxu1 %v5619_v36  ;;  %2074 = vmatpush2.bf16.msra.mxu0 %v4605_v41  ;;  %7436 = vst [vmem:[#allocation17_spill] sm:$0xff] %v5655_v34  ;;  %v4626_v41 = vld [vmem:[#allocation5 + $0x488] ss:$24 sps:$4 sm:$0xff]  }
  0xd5   : > { %2267 = vmatpush2.bf16.msra.mxu1 %v4608_v42  ;;  %2075 = vmatprep.subr.bf16.mxu0 %v4613_v56  ;;  %v4628_v42 = vld [vmem:[#allocation5 + $0x48c] ss:$24 sps:$4 sm:$0xff]  }
  0xd6   : > { %2268 = vmatprep.subr.bf16.mxu1 %v4616_v0  ;;  %v4634_v56 = vld [vmem:[#allocation5 + $0x464] ss:$24 sps:$4 sm:$0xff]  }
  0xd7   : > { %v374_v0 = vld [vmem:[%s5465_s17 + $0x2b8] sm:$0xff] }
  0xd8   : > { %2076 = vmatpush2.bf16.msra.mxu0 %v4611_v58  ;;  %v372_v58 = vld [vmem:[%s5465_s17 + $0x2a8] sm:$0xff] }
  0xd9   : > { %2269 = vmatpush2.bf16.msra.mxu1 %v4614_v63  ;;  %2077 = vmatprep.subr.bf16.mxu0 %v4619_v9  ;;  %v370_v63 = vld [vmem:[%s5465_s17 + $0x298] sm:$0xff]  ;;  %v5673_v9 = vpack.c.bf16 %v363_v51, %v359_v50  ;;  %v379_v50 = vld [vmem:[%s5465_s17 + $0x2e0] sm:$0xff]  ;;  %v377_v51 = vld [vmem:[%s5465_s17 + $0x2d0] sm:$0xff] }
  0xda   : > { %1766 = vmatmul.mubr.bf16.gmra.mxu0 %v5633_v1  ;;  %2270 = vmatprep.subr.bf16.mxu1 %v4622_v13  ;;  %v367_v13 = vld [vmem:[%s5465_s17 + $0x280] sm:$0xff] }
  0xdb   : > { %1959 = vmatmul.mubr.bf16.gmra.mxu1 %v5635_v2  ;;  %1775 = vmatprep.mubr.bf16.mxu0 %v5637_v3  ;;  %7439 = vst [vmem:[#allocation20_spill] sm:$0xff] %v5673_v9 }
  0xdc   : > { %1968 = vmatprep.mubr.bf16.mxu1 %v5639_v4  ;;  %2078 = vmatpush2.bf16.msra.mxu0 %v4617_v11  ;;  %v5677_v11 = vpack.c.bf16 %v372_v58, %v368_v57  ;;  %v386_v57 = vld [vmem:[%s5465_s17 + $0x318] sm:$0xff] }
  0xdd   : > { %2271 = vmatpush2.bf16.msra.mxu1 %v4620_v12  ;;  %2079 = vmatprep.subr.bf16.mxu0 %v4625_v30  ;;  %v5679_v12 = vpack.c.bf16 %v374_v0, %v370_v63  ;;  %v5695_v30 = vpack.c.bf16 %v373_v24, %v369_v23  ;;  %v390_v58 = vld [vmem:[%s5465_s17 + $0x338] sm:$0xff]  ;;  %v5715_v0 = vpack.c.bf16 %v381_v52, %v377_v51  ;;  %v383_v23 = vld [vmem:[%s5465_s17 + $0x300] sm:$0xff] }
  0xde   : > { %2272 = vmatprep.subr.bf16.mxu1 %v4628_v42  ;;  %7441 = vst [vmem:[#allocation22_spill] sm:$0xff] %v5677_v11  ;;  %v5699_v42 = vpack.c.bf16 %v382_v28, %v378_v27  ;;  %v387_v24 = vld [vmem:[%s5465_s17 + $0x320] sm:$0xff]  ;;  %v392_v27 = vld [vmem:[%s5465_s17 + $0x348] sm:$0xff] }
  0xdf   : > { %7442 = vst [vmem:[#allocation23_spill] sm:$0xff] %v5679_v12  ;;  %7444 = vst [vmem:[#allocation25_spill] sm:$0xff] %v5695_v30  ;;  %v396_v28 = vld [vmem:[%s5465_s17 + $0x368] sm:$0xff]  ;;  %v5733_v51 = vpack.c.bf16 %v387_v24, %v383_v23  ;;  %v402_v24 = vld [vmem:[%s5465_s17 + $0x398] sm:$0xff] }
  0xe0   : > { %2080 = vmatpush2.bf16.msra.mxu0 %v4623_v29  ;;  %v5693_v29 = vpack.c.bf16 %v371_v14, %v367_v13  ;;  %7446 = vst [vmem:[#allocation27_spill] sm:$0xff] %v5699_v42  ;;  %7448 = vst [vmem:[#allocation29_spill] sm:$0xff] %v5715_v0  ;;  %v5719_v14 = vpack.c.bf16 %v390_v58, %v386_v57  ;;  %v391_v57 = vld [vmem:[%s5465_s17 + $0x340] sm:$0xff]  ;;  %v404_v23 = vld [vmem:[%s5465_s17 + $0x3a8] sm:$0xff] }
  0xe1   : > { %2273 = vmatpush2.bf16.msra.mxu1 %v4626_v41  ;;  %2435 = vmatprep.subr.bf16.mxu0 %v4631_v49  ;;  %v5697_v41 = vpack.c.bf16 %v380_v26, %v376_v25  ;;  %v375_v49 = vld [vmem:[%s5465_s17 + $0x2c0] sm:$0xff]  ;;  %v385_v25 = vld [vmem:[%s5465_s17 + $0x310] sm:$0xff]  ;;  %7451 = vst [vmem:[#allocation32_spill] sm:$0xff] %v5733_v51 }
  0xe2   : > { %1776 = vmatmul.mubr.bf16.gmra.mxu0 %v5653_v31  ;;  %2628 = vmatprep.subr.bf16.mxu1 %v4634_v56  ;;  %7443 = vst [vmem:[#allocation24_spill] sm:$0xff] %v5693_v29  ;;  %v388_v56 = vld [vmem:[%s5465_s17 + $0x328] sm:$0xff]  ;;  %v5713_v63 = vpack.c.bf16 %v379_v50, %v375_v49  ;;  %7450 = vst [vmem:[#allocation31_spill] sm:$0xff] %v5719_v14  ;;  %v389_v26 = vld [vmem:[%s5465_s17 + $0x330] sm:$0xff] }
  0xe3   : > { %1969 = vmatmul.mubr.bf16.gmra.mxu1 %v5655_v34  ;;  %1785 = vmatprep.mubr.bf16.mxu0 %v5657_v47  ;;  %7445 = vst [vmem:[#allocation26_spill] sm:$0xff] %v5697_v41  ;;  %v5717_v13 = vpack.c.bf16 %v388_v56, %v384_v53  ;;  %v394_v49 = vld [vmem:[%s5465_s17 + $0x358] sm:$0xff]  ;;  %v5735_v52 = vpack.c.bf16 %v389_v26, %v385_v25  ;;  %v395_v58 = vld [vmem:[%s5465_s17 + $0x360] sm:$0xff] }
  0xe4   : > { %1978 = vmatprep.mubr.bf16.mxu1 %v5659_v48  ;;  %7447 = vst [vmem:[#allocation28_spill] sm:$0xff] %v5713_v63  ;;  %v398_v50 = vld [vmem:[%s5465_s17 + $0x378] sm:$0xff]  ;;  %v5737_v53 = vpack.c.bf16 %v396_v28, %v392_v27  ;;  %v5753_v26 = vpack.c.bf16 %v395_v58, %v391_v57  ;;  %v401_v57 = vld [vmem:[%s5465_s17 + $0x390] sm:$0xff] }
  0xe5   : > { %7449 = vst [vmem:[#allocation30_spill] sm:$0xff] %v5717_v13  ;;  %7452 = vst [vmem:[#allocation33_spill] sm:$0xff] %v5735_v52  ;;  %v5739_v56 = vpack.c.bf16 %v398_v50, %v394_v49  ;;  %v406_v25 = vld [vmem:[%s5465_s17 + $0x3b8] sm:$0xff]  ;;  %v399_v50 = vld [vmem:[%s5465_s17 + $0x380] sm:$0xff] }
  0xe6   : > { %7453 = vst [vmem:[#allocation34_spill] sm:$0xff] %v5737_v53  ;;  %7455 = vst [vmem:[#allocation36_spill] sm:$0xff] %v5753_v26  ;;  %v5759_v49 = vpack.c.bf16 %v406_v25, %v402_v24  ;;  %v410_v58 = vld [vmem:[%s5465_s17 + $0x3d8] sm:$0xff] }
  0xe7   : > { %7454 = vst [vmem:[#allocation35_spill] sm:$0xff] %v5739_v56 }
  0xe8   : > { %7458 = vst [vmem:[#allocation39_spill] sm:$0xff] %v5759_v49 }
  0xea   : > { %1786 = vmatmul.mubr.bf16.gmra.mxu0 %v5673_v9 }
  0xeb   : > { %1979 = vmatmul.mubr.bf16.gmra.mxu1 %v5675_v10  ;;  %1795 = vmatprep.mubr.bf16.mxu0 %v5677_v11 }
  0xec   : > { %1988 = vmatprep.mubr.bf16.mxu1 %v5679_v12 }
  0xf2   : > { %1796 = vmatmul.mubr.bf16.gmra.mxu0 %v5693_v29 }
  0xf3   : > { %1989 = vmatmul.mubr.bf16.gmra.mxu1 %v5695_v30  ;;  %1805 = vmatprep.mubr.bf16.mxu0 %v5697_v41 }
  0xf4   : > { %1998 = vmatprep.mubr.bf16.mxu1 %v5699_v42 }
  0xfa   : > { %1806 = vmatmul.mubr.bf16.gmra.mxu0 %v5713_v63 }
  0xfb   : > { %1999 = vmatmul.mubr.bf16.gmra.mxu1 %v5715_v0  ;;  %1815 = vmatprep.mubr.bf16.mxu0 %v5717_v13  ;;  %v393_v0 = vld [vmem:[%s5465_s17 + $0x350] sm:$0xff] }
  0xfc   : > { %2008 = vmatprep.mubr.bf16.mxu1 %v5719_v14  ;;  %v397_v13 = vld [vmem:[%s5465_s17 + $0x370] sm:$0xff]  ;;  %v400_v14 = vld [vmem:[%s5465_s17 + $0x388] sm:$0xff] }
  0xfd   : > { %v5755_v27 = vpack.c.bf16 %v397_v13, %v393_v0  ;;  %v5757_v28 = vpack.c.bf16 %v404_v23, %v400_v14  ;;  %v405_v0 = vld [vmem:[%s5465_s17 + $0x3b0] sm:$0xff]  ;;  %v408_v13 = vld [vmem:[%s5465_s17 + $0x3c8] sm:$0xff]  ;;  %v414_v23 = vld [vmem:[%s5465_s17 + $0x3f8] sm:$0xff] }
  0xfe   : > { %v412_v14 = vld [vmem:[%s5465_s17 + $0x3e8] sm:$0xff]  ;;  %v5775_v25 = vpack.c.bf16 %v405_v0, %v401_v57  ;;  %v4629_v57 = vld [vmem:[#allocation5 + $0x160] ss:$24 sps:$4 sm:$0xff]  }
  0xff   : > { %7456 = vst [vmem:[#allocation37_spill] sm:$0xff] %v5755_v27  ;;  %7457 = vst [vmem:[#allocation38_spill] sm:$0xff] %v5757_v28  ;;  %v4632_v0 = vld [vmem:[#allocation5 + $0x460] ss:$24 sps:$4 sm:$0xff]  }
 0x100   : > { %7460 = vst [vmem:[#allocation41_spill] sm:$0xff] %v5775_v25 }
 0x102   : > { %1816 = vmatmul.mubr.bf16.gmra.mxu0 %v5733_v51 }
 0x103   : > { %2009 = vmatmul.mubr.bf16.gmra.mxu1 %v5735_v52  ;;  %1825 = vmatprep.mubr.bf16.mxu0 %v5737_v53  ;;  %v403_v53 = vld [vmem:[%s5465_s17 + $0x3a0] sm:$0xff]  ;;  %v413_v52 = vld [vmem:[%s5465_s17 + $0x3f0] sm:$0xff] }
 0x104   : > { %2018 = vmatprep.mubr.bf16.mxu1 %v5739_v56  ;;  %v5773_v24 = vpack.c.bf16 %v403_v53, %v399_v50  ;;  %v409_v56 = vld [vmem:[%s5465_s17 + $0x3d0] sm:$0xff] }
 0x105   : > { %v5791_v50 = vpack.c.bf16 %v413_v52, %v409_v56  ;;  %v4635_v52 = vld [vmem:[#allocation5 + $0x130] ss:$24 sps:$4 sm:$0xff]  }
 0x106   : > { %7459 = vst [vmem:[#allocation40_spill] sm:$0xff] %v5773_v24  ;;  %v4638_v56 = vld [vmem:[#allocation5 + $0x430] ss:$24 sps:$4 sm:$0xff]  }
 0x107   : > { %7464 = vst [vmem:[#allocation45_spill] sm:$0xff] %v5791_v50 }
 0x10a   : > { %1826 = vmatmul.mubr.bf16.gmra.mxu0 %v5753_v26  ;;  %v5779_v26 = vpack.c.bf16 %v414_v23, %v410_v58  ;;  %v4641_v58 = vld [vmem:[#allocation5 + $0x100] ss:$24 sps:$4 sm:$0xff]  }
 0x10b   : > { %2019 = vmatmul.mubr.bf16.gmra.mxu1 %v5755_v27  ;;  %1835 = vmatprep.mubr.bf16.mxu0 %v5757_v28  ;;  %v5777_v27 = vpack.c.bf16 %v412_v14, %v408_v13  ;;  %v411_v28 = vld [vmem:[%s5465_s17 + $0x3e0] sm:$0xff]  ;;  %v4637_v13 = vld [vmem:[#allocation5 + $0x134] ss:$24 sps:$4 sm:$0xff]  }
 0x10c   : > { %2028 = vmatprep.mubr.bf16.mxu1 %v5759_v49  ;;  %7462 = vst [vmem:[#allocation43_spill] sm:$0xff] %v5779_v26  ;;  %v407_v49 = vld [vmem:[%s5465_s17 + $0x3c0] sm:$0xff]  ;;  %v4640_v14 = vld [vmem:[#allocation5 + $0x434] ss:$24 sps:$4 sm:$0xff]  }
 0x10d   : > { %7461 = vst [vmem:[#allocation42_spill] sm:$0xff] %v5777_v27  ;;  %v5789_v53 = vpack.c.bf16 %v411_v28, %v407_v49  ;;  %v4643_v28 = vld [vmem:[#allocation5 + $0x104] ss:$24 sps:$4 sm:$0xff]   ;;  %v4644_v23 = vld [vmem:[#allocation5 + $0x400] ss:$24 sps:$4 sm:$0xff]  }
 0x10e   : > { %v4646_v49 = vld [vmem:[#allocation5 + $0x404] ss:$24 sps:$4 sm:$0xff]  }
 0x10f   : > { %7463 = vst [vmem:[#allocation44_spill] sm:$0xff] %v5789_v53 }
 0x112   : > { %1836 = vmatmul.mubr.bf16.gmra.mxu0 %v5773_v24 }
 0x113   : > { %2029 = vmatmul.mubr.bf16.gmra.mxu1 %v5775_v25  ;;  %1845 = vmatprep.mubr.bf16.mxu0 %v5777_v27 }
 0x114   : > { %2038 = vmatprep.mubr.bf16.mxu1 %v5779_v26 }
 0x11a   : > { %1846 = vmatmul.mubr.bf16.gmra.mxu0 %v5789_v53 }
 0x11b   : > { %2039 = vmatmul.mubr.bf16.gmra.mxu1 %v5791_v50  ;;  %2081 = vmatprep.mubr.bf16.mxu0 %v5479_v54 }
 0x11c   : > { %2274 = vmatprep.mubr.bf16.mxu1 %v5481_v55 }
 0x122   : > { %2082 = vmatmul.mubr.bf16.vlgmr.msra.gmra.mxu0 %v5493_v17  ;;  %v4649_v17 = vld [vmem:[#allocation5 + $0xd4] ss:$24 sps:$4 sm:$0xff]  }
 0x123   : > { %2275 = vmatmul.mubr.bf16.vlgmr.msra.gmra.mxu1 %v5495_v18  ;;  %2436 = vmatpush1.bf16.msra.mxu0 %v4629_v57  ;;  %v4652_v18 = vld [vmem:[#allocation5 + $0x3d4] ss:$24 sps:$4 sm:$0xff]   ;;  %v4647_v57 = vld [vmem:[#allocation5 + $0xd0] ss:$24 sps:$4 sm:$0xff]  }
 0x124   : > { %2629 = vmatpush1.bf16.msra.mxu1 %v4632_v0  ;;  %2091 = vmatprep.mubr.bf16.mxu0 %v5497_v21  ;;  %v4650_v0 = vld [vmem:[#allocation5 + $0x3d0] ss:$24 sps:$4 sm:$0xff]  }
 0x125   : > { %2284 = vmatprep.mubr.bf16.mxu1 %v5499_v22  ;;  %2437 = vmatprep.subr.bf16.mxu0 %v4637_v13  ;;  %v4655_v13 = vld [vmem:[#allocation5 + $0xa4] ss:$24 sps:$4 sm:$0xff]  }
 0x126   : > { %2630 = vmatprep.subr.bf16.mxu1 %v4640_v14  ;;  %v4658_v14 = vld [vmem:[#allocation5 + $0x3a4] ss:$24 sps:$4 sm:$0xff]  }
 0x127   : > { %2438 = vmatpush1.bf16.msra.mxu0 %v4635_v52  ;;  %v4653_v52 = vld [vmem:[#allocation5 + $0xa0] ss:$24 sps:$4 sm:$0xff]  }
 0x128   : > { %2631 = vmatpush1.bf16.msra.mxu1 %v4638_v56  ;;  %2439 = vmatprep.subr.bf16.mxu0 %v4643_v28  ;;  %v4656_v56 = vld [vmem:[#allocation5 + $0x3a0] ss:$24 sps:$4 sm:$0xff]   ;;  %v4661_v28 = vld [vmem:[#allocation5 + $0x74] ss:$24 sps:$4 sm:$0xff]  }
 0x129   : > { %2632 = vmatprep.subr.bf16.mxu1 %v4646_v49  ;;  %v4664_v49 = vld [vmem:[#allocation5 + $0x374] ss:$24 sps:$4 sm:$0xff]  }
 0x12a   : > { %2092 = vmatmul.mubr.bf16.gmra.mxu0 %v5513_v37 }
 0x12b   : > { %2285 = vmatmul.mubr.bf16.gmra.mxu1 %v5515_v38  ;;  %2101 = vmatprep.mubr.bf16.mxu0 %v5517_v39 }
 0x12c   : > { %2294 = vmatprep.mubr.bf16.mxu1 %v5519_v40  ;;  %2440 = vmatpush1.bf16.msra.mxu0 %v4641_v58  ;;  %v4667_v58 = vld [vmem:[#allocation5 + $0x44] ss:$24 sps:$4 sm:$0xff]  }
 0x12d   : > { %2633 = vmatpush1.bf16.msra.mxu1 %v4644_v23  ;;  %2441 = vmatprep.subr.bf16.mxu0 %v4649_v17  ;;  %v4659_v17 = vld [vmem:[#allocation5 + $0x70] ss:$24 sps:$4 sm:$0xff]   ;;  %v4670_v23 = vld [vmem:[#allocation5 + $0x344] ss:$24 sps:$4 sm:$0xff]  }
 0x12e   : > { %2634 = vmatprep.subr.bf16.mxu1 %v4652_v18  ;;  %v4662_v18 = vld [vmem:[#allocation5 + $0x370] ss:$24 sps:$4 sm:$0xff]  }
 0x130   : > { %2442 = vmatpush1.bf16.msra.mxu0 %v4647_v57  ;;  %v4665_v57 = vld [vmem:[#allocation5 + $0x40] ss:$24 sps:$4 sm:$0xff]  }
 0x131   : > { %2635 = vmatpush1.bf16.msra.mxu1 %v4650_v0  ;;  %2443 = vmatprep.subr.bf16.mxu0 %v4655_v13  ;;  %v4668_v0 = vld [vmem:[#allocation5 + $0x340] ss:$24 sps:$4 sm:$0xff]   ;;  %v4673_v13 = vld [vmem:[#allocation5 + $0x14] ss:$24 sps:$4 sm:$0xff]  }
 0x132   : > { %2636 = vmatprep.subr.bf16.mxu1 %v4658_v14  ;;  %2102 = vmatmul.mubr.bf16.gmra.mxu0 %v5533_v59  ;;  %v4676_v14 = vld [vmem:[#allocation5 + $0x314] ss:$24 sps:$4 sm:$0xff]  }
 0x133   : > { %2295 = vmatmul.mubr.bf16.gmra.mxu1 %v5535_v60  ;;  %2111 = vmatprep.mubr.bf16.mxu0 %v5537_v61 }
 0x134   : > { %2304 = vmatprep.mubr.bf16.mxu1 %v5539_v62  ;;  %2444 = vmatpush1.bf16.msra.mxu0 %v4653_v52  ;;  %v4671_v52 = vld [vmem:[#allocation5 + $0x10] ss:$24 sps:$4 sm:$0xff]  }
 0x135   : > { %2637 = vmatpush1.bf16.msra.mxu1 %v4656_v56  ;;  %2445 = vmatprep.subr.bf16.mxu0 %v4661_v28  ;;  %v4674_v56 = vld [vmem:[#allocation5 + $0x310] ss:$24 sps:$4 sm:$0xff]   ;;  %v4679_v28 = vld [vmem:[#allocation5 + $0x2e4] ss:$24 sps:$4 sm:$0xff]  }
 0x136   : > { %2638 = vmatprep.subr.bf16.mxu1 %v4664_v49  ;;  %v4682_v49 = vld [vmem:[#allocation5 + $0x5e4] ss:$24 sps:$4 sm:$0xff]  }
 0x138   : > { %2446 = vmatpush1.bf16.msra.mxu0 %v4659_v17  ;;  %v4677_v17 = vld [vmem:[#allocation5 + $0x2e0] ss:$24 sps:$4 sm:$0xff]  }
 0x139   : > { %2639 = vmatpush1.bf16.msra.mxu1 %v4662_v18  ;;  %2447 = vmatprep.subr.bf16.mxu0 %v4667_v58  ;;  %v4680_v18 = vld [vmem:[#allocation5 + $0x5e0] ss:$24 sps:$4 sm:$0xff]   ;;  %v4685_v58 = vld [vmem:[#allocation5 + $0x2b4] ss:$24 sps:$4 sm:$0xff]  }
 0x13a   : > { %2640 = vmatprep.subr.bf16.mxu1 %v4670_v23  ;;  %2112 = vmatmul.mubr.bf16.gmra.mxu0 %v5553_v15  ;;  %v4688_v23 = vld [vmem:[#allocation5 + $0x5b4] ss:$24 sps:$4 sm:$0xff]  }
 0x13b   : > { %2305 = vmatmul.mubr.bf16.gmra.mxu1 %v5555_v16  ;;  %2121 = vmatprep.mubr.bf16.mxu0 %v5557_v19 }
 0x13c   : > { %2314 = vmatprep.mubr.bf16.mxu1 %v5559_v20  ;;  %2448 = vmatpush1.bf16.msra.mxu0 %v4665_v57  ;;  %v4683_v57 = vld [vmem:[#allocation5 + $0x2b0] ss:$24 sps:$4 sm:$0xff]  }
 0x13d   : > { %2641 = vmatpush1.bf16.msra.mxu1 %v4668_v0  ;;  %2449 = vmatprep.subr.bf16.mxu0 %v4673_v13  ;;  %v4686_v0 = vld [vmem:[#allocation5 + $0x5b0] ss:$24 sps:$4 sm:$0xff]   ;;  %v4691_v13 = vld [vmem:[#allocation5 + $0x284] ss:$24 sps:$4 sm:$0xff]  }
 0x13e   : > { %2642 = vmatprep.subr.bf16.mxu1 %v4676_v14  ;;  %v4694_v14 = vld [vmem:[#allocation5 + $0x584] ss:$24 sps:$4 sm:$0xff]  }
 0x140   : > { %2450 = vmatpush1.bf16.msra.mxu0 %v4671_v52  ;;  %v4689_v52 = vld [vmem:[#allocation5 + $0x280] ss:$24 sps:$4 sm:$0xff]  }
 0x141   : > { %2643 = vmatpush1.bf16.msra.mxu1 %v4674_v56  ;;  %2451 = vmatprep.subr.bf16.mxu0 %v4679_v28  ;;  %v4692_v56 = vld [vmem:[#allocation5 + $0x580] ss:$24 sps:$4 sm:$0xff]   ;;  %v4697_v28 = vld [vmem:[#allocation5 + $0x254] ss:$24 sps:$4 sm:$0xff]  }
 0x142   : > { %2644 = vmatprep.subr.bf16.mxu1 %v4682_v49  ;;  %2122 = vmatmul.mubr.bf16.gmra.mxu0 %v5573_v43  ;;  %v4700_v49 = vld [vmem:[#allocation5 + $0x554] ss:$24 sps:$4 sm:$0xff]  }
 0x143   : > { %2315 = vmatmul.mubr.bf16.gmra.mxu1 %v5575_v44  ;;  %2131 = vmatprep.mubr.bf16.mxu0 %v5577_v45 }
 0x144   : > { %2324 = vmatprep.mubr.bf16.mxu1 %v5579_v46  ;;  %2452 = vmatpush2.bf16.msra.mxu0 %v4677_v17  ;;  %v4695_v17 = vld [vmem:[#allocation5 + $0x250] ss:$24 sps:$4 sm:$0xff]  }
 0x145   : > { %2645 = vmatpush2.bf16.msra.mxu1 %v4680_v18  ;;  %2453 = vmatprep.subr.bf16.mxu0 %v4685_v58  ;;  %v4698_v18 = vld [vmem:[#allocation5 + $0x550] ss:$24 sps:$4 sm:$0xff]   ;;  %v4703_v58 = vld [vmem:[#allocation5 + $0x224] ss:$24 sps:$4 sm:$0xff]  }
 0x146   : > { %2646 = vmatprep.subr.bf16.mxu1 %v4688_v23  ;;  %v4706_v23 = vld [vmem:[#allocation5 + $0x524] ss:$24 sps:$4 sm:$0xff]  }
 0x148   : > { %2454 = vmatpush2.bf16.msra.mxu0 %v4683_v57  ;;  %v4701_v57 = vld [vmem:[#allocation5 + $0x220] ss:$24 sps:$4 sm:$0xff]  }
 0x149   : > { %2647 = vmatpush2.bf16.msra.mxu1 %v4686_v0  ;;  %2455 = vmatprep.subr.bf16.mxu0 %v4691_v13  ;;  %v4704_v0 = vld [vmem:[#allocation5 + $0x520] ss:$24 sps:$4 sm:$0xff]   ;;  %v4709_v13 = vld [vmem:[#allocation5 + $0x1f4] ss:$24 sps:$4 sm:$0xff]  }
 0x14a   : > { %2648 = vmatprep.subr.bf16.mxu1 %v4694_v14  ;;  %2132 = vmatmul.mubr.bf16.gmra.mxu0 %v5593_v5  ;;  %v4712_v14 = vld [vmem:[#allocation5 + $0x4f4] ss:$24 sps:$4 sm:$0xff]  }
 0x14b   : > { %2325 = vmatmul.mubr.bf16.gmra.mxu1 %v5595_v6  ;;  %2141 = vmatprep.mubr.bf16.mxu0 %v5597_v7 }
 0x14c   : > { %2334 = vmatprep.mubr.bf16.mxu1 %v5599_v8  ;;  %2456 = vmatpush2.bf16.msra.mxu0 %v4689_v52  ;;  %v673_v52 = vlaneseq }
 0x14d   : > { %2649 = vmatpush2.bf16.msra.mxu1 %v4692_v56  ;;  %2457 = vmatprep.subr.bf16.mxu0 %v4697_v28  ;;  %v4707_v56 = vld [vmem:[#allocation5 + $0x1f0] ss:$24 sps:$4 sm:$0xff]  }
 0x14e   : > { %2650 = vmatprep.subr.bf16.mxu1 %v4700_v49  ;;  %v4710_v28 = vld [vmem:[#allocation5 + $0x4f0] ss:$24 sps:$4 sm:$0xff]   ;;  %v4715_v49 = vld [vmem:[#allocation5 + $0x1c4] ss:$24 sps:$4 sm:$0xff]  }
 0x150   : > { %2458 = vmatpush2.bf16.msra.mxu0 %v4695_v17  ;;  %v4718_v17 = vld [vmem:[#allocation5 + $0x4c4] ss:$24 sps:$4 sm:$0xff]  }
 0x151   : > { %2651 = vmatpush2.bf16.msra.mxu1 %v4698_v18  ;;  %2459 = vmatprep.subr.bf16.mxu0 %v4703_v58  ;;  %v5825_v18 = vshrl.u32 %v673_v52, 7  ;;  %v4713_v58 = vld [vmem:[#allocation5 + $0x1c0] ss:$24 sps:$4 sm:$0xff]  }
 0x152   : > { %2652 = vmatprep.subr.bf16.mxu1 %v4706_v23  ;;  %2142 = vmatmul.mubr.bf16.gmra.mxu0 %v5613_v32  ;;  %v4716_v23 = vld [vmem:[#allocation5 + $0x4c0] ss:$24 sps:$4 sm:$0xff]  }
 0x153   : > { %2335 = vmatmul.mubr.bf16.gmra.mxu1 %v5615_v33  ;;  %2151 = vmatprep.mubr.bf16.mxu0 %v5617_v35  ;;  %7465 = vst [vmem:[#allocation46_spill] sm:$0xff] %v5825_v18  ;;  %v4721_v35 = vld [vmem:[#allocation5 + $0x194] ss:$24 sps:$4 sm:$0xff]   ;;  %v7391_v52 = vsub.s32 1, %v5825_v18 }
 0x154   : > { %2344 = vmatprep.mubr.bf16.mxu1 %v5619_v36  ;;  %2460 = vmatpush2.bf16.msra.mxu0 %v4701_v57  ;;  %v4724_v33 = vld [vmem:[#allocation5 + $0x494] ss:$24 sps:$4 sm:$0xff]   ;;  %v7392_v57 = vsub.s32 0, %v5825_v18 }
 0x155   : > { %2653 = vmatpush2.bf16.msra.mxu1 %v4704_v0  ;;  %2461 = vmatprep.subr.bf16.mxu0 %v4709_v13  ;;  %v5832_v0 = vld [vmem:[#allocation7] sm:$0x3f]  ;;  %v4719_v13 = vld [vmem:[#allocation5 + $0x190] ss:$24 sps:$4 sm:$0xff]  }
 0x156   : > { %2654 = vmatprep.subr.bf16.mxu1 %v4712_v14  ;;  %7466 = vst [vmem:[#allocation47_spill] sm:$0xff] %v5832_v0  ;;  %v4722_v14 = vld [vmem:[#allocation5 + $0x490] ss:$24 sps:$4 sm:$0xff]  }
 0x158   : > { %2462 = vmatpush2.bf16.msra.mxu0 %v4707_v56  ;;  %v5838_v56 = vrot.slane %v5832_v0, %v7392_v57 }
 0x159   : > { %2655 = vmatpush2.bf16.msra.mxu1 %v4710_v28  ;;  %2463 = vmatprep.subr.bf16.mxu0 %v4715_v49  ;;  %v5843_v28 = vrot.slane %v5832_v0, %v7391_v52 }
 0x15a   : > { %2656 = vmatprep.subr.bf16.mxu1 %v4718_v17  ;;  %2152 = vmatmul.mubr.bf16.gmra.mxu0 %v5633_v1 }
 0x15b   : > { %2345 = vmatmul.mubr.bf16.gmra.mxu1 %v5635_v2  ;;  %2161 = vmatprep.mubr.bf16.mxu0 %v5637_v3 }
 0x15c   : > { %2354 = vmatprep.mubr.bf16.mxu1 %v5639_v4  ;;  %2464 = vmatpush2.bf16.msra.mxu0 %v4713_v58 }
 0x15d   : > { %2657 = vmatpush2.bf16.msra.mxu1 %v4716_v23  ;;  %2465 = vmatprep.subr.bf16.mxu0 %v4721_v35 }
 0x15e   : > { %2658 = vmatprep.subr.bf16.mxu1 %v4724_v33 }
 0x160   : > { %2466 = vmatpush2.bf16.msra.mxu0 %v4719_v13 }
 0x161   : > { %2659 = vmatpush2.bf16.msra.mxu1 %v4722_v14 }
 0x162   : > { %v1697_v49 = vpop.f32.mrf.mxu0  ;;  %2162 = vmatmul.mubr.bf16.gmra.mxu0 %v5653_v31 }
 0x163   : > { %v1890_v17 = vpop.f32.mrf.mxu1  ;;  %2355 = vmatmul.mubr.bf16.gmra.mxu1 %v5655_v34  ;;  %v1698_v33 = vadd.f32 %v1697_v49, %v5838_v56  ;;  %2171 = vmatprep.mubr.bf16.mxu0 %v5657_v47 }
 0x164   : > { %2364 = vmatprep.mubr.bf16.mxu1 %v5659_v48  ;;  %v1699_v35 = vpop.f32.mrf.mxu0 }
 0x165   : > { %v1892_v58 = vpop.f32.mrf.mxu1  ;;  %v5850_v23 = vadd.f32 %v1890_v17, %v1698_v33  ;;  %v1700_v13 = vadd.f32 %v1699_v35, %v5843_v28 }
 0x166   : > { %v1701_v14 = vpop.f32.mrf.mxu0 }
 0x167   : > { %v1894_v52 = vpop.f32.mrf.mxu1  ;;  %v5853_v57 = vadd.f32 %v1892_v58, %v1700_v13  ;;  %v1702_v31 = vadd.f32 %v1701_v14, %v5838_v56  ;;  %4725 = vtanh.f32 %v5850_v23 }
 0x168   : > { %v1703_v0 = vpop.f32.mrf.mxu0 }
 0x169   : > { %v1896_v34 = vpop.f32.mrf.mxu1  ;;  %v5856_v18 = vadd.f32 %v1894_v52, %v1702_v31  ;;  %v1704_v49 = vadd.f32 %v1703_v0, %v5843_v28  ;;  %4727 = vtanh.f32 %v5853_v57 }
 0x16a   : > { %v1707_v47 = vpop.f32.mrf.mxu0  ;;  %2172 = vmatmul.mubr.bf16.gmra.mxu0 %v5673_v9 }
 0x16b   : > { %v1900_v48 = vpop.f32.mrf.mxu1  ;;  %2365 = vmatmul.mubr.bf16.gmra.mxu1 %v5675_v10  ;;  %v5861_v17 = vadd.f32 %v1896_v34, %v1704_v49  ;;  %v1708_v33 = vadd.f32 %v1707_v47, %v5838_v56  ;;  %2181 = vmatprep.mubr.bf16.mxu0 %v5677_v11  ;;  %4729 = vtanh.f32 %v5856_v18 }
 0x16c   : > { %2374 = vmatprep.mubr.bf16.mxu1 %v5679_v12  ;;  %v1709_v35 = vpop.f32.mrf.mxu0 }
 0x16d   : > { %v1902_v58 = vpop.f32.mrf.mxu1  ;;  %v5866_v31 = vadd.f32 %v1900_v48, %v1708_v33  ;;  %v1710_v0 = vadd.f32 %v1709_v35, %v5843_v28  ;;  %4731 = vtanh.f32 %v5861_v17 }
 0x16e   : > { %v1711_v52 = vpop.f32.mrf.mxu0 }
 0x16f   : > { %v1904_v13 = vpop.f32.mrf.mxu1  ;;  %v5869_v14 = vadd.f32 %v1902_v58, %v1710_v0  ;;  %v1712_v10 = vadd.f32 %v1711_v52, %v5838_v56  ;;  %4733 = vtanh.f32 %v5866_v31 }
 0x170   : > { %v1713_v34 = vpop.f32.mrf.mxu0 }
 0x171   : > { %v1906_v49 = vpop.f32.mrf.mxu1  ;;  %v5872_v9 = vadd.f32 %v1904_v13, %v1712_v10  ;;  %v1714_v47 = vadd.f32 %v1713_v34, %v5843_v28  ;;  %4735 = vtanh.f32 %v5869_v14 }
 0x172   : > { %v1717_v11 = vpop.f32.mrf.mxu0  ;;  %2182 = vmatmul.mubr.bf16.gmra.mxu0 %v5693_v29 }
 0x173   : > { %v1910_v12 = vpop.f32.mrf.mxu1  ;;  %2375 = vmatmul.mubr.bf16.gmra.mxu1 %v5695_v30  ;;  %v5877_v48 = vadd.f32 %v1906_v49, %v1714_v47  ;;  %v1718_v33 = vadd.f32 %v1717_v11, %v5838_v56  ;;  %2191 = vmatprep.mubr.bf16.mxu0 %v5697_v41  ;;  %4737 = vtanh.f32 %v5872_v9  ;;  %v7492_v9 = vld [vmem:[#allocation15_spill] sm:$0xff] }
 0x174   : > { %2384 = vmatprep.mubr.bf16.mxu1 %v5699_v42  ;;  %v1719_v35 = vpop.f32.mrf.mxu0 }
 0x175   : > { %v1912_v58 = vpop.f32.mrf.mxu1  ;;  %v5882_v10 = vadd.f32 %v1910_v12, %v1718_v33  ;;  %v1720_v0 = vadd.f32 %v1719_v35, %v5843_v28  ;;  %v7469_v12 = vld [vmem:[#allocation29_spill] sm:$0xff]  ;;  %4739 = vtanh.f32 %v5877_v48 }
 0x176   : > { %v1721_v52 = vpop.f32.mrf.mxu0 }
 0x177   : > { %v1914_v13 = vpop.f32.mrf.mxu1  ;;  %v5885_v34 = vadd.f32 %v1912_v58, %v1720_v0  ;;  %v1722_v30 = vadd.f32 %v1721_v52, %v5838_v56  ;;  %v7470_v58 = vld [vmem:[#allocation30_spill] sm:$0xff]  ;;  %v7471_v0 = vld [vmem:[#allocation31_spill] sm:$0xff]  ;;  %4741 = vtanh.f32 %v5882_v10 }
 0x178   : > { %v1723_v49 = vpop.f32.mrf.mxu0 }
 0x179   : > { %7467 = vst [vmem:[#allocation48_spill] sm:$0xff] %v5885_v34  ;;  %v1916_v47 = vpop.f32.mrf.mxu1  ;;  %v5888_v29 = vadd.f32 %v1914_v13, %v1722_v30  ;;  %v1724_v11 = vadd.f32 %v1723_v49, %v5843_v28 }
 0x17a   : > { %v1727_v41 = vpop.f32.mrf.mxu0  ;;  %2192 = vmatmul.mubr.bf16.gmra.mxu0 %v5713_v63 }
 0x17b   : > { %7468 = vst [vmem:[#allocation49_spill] sm:$0xff] %v5888_v29  ;;  %v1920_v42 = vpop.f32.mrf.mxu1  ;;  %2385 = vmatmul.mubr.bf16.gmra.mxu1 %v7469_v12  ;;  %v5893_v33 = vadd.f32 %v1916_v47, %v1724_v11  ;;  %v1728_v35 = vadd.f32 %v1727_v41, %v5838_v56  ;;  %2201 = vmatprep.mubr.bf16.mxu0 %v7470_v58 }
 0x17c   : > { %2394 = vmatprep.mubr.bf16.mxu1 %v7471_v0  ;;  %v1729_v52 = vpop.f32.mrf.mxu0 }
 0x17d   : > { %v1922_v34 = vpop.f32.mrf.mxu1  ;;  %v5898_v30 = vadd.f32 %v1920_v42, %v1728_v35  ;;  %v1730_v13 = vadd.f32 %v1729_v52, %v5843_v28  ;;  %v7475_v42 = vld [vmem:[#allocation33_spill] sm:$0xff] }
 0x17e   : > { %v1731_v49 = vpop.f32.mrf.mxu0 }
 0x17f   : > { %7472 = vst [vmem:[#allocation50_spill] sm:$0xff] %v5898_v30  ;;  %v1924_v29 = vpop.f32.mrf.mxu1  ;;  %v5901_v4 = vadd.f32 %v1922_v34, %v1730_v13  ;;  %v1732_v12 = vadd.f32 %v1731_v49, %v5838_v56  ;;  %v7477_v34 = vld [vmem:[#allocation34_spill] sm:$0xff]  ;;  %v7478_v13 = vld [vmem:[#allocation35_spill] sm:$0xff] }
 0x180   : > { %v1733_v47 = vpop.f32.mrf.mxu0 }
 0x181   : > { %7473 = vst [vmem:[#allocation51_spill] sm:$0xff] %v5901_v4  ;;  %v1926_v11 = vpop.f32.mrf.mxu1  ;;  %v5904_v63 = vadd.f32 %v1924_v29, %v1732_v12  ;;  %v1734_v41 = vadd.f32 %v1733_v47, %v5843_v28 }
 0x182   : > { %v1737_v58 = vpop.f32.mrf.mxu0  ;;  %2202 = vmatmul.mubr.bf16.gmra.mxu0 %v5733_v51 }
 0x183   : > { %7474 = vst [vmem:[#allocation52_spill] sm:$0xff] %v5904_v63  ;;  %v1930_v0 = vpop.f32.mrf.mxu1  ;;  %2395 = vmatmul.mubr.bf16.gmra.mxu1 %v7475_v42  ;;  %v5909_v35 = vadd.f32 %v1926_v11, %v1734_v41  ;;  %v1738_v52 = vadd.f32 %v1737_v58, %v5838_v56  ;;  %2211 = vmatprep.mubr.bf16.mxu0 %v7477_v34 }
 0x184   : > { %2404 = vmatprep.mubr.bf16.mxu1 %v7478_v13  ;;  %v1739_v49 = vpop.f32.mrf.mxu0 }
 0x185   : > { %7476 = vst [vmem:[#allocation53_spill] sm:$0xff] %v5909_v35  ;;  %v1932_v4 = vpop.f32.mrf.mxu1  ;;  %v5914_v29 = vadd.f32 %v1930_v0, %v1738_v52  ;;  %v1740_v12 = vadd.f32 %v1739_v49, %v5843_v28  ;;  %v7482_v35 = vld [vmem:[#allocation36_spill] sm:$0xff]  ;;  %v7483_v0 = vld [vmem:[#allocation37_spill] sm:$0xff] }
 0x186   : > { %v1741_v47 = vpop.f32.mrf.mxu0 }
 0x187   : > { %7479 = vst [vmem:[#allocation54_spill] sm:$0xff] %v5914_v29  ;;  %v1934_v63 = vpop.f32.mrf.mxu1  ;;  %v5917_v30 = vadd.f32 %v1932_v4, %v1740_v12  ;;  %v1742_v42 = vadd.f32 %v1741_v47, %v5838_v56  ;;  %v7484_v4 = vld [vmem:[#allocation38_spill] sm:$0xff]  ;;  %v7485_v12 = vld [vmem:[#allocation39_spill] sm:$0xff] }
 0x188   : > { %v1743_v11 = vpop.f32.mrf.mxu0 }
 0x189   : > { %7480 = vst [vmem:[#allocation55_spill] sm:$0xff] %v5917_v30  ;;  %v1936_v41 = vpop.f32.mrf.mxu1  ;;  %v5920_v51 = vadd.f32 %v1934_v63, %v1742_v42  ;;  %v1744_v58 = vadd.f32 %v1743_v11, %v5843_v28 }
 0x18a   : > { %v1747_v34 = vpop.f32.mrf.mxu0  ;;  %2212 = vmatmul.mubr.bf16.gmra.mxu0 %v7482_v35 }
 0x18b   : > { %7481 = vst [vmem:[#allocation56_spill] sm:$0xff] %v5920_v51  ;;  %v1940_v13 = vpop.f32.mrf.mxu1  ;;  %2405 = vmatmul.mubr.bf16.gmra.mxu1 %v7483_v0  ;;  %v5925_v52 = vadd.f32 %v1936_v41, %v1744_v58  ;;  %v1748_v49 = vadd.f32 %v1747_v34, %v5838_v56  ;;  %2221 = vmatprep.mubr.bf16.mxu0 %v7484_v4 }
 0x18c   : > { %2414 = vmatprep.mubr.bf16.mxu1 %v7485_v12  ;;  %v1749_v47 = vpop.f32.mrf.mxu0 }
 0x18d   : > { %v1942_v30 = vpop.f32.mrf.mxu1  ;;  %v5930_v63 = vadd.f32 %v1940_v13, %v1748_v49  ;;  %v1750_v42 = vadd.f32 %v1749_v47, %v5843_v28 }
 0x18e   : > { %v1751_v11 = vpop.f32.mrf.mxu0 }
 0x18f   : > { %v1944_v51 = vpop.f32.mrf.mxu1  ;;  %v5933_v29 = vadd.f32 %v1942_v30, %v1750_v42  ;;  %v1752_v0 = vadd.f32 %v1751_v11, %v5838_v56 }
 0x190   : > { %v1753_v41 = vpop.f32.mrf.mxu0 }
 0x191   : > { %v1946_v58 = vpop.f32.mrf.mxu1  ;;  %v5936_v35 = vadd.f32 %v1944_v51, %v1752_v0  ;;  %v1754_v34 = vadd.f32 %v1753_v41, %v5843_v28 }
 0x192   : > { %v1757_v4 = vpop.f32.mrf.mxu0  ;;  %2222 = vmatmul.mubr.bf16.gmra.mxu0 %v5773_v24 }
 0x193   : > { %v1950_v12 = vpop.f32.mrf.mxu1  ;;  %2415 = vmatmul.mubr.bf16.gmra.mxu1 %v5775_v25  ;;  %v5941_v13 = vadd.f32 %v1946_v58, %v1754_v34  ;;  %v1758_v49 = vadd.f32 %v1757_v4, %v5838_v56  ;;  %2231 = vmatprep.mubr.bf16.mxu0 %v5777_v27 }
 0x194   : > { %2424 = vmatprep.mubr.bf16.mxu1 %v5779_v26  ;;  %v1759_v30 = vpop.f32.mrf.mxu0 }
 0x195   : > { %v1952_v47 = vpop.f32.mrf.mxu1  ;;  %v5946_v51 = vadd.f32 %v1950_v12, %v1758_v49  ;;  %v1760_v0 = vadd.f32 %v1759_v30, %v5843_v28 }
 0x196   : > { %v1761_v42 = vpop.f32.mrf.mxu0 }
 0x197   : > { %v1954_v11 = vpop.f32.mrf.mxu1  ;;  %v5949_v41 = vadd.f32 %v1952_v47, %v1760_v0  ;;  %v1762_v25 = vadd.f32 %v1761_v42, %v5838_v56 }
 0x198   : > { %v1763_v58 = vpop.f32.mrf.mxu0 }
 0x199   : > { %v1956_v34 = vpop.f32.mrf.mxu1  ;;  %v5952_v24 = vadd.f32 %v1954_v11, %v1762_v25  ;;  %v1764_v4 = vadd.f32 %v1763_v58, %v5843_v28 }
 0x19a   : > { %v1767_v27 = vpop.f32.mrf.mxu0  ;;  %2232 = vmatmul.mubr.bf16.gmra.mxu0 %v5789_v53 }
 0x19b   : > { %v1960_v26 = vpop.f32.mrf.mxu1  ;;  %2425 = vmatmul.mubr.bf16.gmra.mxu1 %v5791_v50  ;;  %v5957_v12 = vadd.f32 %v1956_v34, %v1764_v4  ;;  %v1768_v49 = vadd.f32 %v1767_v27, %v5838_v56  ;;  %2467 = vmatprep.mubr.bf16.mxu0 %v5479_v54 }
 0x19c   : > { %2660 = vmatprep.mubr.bf16.mxu1 %v5481_v55  ;;  %v1769_v30 = vpop.f32.mrf.mxu0 }
 0x19d   : > { %7486 = vst [vmem:[#allocation57_spill] sm:$0xff] %v5957_v12  ;;  %v1962_v47 = vpop.f32.mrf.mxu1  ;;  %v5962_v25 = vadd.f32 %v1960_v26, %v1768_v49  ;;  %v1770_v0 = vadd.f32 %v1769_v30, %v5843_v28  ;;  %v7488_v12 = vld [vmem:[#allocation11_spill] sm:$0xff]  ;;  %v7489_v26 = vld [vmem:[#allocation12_spill] sm:$0xff] }
 0x19e   : > { %v1771_v42 = vpop.f32.mrf.mxu0 }
 0x19f   : > { %v1964_v11 = vpop.f32.mrf.mxu1  ;;  %v5965_v58 = vadd.f32 %v1962_v47, %v1770_v0  ;;  %v1772_v50 = vadd.f32 %v1771_v42, %v5838_v56 }
 0x1a0   : > { %v1773_v34 = vpop.f32.mrf.mxu0 }
 0x1a1   : > { %v1966_v4 = vpop.f32.mrf.mxu1  ;;  %v5968_v53 = vadd.f32 %v1964_v11, %v1772_v50  ;;  %v1774_v54 = vadd.f32 %v1773_v34, %v5843_v28 }
 0x1a2   : > { %v1777_v27 = vpop.f32.mrf.mxu0  ;;  %2468 = vmatmul.mubr.bf16.vlgmr.msra.gmra.mxu0 %v7488_v12 }
 0x1a3   : > { %7487 = vst [vmem:[#allocation58_spill] sm:$0xff] %v5968_v53  ;;  %v1970_v55 = vpop.f32.mrf.mxu1  ;;  %2661 = vmatmul.mubr.bf16.vlgmr.msra.gmra.mxu1 %v7489_v26  ;;  %v5973_v49 = vadd.f32 %v1966_v4, %v1774_v54  ;;  %v1778_v30 = vadd.f32 %v1777_v27, %v5838_v56  ;;  %2477 = vmatprep.mubr.bf16.mxu0 %v5497_v21 }
 0x1a4   : > { %2670 = vmatprep.mubr.bf16.mxu1 %v5499_v22  ;;  %v1779_v47 = vpop.f32.mrf.mxu0 }
 0x1a5   : > { %v1972_v0 = vpop.f32.mrf.mxu1  ;;  %v5978_v50 = vadd.f32 %v1970_v55, %v1778_v30  ;;  %v1780_v42 = vadd.f32 %v1779_v47, %v5843_v28 }
 0x1a6   : > { %v1781_v11 = vpop.f32.mrf.mxu0 }
 0x1a7   : > { %v1974_v34 = vpop.f32.mrf.mxu1  ;;  %v5981_v53 = vadd.f32 %v1972_v0, %v1780_v42  ;;  %v1782_v12 = vadd.f32 %v1781_v11, %v5838_v56 }
 0x1a8   : > { %v1783_v4 = vpop.f32.mrf.mxu0 }
 0x1a9   : > { %v1976_v54 = vpop.f32.mrf.mxu1  ;;  %v5984_v26 = vadd.f32 %v1974_v34, %v1782_v12  ;;  %v1784_v21 = vadd.f32 %v1783_v4, %v5843_v28 }
 0x1aa   : > { %v1787_v27 = vpop.f32.mrf.mxu0  ;;  %2478 = vmatmul.mubr.bf16.gmra.mxu0 %v5513_v37 }
 0x1ab   : > { %v1980_v22 = vpop.f32.mrf.mxu1  ;;  %2671 = vmatmul.mubr.bf16.gmra.mxu1 %v5515_v38  ;;  %v5989_v55 = vadd.f32 %v1976_v54, %v1784_v21  ;;  %v1788_v30 = vadd.f32 %v1787_v27, %v5838_v56  ;;  %2487 = vmatprep.mubr.bf16.mxu0 %v5517_v39 }
 0x1ac   : > { %2680 = vmatprep.mubr.bf16.mxu1 %v5519_v40  ;;  %v1789_v47 = vpop.f32.mrf.mxu0 }
 0x1ad   : > { %v1982_v0 = vpop.f32.mrf.mxu1  ;;  %v5994_v42 = vadd.f32 %v1980_v22, %v1788_v30  ;;  %v1790_v11 = vadd.f32 %v1789_v47, %v5843_v28 }
 0x1ae   : > { %v1791_v34 = vpop.f32.mrf.mxu0 }
 0x1af   : > { %v1984_v12 = vpop.f32.mrf.mxu1  ;;  %v5997_v4 = vadd.f32 %v1982_v0, %v1790_v11  ;;  %v1792_v37 = vadd.f32 %v1791_v34, %v5838_v56 }
 0x1b0   : > { %v1793_v38 = vpop.f32.mrf.mxu0 }
 0x1b1   : > { %v1986_v54 = vpop.f32.mrf.mxu1  ;;  %v6000_v21 = vadd.f32 %v1984_v12, %v1792_v37  ;;  %v1794_v39 = vadd.f32 %v1793_v38, %v5843_v28 }
 0x1b2   : > { %v1797_v27 = vpop.f32.mrf.mxu0  ;;  %2488 = vmatmul.mubr.bf16.gmra.mxu0 %v5533_v59 }
 0x1b3   : > { %v1990_v40 = vpop.f32.mrf.mxu1  ;;  %2681 = vmatmul.mubr.bf16.gmra.mxu1 %v5535_v60  ;;  %v6005_v22 = vadd.f32 %v1986_v54, %v1794_v39  ;;  %v1798_v30 = vadd.f32 %v1797_v27, %v5838_v56  ;;  %2497 = vmatprep.mubr.bf16.mxu0 %v5537_v61 }
 0x1b4   : > { %2690 = vmatprep.mubr.bf16.mxu1 %v5539_v62  ;;  %v1799_v47 = vpop.f32.mrf.mxu0 }
 0x1b5   : > { %v1992_v0 = vpop.f32.mrf.mxu1  ;;  %v6010_v11 = vadd.f32 %v1990_v40, %v1798_v30  ;;  %v1800_v34 = vadd.f32 %v1799_v47, %v5843_v28 }
 0x1b6   : > { %v1801_v12 = vpop.f32.mrf.mxu0 }
 0x1b7   : > { %v1994_v37 = vpop.f32.mrf.mxu1  ;;  %v6013_v38 = vadd.f32 %v1992_v0, %v1800_v34  ;;  %v1802_v59 = vadd.f32 %v1801_v12, %v5838_v56 }
 0x1b8   : > { %v1803_v60 = vpop.f32.mrf.mxu0 }
 0x1b9   : > { %v1996_v54 = vpop.f32.mrf.mxu1  ;;  %v6016_v39 = vadd.f32 %v1994_v37, %v1802_v59  ;;  %v1804_v61 = vadd.f32 %v1803_v60, %v5843_v28 }
 0x1ba   : > { %v1807_v27 = vpop.f32.mrf.mxu0  ;;  %2498 = vmatmul.mubr.bf16.gmra.mxu0 %v5553_v15 }
 0x1bb   : > { %v2000_v62 = vpop.f32.mrf.mxu1  ;;  %2691 = vmatmul.mubr.bf16.gmra.mxu1 %v5555_v16  ;;  %v6021_v40 = vadd.f32 %v1996_v54, %v1804_v61  ;;  %v1808_v30 = vadd.f32 %v1807_v27, %v5838_v56  ;;  %2507 = vmatprep.mubr.bf16.mxu0 %v5557_v19 }
 0x1bc   : > { %2700 = vmatprep.mubr.bf16.mxu1 %v5559_v20  ;;  %v1809_v47 = vpop.f32.mrf.mxu0 }
 0x1bd   : > { %v2002_v0 = vpop.f32.mrf.mxu1  ;;  %v6026_v34 = vadd.f32 %v2000_v62, %v1808_v30  ;;  %v1810_v12 = vadd.f32 %v1809_v47, %v5843_v28 }
 0x1be   : > { %v1811_v37 = vpop.f32.mrf.mxu0 }
 0x1bf   : > { %v2004_v59 = vpop.f32.mrf.mxu1  ;;  %v6029_v60 = vadd.f32 %v2002_v0, %v1810_v12  ;;  %v1812_v15 = vadd.f32 %v1811_v37, %v5838_v56 }
 0x1c0   : > { %v1813_v16 = vpop.f32.mrf.mxu0 }
 0x1c1   : > { %v2006_v54 = vpop.f32.mrf.mxu1  ;;  %v6032_v61 = vadd.f32 %v2004_v59, %v1812_v15  ;;  %v1814_v19 = vadd.f32 %v1813_v16, %v5843_v28 }
 0x1c2   : > { %v1817_v27 = vpop.f32.mrf.mxu0  ;;  %2508 = vmatmul.mubr.bf16.gmra.mxu0 %v5573_v43 }
 0x1c3   : > { %v2010_v20 = vpop.f32.mrf.mxu1  ;;  %2701 = vmatmul.mubr.bf16.gmra.mxu1 %v5575_v44  ;;  %v6037_v62 = vadd.f32 %v2006_v54, %v1814_v19  ;;  %v1818_v30 = vadd.f32 %v1817_v27, %v5838_v56  ;;  %2517 = vmatprep.mubr.bf16.mxu0 %v5577_v45 }
 0x1c4   : > { %2710 = vmatprep.mubr.bf16.mxu1 %v5579_v46  ;;  %v1819_v47 = vpop.f32.mrf.mxu0 }
 0x1c5   : > { %v2012_v0 = vpop.f32.mrf.mxu1  ;;  %v6042_v12 = vadd.f32 %v2010_v20, %v1818_v30  ;;  %v1820_v37 = vadd.f32 %v1819_v47, %v5843_v28 }
 0x1c6   : > { %v1821_v59 = vpop.f32.mrf.mxu0 }
 0x1c7   : > { %v2014_v15 = vpop.f32.mrf.mxu1  ;;  %v6045_v16 = vadd.f32 %v2012_v0, %v1820_v37  ;;  %v1822_v43 = vadd.f32 %v1821_v59, %v5838_v56 }
 0x1c8   : > { %v1823_v44 = vpop.f32.mrf.mxu0 }
 0x1c9   : > { %v2016_v54 = vpop.f32.mrf.mxu1  ;;  %v6048_v19 = vadd.f32 %v2014_v15, %v1822_v43  ;;  %v1824_v45 = vadd.f32 %v1823_v44, %v5843_v28 }
 0x1ca   : > { %v1827_v27 = vpop.f32.mrf.mxu0  ;;  %2518 = vmatmul.mubr.bf16.gmra.mxu0 %v5593_v5 }
 0x1cb   : > { %v2020_v46 = vpop.f32.mrf.mxu1  ;;  %2711 = vmatmul.mubr.bf16.gmra.mxu1 %v5595_v6  ;;  %v6053_v20 = vadd.f32 %v2016_v54, %v1824_v45  ;;  %v1828_v30 = vadd.f32 %v1827_v27, %v5838_v56  ;;  %2527 = vmatprep.mubr.bf16.mxu0 %v5597_v7 }
 0x1cc   : > { %2720 = vmatprep.mubr.bf16.mxu1 %v5599_v8  ;;  %v1829_v47 = vpop.f32.mrf.mxu0 }
 0x1cd   : > { %v2022_v0 = vpop.f32.mrf.mxu1  ;;  %v6058_v37 = vadd.f32 %v2020_v46, %v1828_v30  ;;  %v1830_v59 = vadd.f32 %v1829_v47, %v5843_v28  ;;  %v7490_v46 = vld [vmem:[#allocation13_spill] sm:$0xff] }
 0x1ce   : > { %v1831_v15 = vpop.f32.mrf.mxu0 }
 0x1cf   : > { %v2024_v43 = vpop.f32.mrf.mxu1  ;;  %v6061_v44 = vadd.f32 %v2022_v0, %v1830_v59  ;;  %v1832_v5 = vadd.f32 %v1831_v15, %v5838_v56  ;;  %v7491_v0 = vld [vmem:[#allocation14_spill] sm:$0xff] }
 0x1d0   : > { %v1833_v6 = vpop.f32.mrf.mxu0 }
 0x1d1   : > { %v2026_v54 = vpop.f32.mrf.mxu1  ;;  %v6064_v45 = vadd.f32 %v2024_v43, %v1832_v5  ;;  %v1834_v7 = vadd.f32 %v1833_v6, %v5843_v28 }
 0x1d2   : > { %v1837_v27 = vpop.f32.mrf.mxu0  ;;  %2528 = vmatmul.mubr.bf16.gmra.mxu0 %v5613_v32 }
 0x1d3   : > { %v2030_v8 = vpop.f32.mrf.mxu1  ;;  %2721 = vmatmul.mubr.bf16.gmra.mxu1 %v7490_v46  ;;  %v6070_v30 = vadd.f32 %v2026_v54, %v1834_v7  ;;  %v1838_v47 = vadd.f32 %v1837_v27, %v5838_v56  ;;  %2537 = vmatprep.mubr.bf16.mxu0 %v7491_v0 }
 0x1d4   : > { %2730 = vmatprep.mubr.bf16.mxu1 %v5619_v36  ;;  %v1839_v59 = vpop.f32.mrf.mxu0 }
 0x1d5   : > { %v2032_v15 = vpop.f32.mrf.mxu1  ;;  %v6077_v43 = vadd.f32 %v2030_v8, %v1838_v47  ;;  %v1840_v32 = vadd.f32 %v1839_v59, %v5843_v28  ;;  %v7493_v8 = vld [vmem:[#allocation46_spill] sm:$0xff]  ;;  %v7494_v47 = vld [vmem:[#allocation48_spill] sm:$0xff]  ;;  %v7495_v59 = vld [vmem:[#allocation49_spill] sm:$0xff] }
 0x1d6   : > { %v1841_v23 = vpop.f32.mrf.mxu0  ;;  %v7418_v46 = vsub.s32 2, %v7493_v8  ;;  %4743 = vtanh.f32 %v7494_v47  ;;  %v687_v10 = vsub.s32 3, %v7493_v8 }
 0x1d7   : > { %v2034_v5 = vpop.f32.mrf.mxu1  ;;  %v6082_v6 = vadd.f32 %v2032_v15, %v1840_v32  ;;  %v1842_v36 = vadd.f32 %v1841_v23, %v5838_v56  ;;  %4745 = vtanh.f32 %v7495_v59  ;;  %v7496_v32 = vld [vmem:[#allocation50_spill] sm:$0xff] }
 0x1d8   : > { %v1843_v57 = vpop.f32.mrf.mxu0  ;;  %4747 = vtanh.f32 %v5893_v33 }
 0x1d9   : > { %v2036_v54 = vpop.f32.mrf.mxu1  ;;  %v6087_v18 = vadd.f32 %v2034_v5, %v1842_v36  ;;  %v1844_v7 = vadd.f32 %v1843_v57, %v5843_v28  ;;  %4749 = vtanh.f32 %v7496_v32  ;;  %v7497_v36 = vld [vmem:[#allocation47_spill] sm:$0xff]  ;;  %v7503_v32 = vld [vmem:[#allocation17_spill] sm:$0xff] }
 0x1da   : > { %v1847_v17 = vpop.f32.mrf.mxu0  ;;  %2538 = vmatmul.mubr.bf16.gmra.mxu0 %v5633_v1  ;;  %v6114_v57 = vrot.slane %v7497_v36, %v7418_v46 }
 0x1db   : > { %v2040_v27 = vpop.f32.mrf.mxu1  ;;  %2731 = vmatmul.mubr.bf16.gmra.mxu1 %v5635_v2  ;;  %v6094_v31 = vadd.f32 %v2036_v54, %v1844_v7  ;;  %v1848_v14 = vadd.f32 %v1847_v17, %v5838_v56  ;;  %2547 = vmatprep.mubr.bf16.mxu0 %v5637_v3  ;;  %v6116_v54 = vpop.eup %4725  ;;  %v7498_v7 = vld [vmem:[#allocation51_spill] sm:$0xff] }
 0x1dc   : > { %2740 = vmatprep.mubr.bf16.mxu1 %v7492_v9  ;;  %v1849_v48 = vpop.f32.mrf.mxu0  ;;  %4751 = vtanh.f32 %v7498_v7  ;;  %v6119_v33 = vpop.eup %4727 }
 0x1dd   : > { %v2042_v0 = vpop.f32.mrf.mxu1  ;;  %v6102_v1 = vadd.f32 %v2040_v27, %v1848_v14  ;;  %v1850_v2 = vadd.f32 %v1849_v48, %v5843_v28  ;;  %7499 = vst [vmem:[#allocation11_spill] sm:$0xff] %v6119_v33  ;;  %v7500_v14 = vld [vmem:[#allocation52_spill] sm:$0xff]  ;;  %v6128_v48 = vpop.eup %4729 }
 0x1de   : > { %v1851_v15 = vpop.f32.mrf.mxu0  ;;  %4753 = vtanh.f32 %v7500_v14  ;;  %v6133_v7 = vpop.eup %4731  ;;  %v7505_v14 = vld [vmem:[#allocation54_spill] sm:$0xff] }
 0x1df   : > { %v2044_v3 = vpop.f32.mrf.mxu1  ;;  %v6108_v23 = vadd.f32 %v2042_v0, %v1850_v2  ;;  %v1852_v5 = vadd.f32 %v1851_v15, %v5838_v56  ;;  %v6126_v56 = vrot.slane %v7497_v36, %v687_v10  ;;  %v7501_v0 = vld [vmem:[#allocation53_spill] sm:$0xff]  ;;  %v7502_v15 = vld [vmem:[#allocation16_spill] sm:$0xff]  ;;  %7504 = vst [vmem:[#allocation12_spill] sm:$0xff] %v6133_v7  ;;  %v7506_v10 = vld [vmem:[#allocation18_spill] sm:$0xff]  ;;  %v6141_v36 = vpop.eup %4733 }
 0x1e0   : > { %v1853_v17 = vpop.f32.mrf.mxu0  ;;  %4755 = vtanh.f32 %v7501_v0  ;;  %v6144_v46 = vpop.eup %4735 }
 0x1e1   : > { %v2046_v27 = vpop.f32.mrf.mxu1  ;;  %v6122_v9 = vadd.f32 %v2044_v3, %v1852_v5  ;;  %v1854_v47 = vadd.f32 %v1853_v17, %v5843_v28  ;;  %4757 = vtanh.f32 %v7505_v14  ;;  %v7507_v5 = vld [vmem:[#allocation19_spill] sm:$0xff]  ;;  %7509 = vst [vmem:[#allocation13_spill] sm:$0xff] %v6144_v46 }
 0x1e2   : > { %v2083_v59 = vpop.f32.mrf.mxu0  ;;  %2548 = vmatmul.mubr.bf16.gmra.mxu0 %v7502_v15  ;;  %v7508_v17 = vld [vmem:[#allocation55_spill] sm:$0xff] }
 0x1e3   : > { %v2276_v2 = vpop.f32.mrf.mxu1  ;;  %2741 = vmatmul.mubr.bf16.gmra.mxu1 %v7503_v32  ;;  %v6136_v3 = vadd.f32 %v2046_v27, %v1854_v47  ;;  %v2084_v28 = vadd.f32 %v2083_v59, %v6114_v57  ;;  %2557 = vmatprep.mubr.bf16.mxu0 %v7506_v10  ;;  %4759 = vtanh.f32 %v7508_v17  ;;  %v7510_v32 = vld [vmem:[#allocation56_spill] sm:$0xff]  ;;  %v6150_v47 = vpop.eup %4737 }
 0x1e4   : > { %2750 = vmatprep.mubr.bf16.mxu1 %v7507_v5  ;;  %v2085_v0 = vpop.f32.mrf.mxu0  ;;  %4761 = vtanh.f32 %v7510_v32  ;;  %v6153_v10 = vpop.eup %4739 }
 0x1e5   : > { %v2278_v15 = vpop.f32.mrf.mxu1  ;;  %v6147_v7 = vadd.f32 %v2276_v2, %v2084_v28  ;;  %v2086_v27 = vadd.f32 %v2085_v0, %v6126_v56  ;;  %4763 = vtanh.f32 %v5925_v52  ;;  %7511 = vst [vmem:[#allocation14_spill] sm:$0xff] %v6153_v10  ;;  %v6157_v46 = vpop.eup %4741 }
 0x1e6   : > { %v2087_v59 = vpop.f32.mrf.mxu0  ;;  %4765 = vtanh.f32 %v5930_v63  ;;  %v6160_v0 = vpop.eup %4743 }
 0x1e7   : > { %v2280_v14 = vpop.f32.mrf.mxu1  ;;  %v2279_v5 = vadd.f32 %v2278_v15, %v2086_v27  ;;  %v2088_v17 = vadd.f32 %v2087_v59, %v6114_v57  ;;  %4767 = vtanh.f32 %v5933_v29  ;;  %7512 = vst [vmem:[#allocation15_spill] sm:$0xff] %v6160_v0  ;;  %v6166_v33 = vpop.eup %4745  ;;  %v7514_v27 = vld [vmem:[#allocation20_spill] sm:$0xff]  ;;  %v7515_v29 = vld [vmem:[#allocation21_spill] sm:$0xff] }
 0x1e8   : > { %v2089_v2 = vpop.f32.mrf.mxu0  ;;  %4769 = vtanh.f32 %v5936_v35  ;;  %v6171_v59 = vpop.eup %4747 }
 0x1e9   : > { %v2282_v28 = vpop.f32.mrf.mxu1  ;;  %v2917_v52 = vmul.f32 0.5, %v2279_v5  ;;  %v6163_v32 = vadd.f32 %v2280_v14, %v2088_v17  ;;  %v2090_v10 = vadd.f32 %v2089_v2, %v6126_v56  ;;  %4771 = vtanh.f32 %v5941_v13  ;;  %7516 = vst [vmem:[#allocation49_spill] sm:$0xff] %v6171_v59  ;;  %v7517_v14 = vld [vmem:[#allocation22_spill] sm:$0xff]  ;;  %v7518_v5 = vld [vmem:[#allocation23_spill] sm:$0xff]  ;;  %v6176_v17 = vpop.eup %4749 }
 0x1ea   : > { %v2093_v63 = vpop.f32.mrf.mxu0  ;;  %2558 = vmatmul.mubr.bf16.gmra.mxu0 %v7514_v27  ;;  %v6179_v8 = vpop.eup %4751 }
 0x1eb   : > { %7513 = vst [vmem:[#allocation48_spill] sm:$0xff] %v6163_v32  ;;  %v2286_v15 = vpop.f32.mrf.mxu1  ;;  %2751 = vmatmul.mubr.bf16.gmra.mxu1 %v7515_v29  ;;  %4773 = vtanh.f32 %v2917_v52  ;;  %v2283_v0 = vadd.f32 %v2282_v28, %v2090_v10  ;;  %v2094_v35 = vadd.f32 %v2093_v63, %v6114_v57  ;;  %2567 = vmatprep.mubr.bf16.mxu0 %v7517_v14  ;;  %7519 = vst [vmem:[#allocation50_spill] sm:$0xff] %v6179_v8  ;;  %v6185_v28 = vpop.eup %4753 }
 0x1ec   : > { %2760 = vmatprep.mubr.bf16.mxu1 %v7518_v5  ;;  %4775 = vtanh.f32 %v5946_v51  ;;  %v2095_v13 = vpop.f32.mrf.mxu0 }
 0x1ed   : > { %v2288_v2 = vpop.f32.mrf.mxu1  ;;  %4777 = vtanh.f32 %v5949_v41  ;;  %v2920_v27 = vmul.f32 0.5, %v2283_v0  ;;  %v6182_v29 = vadd.f32 %v2286_v15, %v2094_v35  ;;  %v2096_v10 = vadd.f32 %v2095_v13, %v6126_v56  ;;  %v6188_v14 = vpop.eup %4755  ;;  %v7522_v41 = vld [vmem:[#allocation57_spill] sm:$0xff] }
 0x1ee   : > { %4779 = vtanh.f32 %v5952_v24  ;;  %v2097_v52 = vpop.f32.mrf.mxu0  ;;  %7521 = vst [vmem:[#allocation51_spill] sm:$0xff] %v6188_v14  ;;  %v6191_v8 = vpop.eup %4757 }
 0x1ef   : > { %7520 = vst [vmem:[#allocation47_spill] sm:$0xff] %v6182_v29  ;;  %v2290_v63 = vpop.f32.mrf.mxu1  ;;  %4781 = vtanh.f32 %v2920_v27  ;;  %v2289_v51 = vadd.f32 %v2288_v2, %v2096_v10  ;;  %v2098_v5 = vadd.f32 %v2097_v52, %v6114_v57  ;;  %v7525_v10 = vld [vmem:[#allocation24_spill] sm:$0xff]  ;;  %v7526_v52 = vld [vmem:[#allocation25_spill] sm:$0xff] }
 0x1f0   : > { %4783 = vtanh.f32 %v7522_v41  ;;  %v2099_v0 = vpop.f32.mrf.mxu0  ;;  %v6194_v35 = vpop.eup %4759 }
 0x1f1   : > { %v2292_v15 = vpop.f32.mrf.mxu1  ;;  %7523 = vst [vmem:[#allocation52_spill] sm:$0xff] %v6194_v35  ;;  %4785 = vtanh.f32 %v5962_v25  ;;  %v2923_v13 = vmul.f32 0.5, %v2289_v51  ;;  %v6197_v24 = vadd.f32 %v2290_v63, %v2098_v5  ;;  %v2100_v59 = vadd.f32 %v2099_v0, %v6126_v56  ;;  %v6200_v14 = vpop.eup %4761  ;;  %v7528_v63 = vld [vmem:[#allocation26_spill] sm:$0xff]  ;;  %v7529_v51 = vld [vmem:[#allocation27_spill] sm:$0xff] }
 0x1f2   : > { %4787 = vtanh.f32 %v5965_v58  ;;  %v2103_v2 = vpop.f32.mrf.mxu0  ;;  %2568 = vmatmul.mubr.bf16.gmra.mxu0 %v7525_v10  ;;  %v6205_v41 = vpop.eup %4763  ;;  %v7530_v0 = vld [vmem:[#allocation58_spill] sm:$0xff] }
 0x1f3   : > { %7524 = vst [vmem:[#allocation53_spill] sm:$0xff] %v6197_v24  ;;  %v2296_v27 = vpop.f32.mrf.mxu1  ;;  %2761 = vmatmul.mubr.bf16.gmra.mxu1 %v7526_v52  ;;  %7527 = vst [vmem:[#allocation16_spill] sm:$0xff] %v6205_v41  ;;  %4789 = vtanh.f32 %v2923_v13  ;;  %v2293_v35 = vadd.f32 %v2292_v15, %v2100_v59  ;;  %v2104_v25 = vadd.f32 %v2103_v2, %v6114_v57  ;;  %2577 = vmatprep.mubr.bf16.mxu0 %v7528_v63  ;;  %v6210_v5 = vpop.eup %4765 }
 0x1f4   : > { %2770 = vmatprep.mubr.bf16.mxu1 %v7529_v51  ;;  %4791 = vtanh.f32 %v7530_v0  ;;  %v2105_v58 = vpop.f32.mrf.mxu0  ;;  %v6213_v29 = vpop.eup %4767 }
 0x1f5   : > { %v2298_v24 = vpop.f32.mrf.mxu1  ;;  %7531 = vst [vmem:[#allocation17_spill] sm:$0xff] %v6213_v29  ;;  %4793 = vtanh.f32 %v5973_v49  ;;  %v2926_v10 = vmul.f32 0.5, %v2293_v35  ;;  %v6216_v52 = vadd.f32 %v2296_v27, %v2104_v25  ;;  %v2106_v59 = vadd.f32 %v2105_v58, %v6126_v56  ;;  %v6219_v15 = vpop.eup %4769 }
 0x1f6   : > { %4795 = vtanh.f32 %v5978_v50  ;;  %v2107_v13 = vpop.f32.mrf.mxu0  ;;  %v6222_v63 = vpop.eup %4771 }
 0x1f7   : > { %7532 = vst [vmem:[#allocation54_spill] sm:$0xff] %v6216_v52  ;;  %v2300_v2 = vpop.f32.mrf.mxu1  ;;  %7533 = vst [vmem:[#allocation18_spill] sm:$0xff] %v6222_v63  ;;  %4797 = vtanh.f32 %v2926_v10  ;;  %v2299_v51 = vadd.f32 %v2298_v24, %v2106_v59  ;;  %v2108_v0 = vadd.f32 %v2107_v13, %v6114_v57  ;;  %v7536_v59 = vld [vmem:[#allocation28_spill] sm:$0xff]  ;;  %v7537_v13 = vld [vmem:[#allocation29_spill] sm:$0xff] }
 0x1f8   : > { %v4774_v29 = vpop.eup %4773  ;;  %4799 = vtanh.f32 %v5981_v53  ;;  %v2109_v49 = vpop.f32.mrf.mxu0 }
 0x1f9   : > { %v2302_v35 = vpop.f32.mrf.mxu1  ;;  %v6226_v27 = vpop.eup %4775  ;;  %v3109_v25 = vadd.f32 1.0, %v4774_v29  ;;  %v2929_v58 = vmul.f32 0.5, %v2299_v51  ;;  %v6228_v41 = vadd.f32 %v2300_v2, %v2108_v0  ;;  %v2110_v50 = vadd.f32 %v2109_v49, %v6126_v56  ;;  %v7538_v51 = vld [vmem:[#allocation30_spill] sm:$0xff]  ;;  %v7539_v0 = vld [vmem:[#allocation31_spill] sm:$0xff] }
 0x1fa   : > { %v6231_v52 = vpop.eup %4777  ;;  %4801 = vtanh.f32 %v5984_v26  ;;  %v2113_v24 = vpop.f32.mrf.mxu0  ;;  %2578 = vmatmul.mubr.bf16.gmra.mxu0 %v7536_v59 }
 0x1fb   : > { %7534 = vst [vmem:[#allocation19_spill] sm:$0xff] %v6228_v41  ;;  %7535 = vst [vmem:[#allocation55_spill] sm:$0xff] %v6231_v52  ;;  %v2306_v10 = vpop.f32.mrf.mxu1  ;;  %2771 = vmatmul.mubr.bf16.gmra.mxu1 %v7537_v13  ;;  %v6236_v53 = vpop.eup %4779  ;;  %v3205_v63 = vmul.f32 0.5, %v3109_v25  ;;  %4803 = vtanh.f32 %v2929_v58  ;;  %v2303_v29 = vadd.f32 %v2302_v35, %v2110_v50  ;;  %v2114_v2 = vadd.f32 %v2113_v24, %v6114_v57 }
 0x1fc   : > { %2587 = vmatprep.mubr.bf16.mxu0 %v7538_v51  ;;  %2780 = vmatprep.mubr.bf16.mxu1 %v7539_v0  ;;  %v4782_v49 = vpop.eup %4781  ;;  %4805 = vtanh.f32 %v5989_v55  ;;  %v2115_v26 = vpop.f32.mrf.mxu0 }
 0x1fd   : > { %v2308_v52 = vpop.f32.mrf.mxu1  ;;  %v6242_v41 = vpop.eup %4783  ;;  %v3112_v59 = vadd.f32 1.0, %v4782_v49  ;;  %v2932_v13 = vmul.f32 0.5, %v2303_v29  ;;  %v6244_v32 = vadd.f32 %v2306_v10, %v2114_v2  ;;  %v2116_v25 = vadd.f32 %v2115_v26, %v6126_v56 }
 0x1fe   : > { %7540 = vst [vmem:[#allocation56_spill] sm:$0xff] %v6242_v41  ;;  %v6247_v35 = vpop.eup %4785  ;;  %4807 = vtanh.f32 %v5994_v42  ;;  %v2117_v58 = vpop.f32.mrf.mxu0  ;;  %v6251_v24 = vmul.f32 %v6116_v54, %v3205_v63 }
 0x1ff   : > { %7541 = vst [vmem:[#allocation20_spill] sm:$0xff] %v6244_v32  ;;  %v2310_v50 = vpop.f32.mrf.mxu1  ;;  %v6253_v55 = vpop.eup %4787  ;;  %v3208_v51 = vmul.f32 0.5, %v3112_v59  ;;  %4809 = vtanh.f32 %v2932_v13  ;;  %v2309_v0 = vadd.f32 %v2308_v52, %v2116_v25  ;;  %v2118_v29 = vadd.f32 %v2117_v58, %v6114_v57  ;;  %v7544_v13 = vld [vmem:[#allocation32_spill] sm:$0xff]  ;;  %v7545_v25 = vld [vmem:[#allocation33_spill] sm:$0xff] }
 0x200   : > { %7542 = vst [vmem:[#allocation21_spill] sm:$0xff] %v6253_v55  ;;  %v4790_v10 = vpop.eup %4789  ;;  %4811 = vtanh.f32 %v5997_v4  ;;  %v2119_v2 = vpop.f32.mrf.mxu0 }
 0x201   : > { %v2312_v49 = vpop.f32.mrf.mxu1  ;;  %v6257_v26 = vpop.eup %4791  ;;  %v3115_v42 = vadd.f32 1.0, %v4790_v10  ;;  %v2935_v41 = vmul.f32 0.5, %v2309_v0  ;;  %v6259_v32 = vadd.f32 %v2310_v50, %v2118_v29  ;;  %v2120_v54 = vadd.f32 %v2119_v2, %v6126_v56  ;;  %v7546_v10 = vld [vmem:[#allocation34_spill] sm:$0xff]  ;;  %v7547_v2 = vld [vmem:[#allocation35_spill] sm:$0xff] }
 0x202   : > { %v6262_v63 = vpop.eup %4793  ;;  %4813 = vtanh.f32 %v6000_v21  ;;  %v2123_v52 = vpop.f32.mrf.mxu0  ;;  %2588 = vmatmul.mubr.bf16.gmra.mxu0 %v7544_v13  ;;  %v6268_v4 = vmul.f32 %v6128_v48, %v3208_v51 }
 0x203   : > { %7543 = vst [vmem:[#allocation22_spill] sm:$0xff] %v6262_v63  ;;  %v2316_v59 = vpop.f32.mrf.mxu1  ;;  %2781 = vmatmul.mubr.bf16.gmra.mxu1 %v7545_v25  ;;  %v6270_v58 = vpop.eup %4795  ;;  %v3211_v0 = vmul.f32 0.5, %v3115_v42  ;;  %4815 = vtanh.f32 %v2935_v41  ;;  %v2313_v50 = vadd.f32 %v2312_v49, %v2120_v54  ;;  %v2124_v29 = vadd.f32 %v2123_v52, %v6114_v57  ;;  %2597 = vmatprep.mubr.bf16.mxu0 %v7546_v10 }
 0x204   : > { %2790 = vmatprep.mubr.bf16.mxu1 %v7547_v2  ;;  %v4798_v21 = vpop.eup %4797  ;;  %4817 = vtanh.f32 %v6005_v22  ;;  %v2125_v13 = vpop.f32.mrf.mxu0 }
 0x205   : > { %v2318_v63 = vpop.f32.mrf.mxu1  ;;  %v6276_v25 = vpop.eup %4799  ;;  %v3118_v48 = vadd.f32 1.0, %v4798_v21  ;;  %v2938_v51 = vmul.f32 0.5, %v2313_v50  ;;  %v6278_v55 = vadd.f32 %v2316_v59, %v2124_v29  ;;  %v2126_v41 = vadd.f32 %v2125_v13, %v6126_v56 }
 0x206   : > { %7548 = vst [vmem:[#allocation23_spill] sm:$0xff] %v6276_v25  ;;  %4819 = vtanh.f32 %v6010_v11  ;;  %v2127_v49 = vpop.f32.mrf.mxu0  ;;  %v6283_v54 = vmul.f32 %v6141_v36, %v3211_v0 }
 0x207   : > { %v2320_v42 = vpop.f32.mrf.mxu1  ;;  %v6285_v52 = vpop.eup %4801  ;;  %v3214_v22 = vmul.f32 0.5, %v3118_v48  ;;  %4821 = vtanh.f32 %v2938_v51  ;;  %v2319_v10 = vadd.f32 %v2318_v63, %v2126_v41  ;;  %v2128_v2 = vadd.f32 %v2127_v49, %v6114_v57  ;;  %v7550_v63 = vld [vmem:[#allocation36_spill] sm:$0xff]  ;;  %v7551_v51 = vld [vmem:[#allocation37_spill] sm:$0xff] }
 0x208   : > { %v4804_v21 = vpop.eup %4803  ;;  %4823 = vtanh.f32 %v6013_v38  ;;  %v2129_v59 = vpop.f32.mrf.mxu0 }
 0x209   : > { %v2322_v50 = vpop.f32.mrf.mxu1  ;;  %v6289_v29 = vpop.eup %4805  ;;  %v3121_v11 = vadd.f32 1.0, %v4804_v21  ;;  %v2941_v13 = vmul.f32 0.5, %v2319_v10  ;;  %v6291_v25 = vadd.f32 %v2320_v42, %v2128_v2  ;;  %v2130_v36 = vadd.f32 %v2129_v59, %v6126_v56  ;;  %v7552_v2 = vld [vmem:[#allocation38_spill] sm:$0xff]  ;;  %v7553_v21 = vld [vmem:[#allocation39_spill] sm:$0xff] }
 0x20a   : > { %7549 = vst [vmem:[#allocation57_spill] sm:$0xff] %v6289_v29  ;;  %4825 = vtanh.f32 %v6016_v39  ;;  %v2133_v0 = vpop.f32.mrf.mxu0  ;;  %2598 = vmatmul.mubr.bf16.gmra.mxu0 %v7550_v63  ;;  %v6298_v38 = vmul.f32 %v6150_v47, %v3214_v22 }
 0x20b   : > { %v2326_v48 = vpop.f32.mrf.mxu1  ;;  %2791 = vmatmul.mubr.bf16.gmra.mxu1 %v7551_v51  ;;  %v6300_v41 = vpop.eup %4807  ;;  %v3217_v49 = vmul.f32 0.5, %v3121_v11  ;;  %4827 = vtanh.f32 %v2941_v13  ;;  %v2323_v10 = vadd.f32 %v2322_v50, %v2130_v36  ;;  %v2134_v42 = vadd.f32 %v2133_v0, %v6114_v57  ;;  %2607 = vmatprep.mubr.bf16.mxu0 %v7552_v2 }
 0x20c   : > { %2800 = vmatprep.mubr.bf16.mxu1 %v7553_v21  ;;  %v4810_v39 = vpop.eup %4809  ;;  %4829 = vtanh.f32 %v6021_v40  ;;  %v2135_v59 = vpop.f32.mrf.mxu0 }
 0x20d   : > { %v2328_v63 = vpop.f32.mrf.mxu1  ;;  %v6306_v51 = vpop.eup %4811  ;;  %v3124_v47 = vadd.f32 1.0, %v4810_v39  ;;  %v2944_v22 = vmul.f32 0.5, %v2323_v10  ;;  %v6308_v29 = vadd.f32 %v2326_v48, %v2134_v42  ;;  %v2136_v11 = vadd.f32 %v2135_v59, %v6126_v56 }
 0x20e   : > { %7554 = vst [vmem:[#allocation24_spill] sm:$0xff] %v6306_v51  ;;  %4831 = vtanh.f32 %v6026_v34  ;;  %v2137_v50 = vpop.f32.mrf.mxu0  ;;  %v6313_v36 = vmul.f32 %v6157_v46, %v3217_v49 }
 0x20f   : > { %v2330_v13 = vpop.f32.mrf.mxu1  ;;  %v6315_v0 = vpop.eup %4813  ;;  %v3220_v40 = vmul.f32 0.5, %v3124_v47  ;;  %4833 = vtanh.f32 %v2944_v22  ;;  %v2329_v2 = vadd.f32 %v2328_v63, %v2136_v11  ;;  %v2138_v21 = vadd.f32 %v2137_v50, %v6114_v57  ;;  %v7556_v63 = vld [vmem:[#allocation40_spill] sm:$0xff]  ;;  %v7557_v22 = vld [vmem:[#allocation41_spill] sm:$0xff] }
 0x210   : > { %v4816_v39 = vpop.eup %4815  ;;  %4835 = vtanh.f32 %v6029_v60  ;;  %v2139_v48 = vpop.f32.mrf.mxu0 }
 0x211   : > { %v2332_v10 = vpop.f32.mrf.mxu1  ;;  %v6319_v42 = vpop.eup %4817  ;;  %v3127_v34 = vadd.f32 1.0, %v4816_v39  ;;  %v2947_v59 = vmul.f32 0.5, %v2329_v2  ;;  %v6321_v51 = vadd.f32 %v2330_v13, %v2138_v21  ;;  %v2140_v46 = vadd.f32 %v2139_v48, %v6126_v56  ;;  %v7558_v21 = vld [vmem:[#allocation42_spill] sm:$0xff]  ;;  %v7559_v39 = vld [vmem:[#allocation43_spill] sm:$0xff] }
 0x212   : > { %7555 = vst [vmem:[#allocation25_spill] sm:$0xff] %v6319_v42  ;;  %4837 = vtanh.f32 %v6032_v61  ;;  %v2143_v49 = vpop.f32.mrf.mxu0  ;;  %2608 = vmatmul.mubr.bf16.gmra.mxu0 %v7556_v63  ;;  %v6328_v60 = vmul.f32 %v6166_v33, %v3220_v40 }
 0x213   : > { %v2336_v47 = vpop.f32.mrf.mxu1  ;;  %2801 = vmatmul.mubr.bf16.gmra.mxu1 %v7557_v22  ;;  %v6330_v11 = vpop.eup %4819  ;;  %v3223_v50 = vmul.f32 0.5, %v3127_v34  ;;  %4839 = vtanh.f32 %v2947_v59  ;;  %v2333_v2 = vadd.f32 %v2332_v10, %v2140_v46  ;;  %v2144_v13 = vadd.f32 %v2143_v49, %v6114_v57  ;;  %2617 = vmatprep.mubr.bf16.mxu0 %v7558_v21 }
 0x214   : > { %2810 = vmatprep.mubr.bf16.mxu1 %v7559_v39  ;;  %v4822_v61 = vpop.eup %4821  ;;  %4841 = vtanh.f32 %v6037_v62  ;;  %v2145_v48 = vpop.f32.mrf.mxu0 }
 0x215   : > { %v2338_v63 = vpop.f32.mrf.mxu1  ;;  %v6336_v22 = vpop.eup %4823  ;;  %v3130_v33 = vadd.f32 1.0, %v4822_v61  ;;  %v2950_v40 = vmul.f32 0.5, %v2333_v2  ;;  %v6338_v42 = vadd.f32 %v2336_v47, %v2144_v13  ;;  %v2146_v34 = vadd.f32 %v2145_v48, %v6126_v56 }
 0x216   : > { %7560 = vst [vmem:[#allocation26_spill] sm:$0xff] %v6336_v22  ;;  %4843 = vtanh.f32 %v6042_v12  ;;  %v2147_v10 = vpop.f32.mrf.mxu0  ;;  %v6343_v46 = vmul.f32 %v6176_v17, %v3223_v50 }
 0x217   : > { %v2340_v59 = vpop.f32.mrf.mxu1  ;;  %v6345_v49 = vpop.eup %4825  ;;  %v3226_v62 = vmul.f32 0.5, %v3130_v33  ;;  %4845 = vtanh.f32 %v2950_v40  ;;  %v2339_v21 = vadd.f32 %v2338_v63, %v2146_v34  ;;  %v2148_v39 = vadd.f32 %v2147_v10, %v6114_v57  ;;  %v7562_v63 = vld [vmem:[#allocation44_spill] sm:$0xff]  ;;  %v7563_v40 = vld [vmem:[#allocation45_spill] sm:$0xff] }
 0x218   : > { %v4828_v61 = vpop.eup %4827  ;;  %4847 = vtanh.f32 %v6045_v16  ;;  %v2149_v47 = vpop.f32.mrf.mxu0 }
 0x219   : > { %v2342_v2 = vpop.f32.mrf.mxu1  ;;  %v6349_v13 = vpop.eup %4829  ;;  %v3133_v12 = vadd.f32 1.0, %v4828_v61  ;;  %v2953_v48 = vmul.f32 0.5, %v2339_v21  ;;  %v6351_v22 = vadd.f32 %v2340_v59, %v2148_v39  ;;  %v2150_v17 = vadd.f32 %v2149_v47, %v6126_v56 }
 0x21a   : > { %7561 = vst [vmem:[#allocation27_spill] sm:$0xff] %v6349_v13  ;;  %4849 = vtanh.f32 %v6048_v19  ;;  %v2153_v50 = vpop.f32.mrf.mxu0  ;;  %2618 = vmatmul.mubr.bf16.gmra.mxu0 %v7562_v63  ;;  %v6358_v16 = vmul.f32 %v6185_v28, %v3226_v62 }
 0x21b   : > { %v2346_v33 = vpop.f32.mrf.mxu1  ;;  %2811 = vmatmul.mubr.bf16.gmra.mxu1 %v7563_v40  ;;  %v6360_v34 = vpop.eup %4831  ;;  %v3229_v10 = vmul.f32 0.5, %v3133_v12  ;;  %4851 = vtanh.f32 %v2953_v48  ;;  %v2343_v21 = vadd.f32 %v2342_v2, %v2150_v17  ;;  %v2154_v59 = vadd.f32 %v2153_v50, %v6114_v57 }
 0x21c   : > { %v4834_v39 = vpop.eup %4833  ;;  %4853 = vtanh.f32 %v6053_v20  ;;  %v2155_v19 = vpop.f32.mrf.mxu0 }
 0x21d   : > { %v2348_v61 = vpop.f32.mrf.mxu1  ;;  %v6364_v47 = vpop.eup %4835  ;;  %v3136_v63 = vadd.f32 1.0, %v4834_v39  ;;  %v2956_v13 = vmul.f32 0.5, %v2343_v21  ;;  %v6366_v40 = vadd.f32 %v2346_v33, %v2154_v59  ;;  %v2156_v28 = vadd.f32 %v2155_v19, %v6126_v56 }
 0x21e   : > { %7564 = vst [vmem:[#allocation58_spill] sm:$0xff] %v6364_v47  ;;  %4855 = vtanh.f32 %v6058_v37  ;;  %v2157_v62 = vpop.f32.mrf.mxu0  ;;  %v6371_v2 = vmul.f32 %v6191_v8, %v3229_v10 }
 0x21f   : > { %v2350_v12 = vpop.f32.mrf.mxu1  ;;  %v6373_v48 = vpop.eup %4837  ;;  %v3232_v20 = vmul.f32 0.5, %v3136_v63  ;;  %4857 = vtanh.f32 %v2956_v13  ;;  %v2349_v17 = vadd.f32 %v2348_v61, %v2156_v28  ;;  %v2158_v50 = vadd.f32 %v2157_v62, %v6114_v57 }
 0x220   : > { %v4840_v39 = vpop.eup %4839  ;;  %4859 = vtanh.f32 %v6061_v44  ;;  %v2159_v33 = vpop.f32.mrf.mxu0 }
 0x221   : > { %v2352_v21 = vpop.f32.mrf.mxu1  ;;  %v6377_v59 = vpop.eup %4841  ;;  %v3139_v37 = vadd.f32 1.0, %v4840_v39  ;;  %v2959_v19 = vmul.f32 0.5, %v2349_v17  ;;  %v6379_v47 = vadd.f32 %v2350_v12, %v2158_v50  ;;  %v2160_v8 = vadd.f32 %v2159_v33, %v6126_v56 }
 0x222   : > { %7565 = vst [vmem:[#allocation28_spill] sm:$0xff] %v6377_v59  ;;  %4861 = vtanh.f32 %v6064_v45  ;;  %v2163_v10 = vpop.f32.mrf.mxu0  ;;  %v6384_v61 = vmul.f32 %v6200_v14, %v3232_v20 }
 0x223   : > { %v2356_v13 = vpop.f32.mrf.mxu1  ;;  %v6386_v63 = vpop.eup %4843  ;;  %v3235_v44 = vmul.f32 0.5, %v3139_v37  ;;  %4863 = vtanh.f32 %v2959_v19  ;;  %v2353_v28 = vadd.f32 %v2352_v21, %v2160_v8  ;;  %v2164_v62 = vadd.f32 %v2163_v10, %v6114_v57 }
 0x224   : > { %v4846_v39 = vpop.eup %4845  ;;  %4865 = vtanh.f32 %v6070_v30  ;;  %v2165_v12 = vpop.f32.mrf.mxu0 }
 0x225   : > { %v2358_v17 = vpop.f32.mrf.mxu1  ;;  %v6390_v50 = vpop.eup %4847  ;;  %v3142_v45 = vadd.f32 1.0, %v4846_v39  ;;  %v2962_v33 = vmul.f32 0.5, %v2353_v28  ;;  %v6392_v59 = vadd.f32 %v2356_v13, %v2164_v62  ;;  %v2166_v14 = vadd.f32 %v2165_v12, %v6126_v56 }
 0x226   : > { %7566 = vst [vmem:[#allocation29_spill] sm:$0xff] %v6390_v50  ;;  %4867 = vtanh.f32 %v6077_v43  ;;  %v2167_v20 = vpop.f32.mrf.mxu0  ;;  %v6397_v21 = vmul.f32 %v6210_v5, %v3235_v44 }
 0x227   : > { %v2360_v37 = vpop.f32.mrf.mxu1  ;;  %v6399_v19 = vpop.eup %4849  ;;  %v3238_v30 = vmul.f32 0.5, %v3142_v45  ;;  %4869 = vtanh.f32 %v2962_v33  ;;  %v2359_v8 = vadd.f32 %v2358_v17, %v2166_v14  ;;  %v2168_v10 = vadd.f32 %v2167_v20, %v6114_v57 }
 0x228   : > { %v4852_v39 = vpop.eup %4851  ;;  %4871 = vtanh.f32 %v6082_v6  ;;  %v2169_v13 = vpop.f32.mrf.mxu0 }
 0x229   : > { %v2362_v28 = vpop.f32.mrf.mxu1  ;;  %v6403_v62 = vpop.eup %4853  ;;  %v3145_v43 = vadd.f32 1.0, %v4852_v39  ;;  %v2965_v12 = vmul.f32 0.5, %v2359_v8  ;;  %v6405_v50 = vadd.f32 %v2360_v37, %v2168_v10  ;;  %v2170_v5 = vadd.f32 %v2169_v13, %v6126_v56 }
 0x22a   : > { %7567 = vst [vmem:[#allocation30_spill] sm:$0xff] %v6403_v62  ;;  %4873 = vtanh.f32 %v6087_v18  ;;  %v2173_v44 = vpop.f32.mrf.mxu0  ;;  %v6410_v17 = vmul.f32 %v6219_v15, %v3238_v30 }
 0x22b   : > { %v2366_v45 = vpop.f32.mrf.mxu1  ;;  %v6412_v33 = vpop.eup %4855  ;;  %v3241_v6 = vmul.f32 0.5, %v3145_v43  ;;  %4875 = vtanh.f32 %v2965_v12  ;;  %v2363_v14 = vadd.f32 %v2362_v28, %v2170_v5  ;;  %v2174_v20 = vadd.f32 %v2173_v44, %v6114_v57 }
 0x22c   : > { %v4858_v39 = vpop.eup %4857  ;;  %4877 = vtanh.f32 %v6094_v31  ;;  %v2175_v37 = vpop.f32.mrf.mxu0 }
 0x22d   : > { %v2368_v8 = vpop.f32.mrf.mxu1  ;;  %v6416_v10 = vpop.eup %4859  ;;  %v3148_v18 = vadd.f32 1.0, %v4858_v39  ;;  %v2968_v13 = vmul.f32 0.5, %v2363_v14  ;;  %v6418_v62 = vadd.f32 %v2366_v45, %v2174_v20  ;;  %v2176_v15 = vadd.f32 %v2175_v37, %v6126_v56 }
 0x22e   : > { %7568 = vst [vmem:[#allocation31_spill] sm:$0xff] %v6416_v10  ;;  %4879 = vtanh.f32 %v6102_v1  ;;  %v2177_v30 = vpop.f32.mrf.mxu0  ;;  %v6423_v28 = vmul.f32 %v6226_v27, %v3241_v6 }
 0x22f   : > { %v2370_v43 = vpop.f32.mrf.mxu1  ;;  %v6425_v12 = vpop.eup %4861  ;;  %v3244_v31 = vmul.f32 0.5, %v3148_v18  ;;  %4881 = vtanh.f32 %v2968_v13  ;;  %v2369_v5 = vadd.f32 %v2368_v8, %v2176_v15  ;;  %v2178_v44 = vadd.f32 %v2177_v30, %v6114_v57 }
 0x230   : > { %v4864_v39 = vpop.eup %4863  ;;  %4883 = vtanh.f32 %v6108_v23  ;;  %v2179_v45 = vpop.f32.mrf.mxu0 }
 0x231   : > { %v2372_v14 = vpop.f32.mrf.mxu1  ;;  %v6429_v20 = vpop.eup %4865  ;;  %v3151_v1 = vadd.f32 1.0, %v4864_v39  ;;  %v2971_v37 = vmul.f32 0.5, %v2369_v5  ;;  %v6431_v10 = vadd.f32 %v2370_v43, %v2178_v44  ;;  %v2180_v27 = vadd.f32 %v2179_v45, %v6126_v56 }
 0x232   : > { %7569 = vst [vmem:[#allocation32_spill] sm:$0xff] %v6429_v20  ;;  %4885 = vtanh.f32 %v6122_v9  ;;  %v2183_v6 = vpop.f32.mrf.mxu0  ;;  %v6436_v8 = vmul.f32 %v6236_v53, %v3244_v31 }
 0x233   : > { %v2376_v18 = vpop.f32.mrf.mxu1  ;;  %v6438_v13 = vpop.eup %4867  ;;  %v3247_v23 = vmul.f32 0.5, %v3151_v1  ;;  %4887 = vtanh.f32 %v2971_v37  ;;  %v2373_v15 = vadd.f32 %v2372_v14, %v2180_v27  ;;  %v2184_v30 = vadd.f32 %v2183_v6, %v6114_v57 }
 0x234   : > { %7570 = vst [vmem:[#allocation33_spill] sm:$0xff] %v6438_v13  ;;  %v4870_v39 = vpop.eup %4869  ;;  %4889 = vtanh.f32 %v6136_v3  ;;  %v2185_v43 = vpop.f32.mrf.mxu0 }
 0x235   : > { %v2378_v5 = vpop.f32.mrf.mxu1  ;;  %v6442_v44 = vpop.eup %4871  ;;  %v3154_v9 = vadd.f32 1.0, %v4870_v39  ;;  %v2974_v45 = vmul.f32 0.5, %v2373_v15  ;;  %v6444_v20 = vadd.f32 %v2376_v18, %v2184_v30  ;;  %v2186_v53 = vadd.f32 %v2185_v43, %v6126_v56  ;;  %v7574_v15 = vld [vmem:[#allocation48_spill] sm:$0xff] }
 0x236   : > { %7571 = vst [vmem:[#allocation34_spill] sm:$0xff] %v6442_v44  ;;  %4891 = vtanh.f32 %v6147_v7  ;;  %v2187_v31 = vpop.f32.mrf.mxu0  ;;  %v6449_v14 = vmul.f32 %v6247_v35, %v3247_v23  ;;  %v7576_v23 = vld [vmem:[#allocation47_spill] sm:$0xff] }
 0x237   : > { %v2380_v1 = vpop.f32.mrf.mxu1  ;;  %v6451_v37 = vpop.eup %4873  ;;  %v3250_v3 = vmul.f32 0.5, %v3154_v9  ;;  %4893 = vtanh.f32 %v2974_v45  ;;  %v2379_v27 = vadd.f32 %v2378_v5, %v2186_v53  ;;  %v2188_v6 = vadd.f32 %v2187_v31, %v6114_v57 }
 0x238   : > { %7572 = vst [vmem:[#allocation35_spill] sm:$0xff] %v6449_v14  ;;  %7573 = vst [vmem:[#allocation36_spill] sm:$0xff] %v6451_v37  ;;  %v4876_v39 = vpop.eup %4875  ;;  %4895 = vtanh.f32 %v7574_v15  ;;  %v2189_v18 = vpop.f32.mrf.mxu0 }
 0x239   : > { %v2382_v30 = vpop.f32.mrf.mxu1  ;;  %v6455_v43 = vpop.eup %4877  ;;  %v3157_v7 = vadd.f32 1.0, %v4876_v39  ;;  %v2977_v44 = vmul.f32 0.5, %v2379_v27  ;;  %v6457_v13 = vadd.f32 %v2380_v1, %v2188_v6  ;;  %v2190_v35 = vadd.f32 %v2189_v18, %v6126_v56  ;;  %v7579_v27 = vld [vmem:[#allocation53_spill] sm:$0xff] }
 0x23a   : > { %7575 = vst [vmem:[#allocation37_spill] sm:$0xff] %v6455_v43  ;;  %4897 = vtanh.f32 %v7576_v23  ;;  %v2193_v9 = vpop.f32.mrf.mxu0  ;;  %v6462_v5 = vmul.f32 %v6257_v26, %v3250_v3  ;;  %v7581_v3 = vld [vmem:[#allocation54_spill] sm:$0xff] }
 0x23b   : > { %v2386_v45 = vpop.f32.mrf.mxu1  ;;  %v6464_v53 = vpop.eup %4879  ;;  %v3253_v31 = vmul.f32 0.5, %v3157_v7  ;;  %4899 = vtanh.f32 %v2977_v44  ;;  %v2383_v15 = vadd.f32 %v2382_v30, %v2190_v35  ;;  %v2194_v43 = vadd.f32 %v2193_v9, %v6114_v57 }
 0x23c   : > { %7577 = vst [vmem:[#allocation38_spill] sm:$0xff] %v6462_v5  ;;  %7578 = vst [vmem:[#allocation39_spill] sm:$0xff] %v6464_v53  ;;  %v4882_v39 = vpop.eup %4881  ;;  %4901 = vtanh.f32 %v7579_v27  ;;  %v2195_v1 = vpop.f32.mrf.mxu0 }
 0x23d   : > { %v2388_v6 = vpop.f32.mrf.mxu1  ;;  %v6468_v18 = vpop.eup %4883  ;;  %v3160_v23 = vadd.f32 1.0, %v4882_v39  ;;  %v2980_v37 = vmul.f32 0.5, %v2383_v15  ;;  %v6470_v14 = vadd.f32 %v2386_v45, %v2194_v43  ;;  %v2196_v26 = vadd.f32 %v2195_v1, %v6126_v56  ;;  %v7583_v15 = vld [vmem:[#allocation19_spill] sm:$0xff] }
 0x23e   : > { %7580 = vst [vmem:[#allocation40_spill] sm:$0xff] %v6468_v18  ;;  %4903 = vtanh.f32 %v7581_v3  ;;  %v2197_v7 = vpop.f32.mrf.mxu0  ;;  %v6475_v30 = vmul.f32 %v6270_v58, %v3253_v31  ;;  %v7585_v31 = vld [vmem:[#allocation20_spill] sm:$0xff] }
 0x23f   : > { %v2390_v44 = vpop.f32.mrf.mxu1  ;;  %v6477_v35 = vpop.eup %4885  ;;  %v3256_v9 = vmul.f32 0.5, %v3160_v23  ;;  %4905 = vtanh.f32 %v2980_v37  ;;  %v2389_v27 = vadd.f32 %v2388_v6, %v2196_v26  ;;  %v2198_v18 = vadd.f32 %v2197_v7, %v6114_v57 }
 0x240   : > { %7582 = vst [vmem:[#allocation41_spill] sm:$0xff] %v6477_v35  ;;  %v4888_v39 = vpop.eup %4887  ;;  %4907 = vtanh.f32 %v7583_v15  ;;  %v2199_v43 = vpop.f32.mrf.mxu0 }
 0x241   : > { %v2392_v45 = vpop.f32.mrf.mxu1  ;;  %v6481_v1 = vpop.eup %4889  ;;  %v3163_v3 = vadd.f32 1.0, %v4888_v39  ;;  %v2983_v53 = vmul.f32 0.5, %v2389_v27  ;;  %v6483_v5 = vadd.f32 %v2390_v44, %v2198_v18  ;;  %v2200_v58 = vadd.f32 %v2199_v43, %v6126_v56 }
 0x242   : > { %7584 = vst [vmem:[#allocation42_spill] sm:$0xff] %v6481_v1  ;;  %4909 = vtanh.f32 %v7585_v31  ;;  %v2203_v23 = vpop.f32.mrf.mxu0  ;;  %v6488_v6 = vmul.f32 %v6285_v52, %v3256_v9 }
 0x243   : > { %v2396_v37 = vpop.f32.mrf.mxu1  ;;  %v6490_v26 = vpop.eup %4891  ;;  %v3259_v7 = vmul.f32 0.5, %v3163_v3  ;;  %4911 = vtanh.f32 %v2983_v53  ;;  %v2393_v15 = vadd.f32 %v2392_v45, %v2200_v58  ;;  %v2204_v1 = vadd.f32 %v2203_v23, %v6114_v57 }
 0x244   : > { %v4894_v39 = vpop.eup %4893  ;;  %4913 = vtanh.f32 %v6259_v32  ;;  %v2205_v18 = vpop.f32.mrf.mxu0 }
 0x245   : > { %v2398_v44 = vpop.f32.mrf.mxu1  ;;  %v6494_v27 = vpop.eup %4895  ;;  %v3166_v43 = vadd.f32 1.0, %v4894_v39  ;;  %v2986_v31 = vmul.f32 0.5, %v2393_v15  ;;  %v6496_v35 = vadd.f32 %v2396_v37, %v2204_v1  ;;  %v2206_v52 = vadd.f32 %v2205_v18, %v6126_v56 }
 0x246   : > { %7586 = vst [vmem:[#allocation43_spill] sm:$0xff] %v6494_v27  ;;  %4915 = vtanh.f32 %v6278_v55  ;;  %v2207_v9 = vpop.f32.mrf.mxu0  ;;  %v6501_v45 = vmul.f32 %v6300_v41, %v3259_v7 }
 0x247   : > { %v2400_v53 = vpop.f32.mrf.mxu1  ;;  %v6503_v3 = vpop.eup %4897  ;;  %v3262_v32 = vmul.f32 0.5, %v3166_v43  ;;  %4917 = vtanh.f32 %v2986_v31  ;;  %v2399_v58 = vadd.f32 %v2398_v44, %v2206_v52  ;;  %v2208_v23 = vadd.f32 %v2207_v9, %v6114_v57 }
 0x248   : > { %v4900_v39 = vpop.eup %4899  ;;  %4919 = vtanh.f32 %v6291_v25  ;;  %v2209_v1 = vpop.f32.mrf.mxu0 }
 0x249   : > { %v2402_v37 = vpop.f32.mrf.mxu1  ;;  %v6507_v15 = vpop.eup %4901  ;;  %v3169_v55 = vadd.f32 1.0, %v4900_v39  ;;  %v2989_v18 = vmul.f32 0.5, %v2399_v58  ;;  %v6509_v27 = vadd.f32 %v2400_v53, %v2208_v23  ;;  %v2210_v41 = vadd.f32 %v2209_v1, %v6126_v56 }
 0x24a   : > { %7587 = vst [vmem:[#allocation44_spill] sm:$0xff] %v6507_v15  ;;  %4921 = vtanh.f32 %v6308_v29  ;;  %v2213_v7 = vpop.f32.mrf.mxu0  ;;  %v6514_v44 = vmul.f32 %v6315_v0, %v3262_v32 }
 0x24b   : > { %v2406_v43 = vpop.f32.mrf.mxu1  ;;  %v6516_v31 = vpop.eup %4903  ;;  %v3265_v25 = vmul.f32 0.5, %v3169_v55  ;;  %4923 = vtanh.f32 %v2989_v18  ;;  %v2403_v52 = vadd.f32 %v2402_v37, %v2210_v41  ;;  %v2214_v9 = vadd.f32 %v2213_v7, %v6114_v57 }
 0x24c   : > { %v4906_v39 = vpop.eup %4905  ;;  %4925 = vtanh.f32 %v6321_v51  ;;  %v2215_v53 = vpop.f32.mrf.mxu0 }
 0x24d   : > { %v2408_v58 = vpop.f32.mrf.mxu1  ;;  %v6520_v23 = vpop.eup %4907  ;;  %v3172_v29 = vadd.f32 1.0, %v4906_v39  ;;  %v2992_v1 = vmul.f32 0.5, %v2403_v52  ;;  %v6522_v15 = vadd.f32 %v2406_v43, %v2214_v9  ;;  %v2216_v0 = vadd.f32 %v2215_v53, %v6126_v56 }
 0x24e   : > { %7588 = vst [vmem:[#allocation45_spill] sm:$0xff] %v6520_v23  ;;  %4927 = vtanh.f32 %v6338_v42  ;;  %v2217_v32 = vpop.f32.mrf.mxu0  ;;  %v6527_v37 = vmul.f32 %v6330_v11, %v3265_v25 }
 0x24f   : > { %v2410_v55 = vpop.f32.mrf.mxu1  ;;  %v6529_v18 = vpop.eup %4909  ;;  %v3268_v51 = vmul.f32 0.5, %v3172_v29  ;;  %4929 = vtanh.f32 %v2992_v1  ;;  %v2409_v41 = vadd.f32 %v2408_v58, %v2216_v0  ;;  %v2218_v7 = vadd.f32 %v2217_v32, %v6114_v57 }
 0x250   : > { %7589 = vst [vmem:[#allocation48_spill] sm:$0xff] %v6529_v18  ;;  %v4912_v39 = vpop.eup %4911  ;;  %4931 = vtanh.f32 %v6351_v22  ;;  %v2219_v43 = vpop.f32.mrf.mxu0 }
 0x251   : > { %v2412_v52 = vpop.f32.mrf.mxu1  ;;  %v6533_v9 = vpop.eup %4913  ;;  %v3175_v42 = vadd.f32 1.0, %v4912_v39  ;;  %v2995_v53 = vmul.f32 0.5, %v2409_v41  ;;  %v6535_v23 = vadd.f32 %v2410_v55, %v2218_v7  ;;  %v2220_v11 = vadd.f32 %v2219_v43, %v6126_v56 }
 0x252   : > { %7590 = vst [vmem:[#allocation47_spill] sm:$0xff] %v6533_v9  ;;  %4933 = vtanh.f32 %v6366_v40  ;;  %v2223_v25 = vpop.f32.mrf.mxu0  ;;  %v6540_v58 = vmul.f32 %v6345_v49, %v3268_v51 }
 0x253   : > { %v2416_v29 = vpop.f32.mrf.mxu1  ;;  %v6542_v1 = vpop.eup %4915  ;;  %v3271_v22 = vmul.f32 0.5, %v3175_v42  ;;  %4935 = vtanh.f32 %v2995_v53  ;;  %v2413_v0 = vadd.f32 %v2412_v52, %v2220_v11  ;;  %v2224_v32 = vadd.f32 %v2223_v25, %v6114_v57 }
 0x254   : > { %7591 = vst [vmem:[#allocation53_spill] sm:$0xff] %v6542_v1  ;;  %v4918_v39 = vpop.eup %4917  ;;  %4937 = vtanh.f32 %v6379_v47  ;;  %v2225_v55 = vpop.f32.mrf.mxu0 }
 0x255   : > { %v2418_v41 = vpop.f32.mrf.mxu1  ;;  %v6546_v7 = vpop.eup %4919  ;;  %v3178_v40 = vadd.f32 1.0, %v4918_v39  ;;  %v2998_v43 = vmul.f32 0.5, %v2413_v0  ;;  %v6548_v9 = vadd.f32 %v2416_v29, %v2224_v32  ;;  %v2226_v49 = vadd.f32 %v2225_v55, %v6126_v56  ;;  %v7594_v32 = vld [vmem:[#allocation46_spill] sm:$0xff] }
 0x256   : > { %7592 = vst [vmem:[#allocation54_spill] sm:$0xff] %v6546_v7  ;;  %4939 = vtanh.f32 %v6392_v59  ;;  %v2227_v51 = vpop.f32.mrf.mxu0  ;;  %v6553_v52 = vmul.f32 %v6360_v34, %v3271_v22  ;;  %v691_v55 = vsub.s32 4, %v7594_v32  ;;  %v695_v59 = vsub.s32 5, %v7594_v32 }
 0x257   : > { %v2420_v42 = vpop.f32.mrf.mxu1  ;;  %v6555_v53 = vpop.eup %4921  ;;  %v3274_v47 = vmul.f32 0.5, %v3178_v40  ;;  %4941 = vtanh.f32 %v2998_v43  ;;  %v2419_v11 = vadd.f32 %v2418_v41, %v2226_v49  ;;  %v2228_v25 = vadd.f32 %v2227_v51, %v6114_v57  ;;  %v3397_v41 = vld [vmem:[%s7362_s3] sm:$0x7] }
 0x258   : > { %7593 = vst [vmem:[#allocation19_spill] sm:$0xff] %v6555_v53  ;;  %v4924_v39 = vpop.eup %4923  ;;  %4943 = vtanh.f32 %v6405_v50  ;;  %v2229_v29 = vpop.f32.mrf.mxu0  ;;  %v5109_v53 = vld [vmem:[#allocation7] sm:$0x3f] }
 0x259   : > { %v2422_v0 = vpop.f32.mrf.mxu1  ;;  %v6561_v7 = vpop.eup %4925  ;;  %v3181_v34 = vadd.f32 1.0, %v4924_v39  ;;  %v3001_v22 = vmul.f32 0.5, %v2419_v11  ;;  %v6563_v1 = vadd.f32 %v2420_v42, %v2228_v25  ;;  %v2230_v40 = vadd.f32 %v2229_v29, %v6126_v56 }
 0x25a   : > { %7595 = vst [vmem:[#allocation20_spill] sm:$0xff] %v6561_v7  ;;  %4945 = vtanh.f32 %v6418_v62  ;;  %v2233_v50 = vpop.f32.mrf.mxu0  ;;  %v6571_v49 = vmul.f32 %v6373_v48, %v3274_v47  ;;  %v6577_v18 = vrot.slane %v5109_v53, %v691_v55  ;;  %v6579_v62 = vrot.slane %v5109_v53, %v695_v59 }
 0x25b   : > { %v2426_v43 = vpop.f32.mrf.mxu1  ;;  %v6573_v51 = vpop.eup %4927  ;;  %v3277_v7 = vmul.f32 0.5, %v3181_v34  ;;  %4947 = vtanh.f32 %v3001_v22  ;;  %v2423_v11 = vadd.f32 %v2422_v0, %v2230_v40  ;;  %v2234_v42 = vadd.f32 %v2233_v50, %v6114_v57 }
 0x25c   : > { %7596 = vst [vmem:[#allocation46_spill] sm:$0xff] %v6573_v51  ;;  %v4930_v25 = vpop.eup %4929  ;;  %4949 = vtanh.f32 %v6431_v10  ;;  %v2235_v39 = vpop.f32.mrf.mxu0  ;;  %v7597_v48 = vsub.s32 0, %v7594_v32  ;;  %v7600_v55 = vsub.s32 1, %v7594_v32  ;;  %v7601_v59 = vsub.s32 2, %v7594_v32 }
 0x25d   : > { %v2428_v29 = vpop.f32.mrf.mxu1  ;;  %v6585_v51 = vpop.eup %4931  ;;  %v3184_v34 = vadd.f32 1.0, %v4930_v25  ;;  %v3004_v0 = vmul.f32 0.5, %v2423_v11  ;;  %v6587_v22 = vadd.f32 %v2426_v43, %v2234_v42  ;;  %v2236_v40 = vadd.f32 %v2235_v39, %v6126_v56 }
 0x25e   : > { %v6583_v47 = vrot.slane %v3397_v41, %v7597_v48  ;;  %7599 = vst [vmem:[#allocation60_spill] sm:$0xff] %v6585_v51  ;;  %4951 = vtanh.f32 %v6444_v20  ;;  %v2237_v10 = vpop.f32.mrf.mxu0  ;;  %v6593_v53 = vrot.slane %v3397_v41, %v7600_v55  ;;  %v6597_v48 = vrot.slane %v3397_v41, %v7601_v59 }
 0x25f   : > { %v2430_v50 = vpop.f32.mrf.mxu1  ;;  %v6600_v51 = vmul.f32 %v6386_v63, %v3277_v7  ;;  %v6602_v11 = vpop.eup %4933  ;;  %v3280_v43 = vmul.f32 0.5, %v3184_v34  ;;  %4953 = vtanh.f32 %v3004_v0  ;;  %v2429_v42 = vadd.f32 %v2428_v29, %v2236_v40 }
 0x260   : > { %7598 = vst [vmem:[#allocation59_spill] sm:$0xff] %v6583_v47  ;;  %v2238_v20 = vadd.f32 %v2237_v10, %v6114_v57  ;;  %v4936_v25 = vpop.eup %4935  ;;  %4955 = vtanh.f32 %v6457_v13  ;;  %v2239_v39 = vpop.f32.mrf.mxu0  ;;  %v6608_v32 = vmul.f32 %v6583_v47, %v6251_v24  ;;  %v6612_v63 = vmul.f32 %v6583_v47, %v6268_v4 }
 0x261   : > { %v2432_v55 = vpop.f32.mrf.mxu1  ;;  %v6616_v7 = vmul.f32 %v6583_v47, %v6283_v54  ;;  %v6618_v41 = vpop.eup %4937  ;;  %v3187_v57 = vadd.f32 1.0, %v4936_v25  ;;  %v3007_v29 = vmul.f32 0.5, %v2429_v42  ;;  %v2240_v13 = vadd.f32 %v2239_v39, %v6126_v56 }
 0x262   : > { %v6620_v34 = vadd.f32 %v2430_v50, %v2238_v20  ;;  %4957 = vtanh.f32 %v6470_v14  ;;  %v2469_v24 = vpop.f32.mrf.mxu0  ;;  %v6626_v4 = vmul.f32 %v6583_v47, %v6298_v38  ;;  %v6630_v54 = vmul.f32 %v6583_v47, %v6313_v36 }
 0x263   : > { %v2662_v0 = vpop.f32.mrf.mxu1  ;;  %v6633_v40 = vmul.f32 %v6399_v19, %v3280_v43  ;;  %v6635_v10 = vpop.eup %4939  ;;  %v3283_v50 = vmul.f32 0.5, %v3187_v57  ;;  %4959 = vtanh.f32 %v3007_v29  ;;  %v2433_v56 = vadd.f32 %v2432_v55, %v2240_v13 }
 0x264   : > { %v2470_v14 = vadd.f32 %v2469_v24, %v6577_v18  ;;  %v4942_v59 = vpop.eup %4941  ;;  %4961 = vtanh.f32 %v6483_v5  ;;  %v2471_v42 = vpop.f32.mrf.mxu0  ;;  %v6641_v20 = vmul.f32 %v6583_v47, %v6328_v60  ;;  %v6645_v36 = vmul.f32 %v6583_v47, %v6343_v46 }
 0x265   : > { %v2664_v38 = vpop.f32.mrf.mxu1  ;;  %v6649_v19 = vmul.f32 %v6583_v47, %v6358_v16  ;;  %v6651_v43 = vpop.eup %4943  ;;  %v3190_v25 = vadd.f32 1.0, %v4942_v59  ;;  %v3010_v39 = vmul.f32 0.5, %v2433_v56  ;;  %v2472_v5 = vadd.f32 %v2471_v42, %v6579_v62 }
 0x266   : > { %v2663_v55 = vadd.f32 %v2662_v0, %v2470_v14  ;;  %4963 = vtanh.f32 %v6496_v35  ;;  %v2473_v57 = vpop.f32.mrf.mxu0  ;;  %v6657_v29 = vmul.f32 %v6583_v47, %v6371_v2  ;;  %v6661_v46 = vmul.f32 %v6583_v47, %v6384_v61 }
 0x267   : > { %v2666_v60 = vpop.f32.mrf.mxu1  ;;  %v6664_v16 = vmul.f32 %v6412_v33, %v3283_v50  ;;  %v6666_v13 = vpop.eup %4945  ;;  %v3286_v24 = vmul.f32 0.5, %v3190_v25  ;;  %4965 = vtanh.f32 %v3010_v39  ;;  %v2665_v56 = vadd.f32 %v2664_v38, %v2472_v5 }
 0x268   : > { %v2918_v0 = vmul.f32 0.5, %v2663_v55  ;;  %v4948_v35 = vpop.eup %4947  ;;  %4967 = vtanh.f32 %v6509_v27  ;;  %v2474_v14 = vadd.f32 %v2473_v57, %v6577_v18  ;;  %v2475_v2 = vpop.f32.mrf.mxu0  ;;  %v6672_v61 = vmul.f32 %v6583_v47, %v6397_v21 }
 0x269   : > { %v2668_v59 = vpop.f32.mrf.mxu1  ;;  %v6676_v33 = vmul.f32 %v6583_v47, %v6410_v17  ;;  %v6678_v50 = vpop.eup %4949  ;;  %v3193_v42 = vadd.f32 1.0, %v4948_v35  ;;  %v2919_v38 = vmul.f32 0.5, %v2665_v56  ;;  %v2476_v25 = vadd.f32 %v2475_v2, %v6579_v62  ;;  %v7604_v2 = vld [vmem:[#allocation35_spill] sm:$0xff] }
 0x26a   : > { %4969 = vtanh.f32 %v2918_v0  ;;  %v2667_v27 = vadd.f32 %v2666_v60, %v2474_v14  ;;  %v2479_v39 = vpop.f32.mrf.mxu0  ;;  %v6684_v21 = vmul.f32 %v6583_v47, %v6423_v28  ;;  %v6687_v5 = vmul.f32 %v6425_v12, %v3286_v24 }
 0x26b   : > { %4971 = vtanh.f32 %v6522_v15  ;;  %v2672_v55 = vpop.f32.mrf.mxu1  ;;  %v6689_v17 = vpop.eup %4951  ;;  %v3289_v57 = vmul.f32 0.5, %v3193_v42  ;;  %v2669_v0 = vadd.f32 %v2668_v59, %v2476_v25  ;;  %v2480_v56 = vadd.f32 %v2479_v39, %v6577_v18  ;;  %v7606_v39 = vld [vmem:[#allocation38_spill] sm:$0xff] }
 0x26c   : > { %7602 = vst [vmem:[#allocation61_spill] sm:$0xff] %v6687_v5  ;;  %7603 = vst [vmem:[#allocation62_spill] sm:$0xff] %v6689_v17  ;;  %4973 = vtanh.f32 %v2919_v38  ;;  %v4954_v35 = vpop.eup %4953  ;;  %v2921_v15 = vmul.f32 0.5, %v2667_v27  ;;  %v2481_v60 = vpop.f32.mrf.mxu0  ;;  %v6695_v28 = vmul.f32 %v6583_v47, %v6436_v8  ;;  %v6699_v12 = vmul.f32 %v6583_v47, %v7604_v2  ;;  %v7607_v2 = vld [vmem:[#allocation33_spill] sm:$0xff] }
 0x26d   : > { %4975 = vtanh.f32 %v6535_v23  ;;  %v2674_v14 = vpop.f32.mrf.mxu1  ;;  %v6701_v24 = vpop.eup %4955  ;;  %v3196_v42 = vadd.f32 1.0, %v4954_v35  ;;  %v2922_v59 = vmul.f32 0.5, %v2669_v0  ;;  %v2673_v38 = vadd.f32 %v2672_v55, %v2480_v56 }
 0x26e   : > { %7605 = vst [vmem:[#allocation35_spill] sm:$0xff] %v6701_v24  ;;  %v2482_v25 = vadd.f32 %v2481_v60, %v6579_v62  ;;  %4977 = vtanh.f32 %v2921_v15  ;;  %v2483_v23 = vpop.f32.mrf.mxu0  ;;  %v6706_v5 = vmul.f32 %v6583_v47, %v7606_v39  ;;  %v6710_v8 = vmul.f32 %v6583_v47, %v6475_v30 }
 0x26f   : > { %v2676_v27 = vpop.f32.mrf.mxu1  ;;  %v6713_v17 = vmul.f32 %v7607_v2, %v3289_v57  ;;  %v6715_v24 = vpop.eup %4957  ;;  %v3292_v0 = vmul.f32 0.5, %v3196_v42  ;;  %4979 = vtanh.f32 %v2922_v59  ;;  %v2924_v55 = vmul.f32 0.5, %v2673_v38 }
 0x270   : > { %v2675_v56 = vadd.f32 %v2674_v14, %v2482_v25  ;;  %v4960_v35 = vpop.eup %4959  ;;  %4981 = vtanh.f32 %v6548_v9  ;;  %v2484_v15 = vadd.f32 %v2483_v23, %v6577_v18  ;;  %v2485_v60 = vpop.f32.mrf.mxu0  ;;  %v6721_v30 = vmul.f32 %v6583_v47, %v6488_v6  ;;  %v7610_v23 = vld [vmem:[#allocation36_spill] sm:$0xff] }
 0x271   : > { %7608 = vst [vmem:[#allocation38_spill] sm:$0xff] %v6713_v17  ;;  %v2678_v39 = vpop.f32.mrf.mxu1  ;;  %v6725_v57 = vmul.f32 %v6583_v47, %v6501_v45  ;;  %v6727_v2 = vpop.eup %4961  ;;  %v3199_v42 = vadd.f32 1.0, %v4960_v35  ;;  %4983 = vtanh.f32 %v2924_v55  ;;  %v2486_v59 = vadd.f32 %v2485_v60, %v6579_v62 }
 0x272   : > { %7609 = vst [vmem:[#allocation33_spill] sm:$0xff] %v6727_v2  ;;  %v2925_v14 = vmul.f32 0.5, %v2675_v56  ;;  %4985 = vtanh.f32 %v6563_v1  ;;  %v2677_v9 = vadd.f32 %v2676_v27, %v2484_v15  ;;  %v2489_v38 = vpop.f32.mrf.mxu0  ;;  %v6733_v6 = vmul.f32 %v6583_v47, %v6514_v44 }
 0x273   : > { %v2682_v25 = vpop.f32.mrf.mxu1  ;;  %v6736_v17 = vmul.f32 %v7610_v23, %v3292_v0  ;;  %v6738_v45 = vpop.eup %4963  ;;  %v3295_v2 = vmul.f32 0.5, %v3199_v42  ;;  %v2679_v55 = vadd.f32 %v2678_v39, %v2486_v59  ;;  %v2490_v56 = vadd.f32 %v2489_v38, %v6577_v18 }
 0x274   : > { %7612 = vst [vmem:[#allocation63_spill] sm:$0xff] %v6738_v45  ;;  %4987 = vtanh.f32 %v2925_v14  ;;  %v4966_v35 = vpop.eup %4965  ;;  %v2927_v1 = vmul.f32 0.5, %v2677_v9  ;;  %v2491_v27 = vpop.f32.mrf.mxu0  ;;  %v6744_v44 = vmul.f32 %v6583_v47, %v6527_v37  ;;  %v6748_v0 = vmul.f32 %v6583_v47, %v6540_v58  ;;  %v7615_v58 = vld [vmem:[#allocation39_spill] sm:$0xff] }
 0x275   : > { %7611 = vst [vmem:[#allocation36_spill] sm:$0xff] %v6736_v17  ;;  %4989 = vtanh.f32 %v6587_v22  ;;  %v2684_v15 = vpop.f32.mrf.mxu1  ;;  %v6750_v60 = vpop.eup %4967  ;;  %v3202_v42 = vadd.f32 1.0, %v4966_v35  ;;  %v2928_v39 = vmul.f32 0.5, %v2679_v55  ;;  %v2683_v14 = vadd.f32 %v2682_v25, %v2490_v56 }
 0x276   : > { %7613 = vst [vmem:[#allocation64_spill] sm:$0xff] %v6750_v60  ;;  %v2492_v59 = vadd.f32 %v2491_v27, %v6579_v62  ;;  %4991 = vtanh.f32 %v2927_v1  ;;  %v2493_v22 = vpop.f32.mrf.mxu0  ;;  %v6755_v23 = vmul.f32 %v6583_v47, %v6553_v52  ;;  %v6759_v37 = vmul.f32 %v6583_v47, %v6571_v49 }
 0x277   : > { %v4970_v38 = vpop.eup %4969  ;;  %v2686_v9 = vpop.f32.mrf.mxu1  ;;  %v6762_v17 = vmul.f32 %v7615_v58, %v3295_v2  ;;  %v3298_v25 = vmul.f32 0.5, %v3202_v42  ;;  %4993 = vtanh.f32 %v2928_v39  ;;  %v2930_v56 = vmul.f32 0.5, %v2683_v14 }
 0x278   : > { %7614 = vst [vmem:[#allocation65_spill] sm:$0xff] %v6759_v37  ;;  %v6764_v35 = vpop.eup %4971  ;;  %v3110_v55 = vadd.f32 1.0, %v4970_v38  ;;  %4995 = vtanh.f32 %v6620_v34  ;;  %v2685_v27 = vadd.f32 %v2684_v15, %v2492_v59  ;;  %v2494_v52 = vadd.f32 %v2493_v22, %v6577_v18  ;;  %v2495_v60 = vpop.f32.mrf.mxu0  ;;  %v7621_v59 = vld [vmem:[#allocation41_spill] sm:$0xff] }
 0x279   : > { %7616 = vst [vmem:[#allocation39_spill] sm:$0xff] %v6762_v17  ;;  %7617 = vst [vmem:[#allocation66_spill] sm:$0xff] %v6764_v35  ;;  %v4974_v1 = vpop.eup %4973  ;;  %v2688_v45 = vpop.f32.mrf.mxu1  ;;  %v6770_v49 = vmul.f32 %v6583_v47, %v6600_v51  ;;  %4997 = vtanh.f32 %v2930_v56  ;;  %v2496_v42 = vadd.f32 %v2495_v60, %v6579_v62  ;;  %v6777_v15 = vmul.f32 %v6583_v47, %v6633_v40 }
 0x27a   : > { %v6772_v2 = vpop.eup %4975  ;;  %v3206_v58 = vmul.f32 0.5, %v3110_v55  ;;  %v3111_v17 = vadd.f32 1.0, %v4974_v1  ;;  %v2931_v39 = vmul.f32 0.5, %v2685_v27  ;;  %v2687_v14 = vadd.f32 %v2686_v9, %v2494_v52  ;;  %v2499_v38 = vpop.f32.mrf.mxu0  ;;  %v7623_v1 = vld [vmem:[#allocation11_spill] sm:$0xff] }
 0x27b   : > { %7618 = vst [vmem:[#allocation67_spill] sm:$0xff] %v6770_v49  ;;  %7619 = vst [vmem:[#allocation68_spill] sm:$0xff] %v6772_v2  ;;  %v2692_v34 = vpop.f32.mrf.mxu1  ;;  %v6780_v22 = vmul.f32 %v7621_v59, %v3298_v25  ;;  %v4978_v51 = vpop.eup %4977  ;;  %v2689_v49 = vadd.f32 %v2688_v45, %v2496_v42  ;;  %v2500_v55 = vadd.f32 %v2499_v38, %v6577_v18 }
 0x27c   : > { %7620 = vst [vmem:[#allocation69_spill] sm:$0xff] %v6777_v15  ;;  %v3207_v35 = vmul.f32 0.5, %v3111_v17  ;;  %v3302_v56 = vmul.f32 %v7623_v1, %v3206_v58  ;;  %v4980_v2 = vpop.eup %4979  ;;  %v3113_v60 = vadd.f32 1.0, %v4978_v51  ;;  %4999 = vtanh.f32 %v2931_v39  ;;  %v2501_v27 = vpop.f32.mrf.mxu0 }
 0x27d   : > { %7622 = vst [vmem:[#allocation41_spill] sm:$0xff] %v6780_v22  ;;  %v2933_v9 = vmul.f32 0.5, %v2687_v14  ;;  %v2694_v52 = vpop.f32.mrf.mxu1  ;;  %v6786_v40 = vmul.f32 %v6583_v47, %v6664_v16  ;;  %v6788_v15 = vpop.eup %4981  ;;  %v3114_v25 = vadd.f32 1.0, %v4980_v2  ;;  %v2934_v59 = vmul.f32 0.5, %v2689_v49 }
 0x27e   : > { %7625 = vst [vmem:[#allocation70_spill] sm:$0xff] %v6788_v15  ;;  %v2693_v17 = vadd.f32 %v2692_v34, %v2500_v55  ;;  %v2502_v45 = vadd.f32 %v2501_v27, %v6579_v62  ;;  %v4984_v42 = vpop.eup %4983  ;;  %v3209_v38 = vmul.f32 0.5, %v3113_v60  ;;  %v2503_v58 = vpop.f32.mrf.mxu0  ;;  %v3303_v39 = vmul.f32 %v6490_v26, %v3207_v35 }
 0x27f   : > { %7624 = vst [vmem:[#allocation11_spill] sm:$0xff] %v6786_v40  ;;  %5001 = vtanh.f32 %v2933_v9  ;;  %v2696_v51 = vpop.f32.mrf.mxu1  ;;  %v3415_v14 = vmul.f32 %v6593_v53, %v3302_v56  ;;  %v6793_v1 = vpop.eup %4985  ;;  %v3210_v16 = vmul.f32 0.5, %v3114_v25  ;;  %v3116_v22 = vadd.f32 1.0, %v4984_v42 }
 0x280   : > { %7626 = vst [vmem:[#allocation71_spill] sm:$0xff] %v6793_v1  ;;  %5003 = vtanh.f32 %v2934_v59  ;;  %v2936_v15 = vmul.f32 0.5, %v2693_v17  ;;  %v2695_v49 = vadd.f32 %v2694_v52, %v2502_v45  ;;  %v2504_v34 = vadd.f32 %v2503_v58, %v6577_v18  ;;  %v2505_v55 = vpop.f32.mrf.mxu0  ;;  %v7628_v45 = vld [vmem:[#allocation12_spill] sm:$0xff] }
 0x281   : > { %v4988_v2 = vpop.eup %4987  ;;  %v2698_v27 = vpop.f32.mrf.mxu1  ;;  %v3416_v60 = vmul.f32 %v6597_v48, %v3303_v39  ;;  %v3510_v9 = vadd.f32 %v3415_v14, %v6608_v32  ;;  %v3212_v26 = vmul.f32 0.5, %v3116_v22  ;;  %v2506_v56 = vadd.f32 %v2505_v55, %v6579_v62  ;;  %v7629_v32 = vld [vmem:[#allocation43_spill] sm:$0xff] }
 0x282   : > { %v6798_v47 = vpop.eup %4989  ;;  %v3117_v35 = vadd.f32 1.0, %v4988_v2  ;;  %5005 = vtanh.f32 %v2936_v15  ;;  %v2937_v25 = vmul.f32 0.5, %v2695_v49  ;;  %v2697_v59 = vadd.f32 %v2696_v51, %v2504_v34  ;;  %v2509_v17 = vpop.f32.mrf.mxu0 }
 0x283   : > { %7627 = vst [vmem:[#allocation72_spill] sm:$0xff] %v6798_v47  ;;  %v2702_v42 = vpop.f32.mrf.mxu1  ;;  %v3511_v52 = vadd.f32 %v3510_v9, %v3416_v60  ;;  %v3305_v58 = vmul.f32 %v7628_v45, %v3209_v38  ;;  %v4992_v1 = vpop.eup %4991  ;;  %v2699_v37 = vadd.f32 %v2698_v27, %v2506_v56  ;;  %v2510_v39 = vadd.f32 %v2509_v17, %v6577_v18 }
 0x284   : > { %v3213_v40 = vmul.f32 0.5, %v3117_v35  ;;  %v3306_v14 = vmul.f32 %v7629_v32, %v3210_v16  ;;  %v4994_v47 = vpop.eup %4993  ;;  %v3119_v22 = vadd.f32 1.0, %v4992_v1  ;;  %5007 = vtanh.f32 %v2937_v25  ;;  %v2511_v2 = vpop.f32.mrf.mxu0 }
 0x285   : > { %v2939_v15 = vmul.f32 0.5, %v2697_v59  ;;  %3512 = vadd.xlane.f32.xlu0 %v3511_v52  ;;  %v2704_v49 = vpop.f32.mrf.mxu1  ;;  %v3418_v51 = vmul.f32 %v6593_v53, %v3305_v58  ;;  %v6805_v34 = vpop.eup %4995  ;;  %v3120_v55 = vadd.f32 1.0, %v4994_v47  ;;  %v2940_v38 = vmul.f32 0.5, %v2699_v37 }
 0x286   : > { %v2703_v60 = vadd.f32 %v2702_v42, %v2510_v39  ;;  %v2512_v27 = vadd.f32 %v2511_v2, %v6579_v62  ;;  %v4998_v9 = vpop.eup %4997  ;;  %v3215_v35 = vmul.f32 0.5, %v3119_v22  ;;  %v2513_v16 = vpop.f32.mrf.mxu0  ;;  %v3419_v1 = vmul.f32 %v6597_v48, %v3306_v14  ;;  %v7630_v39 = vld [vmem:[#allocation13_spill] sm:$0xff] }
 0x287   : > { %5009 = vtanh.f32 %v2939_v15  ;;  %v2706_v56 = vpop.f32.mrf.mxu1  ;;  %v3514_v25 = vadd.f32 %v3418_v51, %v6612_v63  ;;  %v3216_v59 = vmul.f32 0.5, %v3120_v55  ;;  %v3122_v17 = vadd.f32 1.0, %v4998_v9 }
 0x288   : > { %5011 = vtanh.f32 %v2940_v38  ;;  %v2942_v52 = vmul.f32 0.5, %v2703_v60  ;;  %v2705_v45 = vadd.f32 %v2704_v49, %v2512_v27  ;;  %v2514_v47 = vadd.f32 %v2513_v16, %v6577_v18  ;;  %v2515_v42 = vpop.f32.mrf.mxu0 }
 0x289   : > { %v3515_v37 = vadd.f32 %v3514_v25, %v3419_v1  ;;  %v2708_v58 = vpop.f32.mrf.mxu1  ;;  %v3308_v32 = vmul.f32 %v7630_v39, %v3212_v26  ;;  %v5000_v22 = vpop.eup %4999  ;;  %v3218_v15 = vmul.f32 0.5, %v3122_v17  ;;  %v2516_v2 = vadd.f32 %v2515_v42, %v6579_v62  ;;  %v7631_v1 = vld [vmem:[#allocation14_spill] sm:$0xff] }
 0x28a   : > { %5013 = vtanh.f32 %v2942_v52  ;;  %v3309_v14 = vmul.f32 %v6503_v3, %v3213_v40  ;;  %v3123_v63 = vadd.f32 1.0, %v5000_v22  ;;  %v2943_v51 = vmul.f32 0.5, %v2705_v45  ;;  %v2519_v38 = vpop.f32.mrf.mxu0 }
 0x28b   : > { %v2707_v55 = vadd.f32 %v2706_v56, %v2514_v47  ;;  %3516 = vadd.xlane.f32.xlu0 %v3515_v37  ;;  %v2712_v49 = vpop.f32.mrf.mxu1  ;;  %v3421_v60 = vmul.f32 %v6593_v53, %v3308_v32  ;;  %v2709_v9 = vadd.f32 %v2708_v58, %v2516_v2  ;;  %v2520_v16 = vadd.f32 %v2519_v38, %v6577_v18 }
 0x28c   : > { %v5002_v27 = vpop.eup %5001  ;;  %v3422_v26 = vmul.f32 %v6597_v48, %v3309_v14  ;;  %v3311_v25 = vmul.f32 %v7631_v1, %v3215_v35  ;;  %v3219_v52 = vmul.f32 0.5, %v3123_v63  ;;  %5015 = vtanh.f32 %v2943_v51  ;;  %v2521_v40 = vpop.f32.mrf.mxu0  ;;  %v7632_v35 = vld [vmem:[#allocation44_spill] sm:$0xff] }
 0x28d   : > { %v5004_v17 = vpop.eup %5003  ;;  %v3125_v42 = vadd.f32 1.0, %v5002_v27  ;;  %v2945_v3 = vmul.f32 0.5, %v2707_v55  ;;  %v2714_v56 = vpop.f32.mrf.mxu1  ;;  %v2946_v47 = vmul.f32 0.5, %v2709_v9  ;;  %v2713_v37 = vadd.f32 %v2712_v49, %v2520_v16 }
 0x28e   : > { %v3126_v45 = vadd.f32 1.0, %v5004_v17  ;;  %v3518_v39 = vadd.f32 %v3421_v60, %v6616_v7  ;;  %v2522_v22 = vadd.f32 %v2521_v40, %v6579_v62  ;;  %v2523_v2 = vpop.f32.mrf.mxu0  ;;  %v3312_v38 = vmul.f32 %v7632_v35, %v3216_v59 }
 0x28f   : > { %v5006_v32 = vpop.eup %5005  ;;  %v3221_v58 = vmul.f32 0.5, %v3125_v42  ;;  %5017 = vtanh.f32 %v2945_v3  ;;  %v2716_v14 = vpop.f32.mrf.mxu1  ;;  %v2948_v51 = vmul.f32 0.5, %v2713_v37  ;;  %v2524_v9 = vadd.f32 %v2523_v2, %v6577_v18 }
 0x290   : > { %v3222_v63 = vmul.f32 0.5, %v3126_v45  ;;  %v3128_v27 = vadd.f32 1.0, %v5006_v32  ;;  %5019 = vtanh.f32 %v2946_v47  ;;  %v3519_v55 = vadd.f32 %v3518_v39, %v3422_v26  ;;  %v2525_v7 = vpop.f32.mrf.mxu0  ;;  %v7633_v32 = vld [vmem:[#allocation15_spill] sm:$0xff] }
 0x291   : > { %v2715_v1 = vadd.f32 %v2714_v56, %v2522_v22  ;;  %v3424_v49 = vmul.f32 %v6593_v53, %v3311_v25  ;;  %v2718_v60 = vpop.f32.mrf.mxu1  ;;  %v5008_v16 = vpop.eup %5007  ;;  %5021 = vtanh.f32 %v2948_v51  ;;  %v3425_v42 = vmul.f32 %v6597_v48, %v3312_v38 }
 0x292   : > { %v6823_v17 = vmul.f32 0.5, %v3128_v27  ;;  %v2526_v59 = vadd.f32 %v2525_v7, %v6579_v62  ;;  %v3129_v3 = vadd.f32 1.0, %v5008_v16  ;;  %3520 = vadd.xlane.f32.xlu1 %v3519_v55  ;;  %v2717_v45 = vadd.f32 %v2716_v14, %v2524_v9  ;;  %v2529_v56 = vpop.f32.mrf.mxu0 }
 0x293   : > { %v2949_v40 = vmul.f32 0.5, %v2715_v1  ;;  %v3522_v26 = vadd.f32 %v3424_v49, %v6626_v4  ;;  %v2722_v47 = vpop.f32.mrf.mxu1  ;;  %v2530_v39 = vadd.f32 %v2529_v56, %v6577_v18  ;;  %v3314_v22 = vmul.f32 %v7633_v32, %v3218_v15  ;;  %v7634_v56 = vld [vmem:[#allocation49_spill] sm:$0xff] }
 0x294   : > { %v5010_v37 = vpop.eup %5009  ;;  %v2719_v25 = vadd.f32 %v2718_v60, %v2526_v59  ;;  %v3315_v2 = vmul.f32 %v6516_v31, %v3219_v52  ;;  %v3225_v38 = vmul.f32 0.5, %v3129_v3  ;;  %v2951_v51 = vmul.f32 0.5, %v2717_v45  ;;  %v2531_v55 = vpop.f32.mrf.mxu0 }
 0x295   : > { %v5012_v35 = vpop.eup %5011  ;;  %v3131_v27 = vadd.f32 1.0, %v5010_v37  ;;  %5023 = vtanh.f32 %v2949_v40  ;;  %v2724_v1 = vpop.f32.mrf.mxu1  ;;  %v3523_v9 = vadd.f32 %v3522_v26, %v3425_v42  ;;  %v2723_v49 = vadd.f32 %v2722_v47, %v2530_v39 }
 0x296   : > { %v3132_v14 = vadd.f32 1.0, %v5012_v35  ;;  %v2952_v4 = vmul.f32 0.5, %v2719_v25  ;;  %5025 = vtanh.f32 %v2951_v51  ;;  %v3427_v60 = vmul.f32 %v6593_v53, %v3314_v22  ;;  %v2533_v31 = vpop.f32.mrf.mxu0  ;;  %v7635_v22 = vld [vmem:[#allocation45_spill] sm:$0xff] }
 0x297   : > { %v5014_v7 = vpop.eup %5013  ;;  %v6831_v16 = vmul.f32 0.5, %v3131_v27  ;;  %v3428_v15 = vmul.f32 %v6597_v48, %v3315_v2  ;;  %v2726_v52 = vpop.f32.mrf.mxu1  ;;  %3524 = vadd.xlane.f32.xlu1 %v3523_v9  ;;  %v2954_v40 = vmul.f32 0.5, %v2723_v49  ;;  %v2532_v45 = vadd.f32 %v2531_v55, %v6579_v62 }
 0x298   : > { %v6835_v59 = vmul.f32 0.5, %v3132_v14  ;;  %v3134_v3 = vadd.f32 1.0, %v5014_v7  ;;  %5027 = vtanh.f32 %v2952_v4  ;;  %v3526_v42 = vadd.f32 %v3427_v60, %v6630_v54  ;;  %v2535_v37 = vpop.f32.mrf.mxu0 }
 0x299   : > { %v2534_v26 = vadd.f32 %v2533_v31, %v6577_v18  ;;  %v3317_v47 = vmul.f32 %v7634_v56, %v3221_v58  ;;  %v2728_v25 = vpop.f32.mrf.mxu1  ;;  %v5016_v39 = vpop.eup %5015  ;;  %5029 = vtanh.f32 %v2954_v40  ;;  %v3318_v2 = vmul.f32 %v7635_v22, %v3222_v63  ;;  %v7637_v22 = vld [vmem:[#allocation48_spill] sm:$0xff] }
 0x29a   : > { %v6841_v32 = vmul.f32 0.5, %v3134_v3  ;;  %v2536_v35 = vadd.f32 %v2535_v37, %v6579_v62  ;;  %v3135_v27 = vadd.f32 1.0, %v5016_v39  ;;  %v3527_v51 = vadd.f32 %v3526_v42, %v3428_v15  ;;  %v2539_v9 = vpop.f32.mrf.mxu0 }
 0x29b   : > { %v2725_v14 = vadd.f32 %v2724_v1, %v2532_v45  ;;  %v2727_v54 = vadd.f32 %v2726_v52, %v2534_v26  ;;  %v2732_v55 = vpop.f32.mrf.mxu1  ;;  %v3430_v49 = vmul.f32 %v6593_v53, %v3317_v47  ;;  %v3431_v58 = vmul.f32 %v6597_v48, %v3318_v2 }
 0x29c   : > { %v5018_v4 = vpop.eup %5017  ;;  %v2729_v7 = vadd.f32 %v2728_v25, %v2536_v35  ;;  %v2540_v60 = vadd.f32 %v2539_v9, %v6577_v18  ;;  %v6848_v3 = vmul.f32 0.5, %v3135_v27  ;;  %3528 = vadd.xlane.f32.xlu0 %v3527_v51  ;;  %v2541_v15 = vpop.f32.mrf.mxu0  ;;  %v7636_v25 = vld [vmem:[#allocation50_spill] sm:$0xff]  ;;  %v3321_v2 = vmul.f32 %v7637_v22, %v3225_v38 }
 0x29d   : > { %v5020_v31 = vpop.eup %5019  ;;  %v3137_v63 = vadd.f32 1.0, %v5018_v4  ;;  %v2955_v40 = vmul.f32 0.5, %v2725_v14  ;;  %v2957_v56 = vmul.f32 0.5, %v2727_v54  ;;  %v2734_v1 = vpop.f32.mrf.mxu1  ;;  %v3530_v42 = vadd.f32 %v3430_v49, %v6641_v20 }
 0x29e   : > { %v3138_v52 = vadd.f32 1.0, %v5020_v31  ;;  %v2958_v45 = vmul.f32 0.5, %v2729_v7  ;;  %v2733_v26 = vadd.f32 %v2732_v55, %v2540_v60  ;;  %v5022_v47 = vpop.eup %5021  ;;  %v3320_v39 = vmul.f32 %v7636_v25, %v6823_v17  ;;  %v2543_v35 = vpop.f32.mrf.mxu0  ;;  %v7638_v31 = vld [vmem:[#allocation51_spill] sm:$0xff] }
 0x29f   : > { %v6851_v37 = vmul.f32 0.5, %v3137_v63  ;;  %5031 = vtanh.f32 %v2955_v40  ;;  %v2736_v27 = vpop.f32.mrf.mxu1  ;;  %v3140_v14 = vadd.f32 1.0, %v5022_v47  ;;  %v3531_v54 = vadd.f32 %v3530_v42, %v3431_v58 }
 0x2a0   : > { %v6856_v51 = vmul.f32 0.5, %v3138_v52  ;;  %5033 = vtanh.f32 %v2957_v56  ;;  %v2960_v20 = vmul.f32 0.5, %v2733_v26  ;;  %v3433_v9 = vmul.f32 %v6593_v53, %v3320_v39  ;;  %v2545_v4 = vpop.f32.mrf.mxu0  ;;  %v7639_v56 = vld [vmem:[#allocation47_spill] sm:$0xff] }
 0x2a1   : > { %5035 = vtanh.f32 %v2958_v45  ;;  %v3434_v55 = vmul.f32 %v6597_v48, %v3321_v2  ;;  %v2738_v49 = vpop.f32.mrf.mxu1  ;;  %v6860_v60 = vmul.f32 0.5, %v3140_v14  ;;  %3532 = vadd.xlane.f32.xlu1 %v3531_v54  ;;  %v2542_v17 = vadd.f32 %v2541_v15, %v6579_v62 }
 0x2a2   : > { %v5024_v7 = vpop.eup %5023  ;;  %v2544_v38 = vadd.f32 %v2543_v35, %v6577_v18  ;;  %v3323_v63 = vmul.f32 %v7638_v31, %v6831_v16  ;;  %5037 = vtanh.f32 %v2960_v20  ;;  %v3534_v40 = vadd.f32 %v3433_v9, %v6645_v36  ;;  %v2549_v42 = vpop.f32.mrf.mxu0 }
 0x2a3   : > { %v3141_v58 = vadd.f32 1.0, %v5024_v7  ;;  %v3324_v52 = vmul.f32 %v7639_v56, %v6835_v59  ;;  %v2742_v45 = vpop.f32.mrf.mxu1  ;;  %v5026_v26 = vpop.eup %5025  ;;  %v2735_v47 = vadd.f32 %v2734_v1, %v2542_v17  ;;  %v2546_v15 = vadd.f32 %v2545_v4, %v6579_v62 }
 0x2a4   : > { %v2737_v25 = vadd.f32 %v2736_v27, %v2544_v38  ;;  %v3436_v39 = vmul.f32 %v6593_v53, %v3323_v63  ;;  %v3143_v16 = vadd.f32 1.0, %v5026_v26  ;;  %v3535_v35 = vadd.f32 %v3534_v40, %v3434_v55  ;;  %v2551_v36 = vpop.f32.mrf.mxu0  ;;  %v7640_v38 = vld [vmem:[#allocation52_spill] sm:$0xff]  ;;  %v7641_v26 = vld [vmem:[#allocation53_spill] sm:$0xff] }
 0x2a5   : > { %v5028_v22 = vpop.eup %5027  ;;  %v6871_v2 = vmul.f32 0.5, %v3141_v58  ;;  %v3437_v14 = vmul.f32 %v6597_v48, %v3324_v52  ;;  %v2744_v54 = vpop.f32.mrf.mxu1  ;;  %v2961_v59 = vmul.f32 0.5, %v2735_v47  ;;  %v2739_v17 = vadd.f32 %v2738_v49, %v2546_v15 }
 0x2a6   : > { %v3144_v20 = vadd.f32 1.0, %v5028_v22  ;;  %v2963_v9 = vmul.f32 0.5, %v2737_v25  ;;  %v3538_v7 = vadd.f32 %v3436_v39, %v6649_v19  ;;  %v5030_v1 = vpop.eup %5029  ;;  %v6875_v27 = vmul.f32 0.5, %v3143_v16  ;;  %3536 = vadd.xlane.f32.xlu0 %v3535_v35  ;;  %v2553_v55 = vpop.f32.mrf.mxu0 }
 0x2a7   : > { %v2550_v4 = vadd.f32 %v2549_v42, %v6577_v18  ;;  %v3326_v31 = vmul.f32 %v7640_v38, %v6841_v32  ;;  %v2746_v63 = vpop.f32.mrf.mxu1  ;;  %v3146_v40 = vadd.f32 1.0, %v5030_v1  ;;  %5039 = vtanh.f32 %v2961_v59  ;;  %v7643_v1 = vld [vmem:[#allocation54_spill] sm:$0xff] }
 0x2a8   : > { %v6880_v58 = vmul.f32 0.5, %v3144_v20  ;;  %v3539_v56 = vadd.f32 %v3538_v7, %v3437_v14  ;;  %5041 = vtanh.f32 %v2963_v9  ;;  %v2964_v52 = vmul.f32 0.5, %v2739_v17  ;;  %v2555_v25 = vpop.f32.mrf.mxu0 }
 0x2a9   : > { %v2743_v19 = vadd.f32 %v2742_v45, %v2550_v4  ;;  %v3327_v47 = vmul.f32 %v7641_v26, %v6848_v3  ;;  %v2748_v49 = vpop.f32.mrf.mxu1  ;;  %v6884_v39 = vmul.f32 0.5, %v3146_v40  ;;  %v3439_v32 = vmul.f32 %v6593_v53, %v3326_v31  ;;  %v7642_v45 = vld [vmem:[#allocation16_spill] sm:$0xff] }
 0x2aa   : > { %3540 = vadd.xlane.f32.xlu1 %v3539_v56  ;;  %v2552_v42 = vadd.f32 %v2551_v36, %v6579_v62  ;;  %v2554_v15 = vadd.f32 %v2553_v55, %v6577_v18  ;;  %5043 = vtanh.f32 %v2964_v52  ;;  %v3329_v35 = vmul.f32 %v7642_v45, %v6851_v37  ;;  %v2559_v14 = vpop.f32.mrf.mxu0 }
 0x2ab   : > { %v2966_v22 = vmul.f32 0.5, %v2743_v19  ;;  %v3440_v16 = vmul.f32 %v6597_v48, %v3327_v47  ;;  %v2752_v3 = vpop.f32.mrf.mxu1  ;;  %v3542_v59 = vadd.f32 %v3439_v32, %v6657_v29  ;;  %v3330_v17 = vmul.f32 %v7643_v1, %v6856_v51 }
 0x2ac   : > { %v5032_v20 = vpop.eup %5031  ;;  %v2745_v9 = vadd.f32 %v2744_v54, %v2552_v42  ;;  %v2747_v7 = vadd.f32 %v2746_v63, %v2554_v15  ;;  %v3442_v38 = vmul.f32 %v6593_v53, %v3329_v35  ;;  %v2556_v31 = vadd.f32 %v2555_v25, %v6579_v62  ;;  %v2561_v55 = vpop.f32.mrf.mxu0 }
 0x2ad   : > { %v5034_v36 = vpop.eup %5033  ;;  %v3147_v4 = vadd.f32 1.0, %v5032_v20  ;;  %5045 = vtanh.f32 %v2966_v22  ;;  %v2754_v40 = vpop.f32.mrf.mxu1  ;;  %v3543_v52 = vadd.f32 %v3542_v59, %v3440_v16  ;;  %v3443_v63 = vmul.f32 %v6597_v48, %v3330_v17  ;;  %v7645_v17 = vld [vmem:[#allocation19_spill] sm:$0xff] }
 0x2ae   : > { %v5036_v37 = vpop.eup %5035  ;;  %v3149_v56 = vadd.f32 1.0, %v5034_v36  ;;  %v2967_v19 = vmul.f32 0.5, %v2745_v9  ;;  %v2969_v26 = vmul.f32 0.5, %v2747_v7  ;;  %v3546_v51 = vadd.f32 %v3442_v38, %v6661_v46  ;;  %v2563_v47 = vpop.f32.mrf.mxu0  ;;  %v7644_v46 = vld [vmem:[#allocation17_spill] sm:$0xff]  ;;  %v7646_v38 = vld [vmem:[#allocation18_spill] sm:$0xff] }
 0x2af   : > { %v6897_v29 = vmul.f32 0.5, %v3147_v4  ;;  %v3150_v54 = vadd.f32 1.0, %v5036_v37  ;;  %v2756_v32 = vpop.f32.mrf.mxu1  ;;  %v5038_v42 = vpop.eup %5037  ;;  %3544 = vadd.xlane.f32.xlu0 %v3543_v52  ;;  %v2749_v25 = vadd.f32 %v2748_v49, %v2556_v31  ;;  %v2560_v22 = vadd.f32 %v2559_v14, %v6577_v18 }
 0x2b0   : > { %v6901_v15 = vmul.f32 0.5, %v3149_v56  ;;  %5047 = vtanh.f32 %v2967_v19  ;;  %v3152_v45 = vadd.f32 1.0, %v5038_v42  ;;  %v3547_v35 = vadd.f32 %v3546_v51, %v3443_v63  ;;  %v2565_v20 = vpop.f32.mrf.mxu0 }
 0x2b1   : > { %v6904_v16 = vmul.f32 0.5, %v3150_v54  ;;  %5049 = vtanh.f32 %v2969_v26  ;;  %v2758_v59 = vpop.f32.mrf.mxu1  ;;  %v2970_v9 = vmul.f32 0.5, %v2749_v25  ;;  %v2753_v7 = vadd.f32 %v2752_v3, %v2560_v22  ;;  %v7647_v54 = vld [vmem:[#allocation20_spill] sm:$0xff] }
 0x2b2   : > { %v3332_v1 = vmul.f32 %v7644_v46, %v6860_v60  ;;  %v3333_v36 = vmul.f32 %v7645_v17, %v6871_v2  ;;  %v6910_v4 = vmul.f32 0.5, %v3152_v45  ;;  %3548 = vadd.xlane.f32.xlu1 %v3547_v35  ;;  %v2562_v49 = vadd.f32 %v2561_v55, %v6579_v62  ;;  %v2569_v37 = vpop.f32.mrf.mxu0 }
 0x2b3   : > { %v2564_v14 = vadd.f32 %v2563_v47, %v6577_v18  ;;  %v3335_v31 = vmul.f32 %v7646_v38, %v6875_v27  ;;  %v2762_v56 = vpop.f32.mrf.mxu1  ;;  %5051 = vtanh.f32 %v2970_v9  ;;  %v2972_v3 = vmul.f32 0.5, %v2753_v7 }
 0x2b4   : > { %v3445_v52 = vmul.f32 %v6593_v53, %v3332_v1  ;;  %v3446_v60 = vmul.f32 %v6597_v48, %v3333_v36  ;;  %v5040_v19 = vpop.eup %5039  ;;  %v2755_v2 = vadd.f32 %v2754_v40, %v2562_v49  ;;  %v3336_v63 = vmul.f32 %v7647_v54, %v6880_v58  ;;  %v2571_v51 = vpop.f32.mrf.mxu0 }
 0x2b5   : > { %v2757_v26 = vadd.f32 %v2756_v32, %v2564_v14  ;;  %v3448_v55 = vmul.f32 %v6593_v53, %v3335_v31  ;;  %v2764_v47 = vpop.f32.mrf.mxu1  ;;  %v5042_v42 = vpop.eup %5041  ;;  %v3153_v27 = vadd.f32 1.0, %v5040_v19  ;;  %5053 = vtanh.f32 %v2972_v3  ;;  %v7648_v19 = vld [vmem:[#allocation55_spill] sm:$0xff] }
 0x2b6   : > { %v3550_v25 = vadd.f32 %v3445_v52, %v6672_v61  ;;  %v2566_v22 = vadd.f32 %v2565_v20, %v6579_v62  ;;  %v3155_v45 = vadd.f32 1.0, %v5042_v42  ;;  %v2973_v35 = vmul.f32 0.5, %v2755_v2  ;;  %v2573_v32 = vpop.f32.mrf.mxu0 }
 0x2b7   : > { %v2975_v9 = vmul.f32 0.5, %v2757_v26  ;;  %v3449_v40 = vmul.f32 %v6597_v48, %v3336_v63  ;;  %v2766_v7 = vpop.f32.mrf.mxu1  ;;  %v5044_v46 = vpop.eup %5043  ;;  %v6924_v58 = vmul.f32 0.5, %v3153_v27  ;;  %v3554_v17 = vadd.f32 %v3448_v55, %v6676_v33  ;;  %v7649_v26 = vld [vmem:[#allocation46_spill] sm:$0xff] }
 0x2b8   : > { %v3551_v1 = vadd.f32 %v3550_v25, %v3446_v60  ;;  %v2759_v36 = vadd.f32 %v2758_v59, %v2566_v22  ;;  %v6927_v49 = vmul.f32 0.5, %v3155_v45  ;;  %v3156_v14 = vadd.f32 1.0, %v5044_v46  ;;  %v2575_v20 = vpop.f32.mrf.mxu0 }
 0x2b9   : > { %5055 = vtanh.f32 %v2973_v35  ;;  %v2570_v61 = vadd.f32 %v2569_v37, %v6577_v18  ;;  %v2768_v38 = vpop.f32.mrf.mxu1  ;;  %v3555_v3 = vadd.f32 %v3554_v17, %v3449_v40  ;;  %v3338_v2 = vmul.f32 %v7648_v19, %v6884_v39 }
 0x2ba   : > { %v5046_v31 = vpop.eup %5045  ;;  %3552 = vadd.xlane.f32.xlu0 %v3551_v1  ;;  %5057 = vtanh.f32 %v2975_v9  ;;  %v2976_v52 = vmul.f32 0.5, %v2759_v36  ;;  %v6932_v60 = vmul.f32 0.5, %v3156_v14  ;;  %v3339_v54 = vmul.f32 %v7649_v26, %v6897_v29  ;;  %v2579_v63 = vpop.f32.mrf.mxu0 }
 0x2bb   : > { %v3158_v33 = vadd.f32 1.0, %v5046_v31  ;;  %v2763_v59 = vadd.f32 %v2762_v56, %v2570_v61  ;;  %v2772_v55 = vpop.f32.mrf.mxu1  ;;  %3556 = vadd.xlane.f32.xlu1 %v3555_v3  ;;  %v3451_v37 = vmul.f32 %v6593_v53, %v3338_v2  ;;  %v2572_v42 = vadd.f32 %v2571_v51, %v6579_v62  ;;  %v7650_v56 = vld [vmem:[#allocation56_spill] sm:$0xff] }
 0x2bc   : > { %5059 = vtanh.f32 %v2976_v52  ;;  %v2574_v27 = vadd.f32 %v2573_v32, %v6577_v18  ;;  %v3452_v45 = vmul.f32 %v6597_v48, %v3339_v54  ;;  %v3341_v35 = vmul.f32 %v7650_v56, %v6901_v15  ;;  %v2581_v29 = vpop.f32.mrf.mxu0  ;;  %v7651_v32 = vld [vmem:[#allocation60_spill] sm:$0xff] }
 0x2bd   : > { %v5048_v25 = vpop.eup %5047  ;;  %v6939_v22 = vmul.f32 0.5, %v3158_v33  ;;  %v2978_v39 = vmul.f32 0.5, %v2763_v59  ;;  %v2774_v9 = vpop.f32.mrf.mxu1  ;;  %v3558_v1 = vadd.f32 %v3451_v37, %v6684_v21  ;;  %v2765_v17 = vadd.f32 %v2764_v47, %v2572_v42  ;;  %v7652_v42 = vld [vmem:[#allocation21_spill] sm:$0xff] }
 0x2be   : > { %v5050_v40 = vpop.eup %5049  ;;  %v3159_v46 = vadd.f32 1.0, %v5048_v25  ;;  %v2767_v36 = vadd.f32 %v2766_v7, %v2574_v27  ;;  %v3342_v14 = vmul.f32 %v7651_v32, %v6904_v16  ;;  %v3454_v61 = vmul.f32 %v6593_v53, %v3341_v35  ;;  %v2583_v31 = vpop.f32.mrf.mxu0 }
 0x2bf   : > { %v3161_v51 = vadd.f32 1.0, %v5050_v40  ;;  %5061 = vtanh.f32 %v2978_v39  ;;  %v2776_v3 = vpop.f32.mrf.mxu1  ;;  %v3559_v15 = vadd.f32 %v3558_v1, %v3452_v45  ;;  %v2979_v19 = vmul.f32 0.5, %v2765_v17 }
 0x2c0   : > { %v6948_v52 = vmul.f32 0.5, %v3159_v46  ;;  %v2981_v2 = vmul.f32 0.5, %v2767_v36  ;;  %v5052_v33 = vpop.eup %5051  ;;  %v3455_v21 = vmul.f32 %v6597_v48, %v3342_v14  ;;  %v3562_v47 = vadd.f32 %v3454_v61, %v6695_v28  ;;  %v2585_v26 = vpop.f32.mrf.mxu0 }
 0x2c1   : > { %v6950_v59 = vmul.f32 0.5, %v3161_v51  ;;  %v2576_v7 = vadd.f32 %v2575_v20, %v6579_v62  ;;  %v2778_v16 = vpop.f32.mrf.mxu1  ;;  %v3162_v54 = vadd.f32 1.0, %v5052_v33  ;;  %3560 = vadd.xlane.f32.xlu0 %v3559_v15  ;;  %5063 = vtanh.f32 %v2979_v19 }
 0x2c2   : > { %v2580_v37 = vadd.f32 %v2579_v63, %v6577_v18  ;;  %v3344_v27 = vmul.f32 %v7652_v42, %v6910_v4  ;;  %v5054_v25 = vpop.eup %5053  ;;  %5065 = vtanh.f32 %v2981_v2  ;;  %v3563_v39 = vadd.f32 %v3562_v47, %v3455_v21  ;;  %v2589_v28 = vpop.f32.mrf.mxu0 }
 0x2c3   : > { %v2769_v45 = vadd.f32 %v2768_v38, %v2576_v7  ;;  %v3345_v56 = vmul.f32 %v6602_v11, %v6924_v58  ;;  %v2782_v35 = vpop.f32.mrf.mxu1  ;;  %v6960_v20 = vmul.f32 0.5, %v3162_v54  ;;  %v3164_v40 = vadd.f32 1.0, %v5054_v25 }
 0x2c4   : > { %v2773_v46 = vadd.f32 %v2772_v55, %v2580_v37  ;;  %v3457_v1 = vmul.f32 %v6593_v53, %v3344_v27  ;;  %3564 = vadd.xlane.f32.xlu1 %v3563_v39  ;;  %v2582_v4 = vadd.f32 %v2581_v29, %v6579_v62  ;;  %v2584_v36 = vadd.f32 %v2583_v31, %v6577_v18  ;;  %v2591_v38 = vpop.f32.mrf.mxu0  ;;  %v7653_v55 = vld [vmem:[#allocation22_spill] sm:$0xff] }
 0x2c5   : > { %v2982_v63 = vmul.f32 0.5, %v2769_v45  ;;  %v3458_v17 = vmul.f32 %v6597_v48, %v3345_v56  ;;  %v2784_v51 = vpop.f32.mrf.mxu1  ;;  %v6966_v11 = vmul.f32 0.5, %v3164_v40  ;;  %v3347_v61 = vmul.f32 %v7653_v55, %v6927_v49  ;;  %v7654_v56 = vld [vmem:[#allocation23_spill] sm:$0xff] }
 0x2c6   : > { %v5056_v32 = vpop.eup %5055  ;;  %v2984_v58 = vmul.f32 0.5, %v2773_v46  ;;  %v3566_v14 = vadd.f32 %v3457_v1, %v6699_v12  ;;  %v2775_v2 = vadd.f32 %v2774_v9, %v2582_v4  ;;  %v2777_v33 = vadd.f32 %v2776_v3, %v2584_v36  ;;  %v2593_v21 = vpop.f32.mrf.mxu0 }
 0x2c7   : > { %v5058_v15 = vpop.eup %5057  ;;  %v3165_v19 = vadd.f32 1.0, %v5056_v32  ;;  %5067 = vtanh.f32 %v2982_v63  ;;  %v2786_v29 = vpop.f32.mrf.mxu1  ;;  %v3348_v7 = vmul.f32 %v6618_v41, %v6932_v60  ;;  %v3460_v49 = vmul.f32 %v6593_v53, %v3347_v61 }
 0x2c8   : > { %v3167_v47 = vadd.f32 1.0, %v5058_v15  ;;  %5069 = vtanh.f32 %v2984_v58  ;;  %v3567_v31 = vadd.f32 %v3566_v14, %v3458_v17  ;;  %v2985_v12 = vmul.f32 0.5, %v2775_v2  ;;  %v2595_v27 = vpop.f32.mrf.mxu0 }
 0x2c9   : > { %v5060_v54 = vpop.eup %5059  ;;  %v6973_v37 = vmul.f32 0.5, %v3165_v19  ;;  %v2987_v42 = vmul.f32 0.5, %v2777_v33  ;;  %v6976_v25 = vpop.f32.mrf.mxu1  ;;  %v3461_v39 = vmul.f32 %v6597_v48, %v3348_v7  ;;  %v2586_v45 = vadd.f32 %v2585_v26, %v6579_v62 }
 0x2ca   : > { %v6978_v9 = vmul.f32 0.5, %v3167_v47  ;;  %v3168_v3 = vadd.f32 1.0, %v5060_v54  ;;  %3568 = vadd.xlane.f32.xlu0 %v3567_v31  ;;  %5071 = vtanh.f32 %v2985_v12  ;;  %v3570_v41 = vadd.f32 %v3460_v49, %v6706_v5  ;;  %v2599_v46 = vpop.f32.mrf.mxu0 }
 0x2cb   : > { %v2590_v60 = vadd.f32 %v2589_v28, %v6577_v18  ;;  %v3350_v40 = vmul.f32 %v7654_v56, %v6939_v22  ;;  %v2792_v1 = vpop.f32.mrf.mxu1  ;;  %5073 = vtanh.f32 %v2987_v42  ;;  %v2779_v4 = vadd.f32 %v2778_v16, %v2586_v45 }
 0x2cc   : > { %v5062_v63 = vpop.eup %5061  ;;  %v6986_v17 = vmul.f32 0.5, %v3168_v3  ;;  %v3351_v36 = vmul.f32 %v6635_v10, %v6948_v52  ;;  %v3571_v26 = vadd.f32 %v3570_v41, %v3461_v39  ;;  %v2601_v14 = vpop.f32.mrf.mxu0  ;;  %v2592_v61 = vadd.f32 %v2591_v38, %v6579_v62 }
 0x2cd   : > { %v3170_v32 = vadd.f32 1.0, %v5062_v63  ;;  %v2783_v58 = vadd.f32 %v2782_v35, %v2590_v60  ;;  %v3463_v5 = vmul.f32 %v6593_v53, %v3350_v40  ;;  %v6991_v28 = vpop.f32.mrf.mxu1  ;;  %v2988_v55 = vmul.f32 0.5, %v2779_v4  ;;  %v7655_v35 = vld [vmem:[#allocation57_spill] sm:$0xff]  ;;  %v7656_v63 = vld [vmem:[#allocation24_spill] sm:$0xff] }
 0x2ce   : > { %v3464_v22 = vmul.f32 %v6597_v48, %v3351_v36  ;;  %v2594_v15 = vadd.f32 %v2593_v21, %v6577_v18  ;;  %v5064_v19 = vpop.eup %5063  ;;  %3572 = vadd.xlane.f32.xlu1 %v3571_v26  ;;  %v3353_v2 = vmul.f32 %v7655_v35, %v6950_v59  ;;  %v2603_v33 = vpop.f32.mrf.mxu0  ;;  %v2785_v54 = vadd.f32 %v2784_v51, %v2592_v61  ;;  %v7657_v35 = vld [vmem:[#allocation25_spill] sm:$0xff] }
 0x2cf   : > { %v6996_v16 = vmul.f32 0.5, %v3170_v32  ;;  %v2990_v10 = vmul.f32 0.5, %v2783_v58  ;;  %v3574_v52 = vadd.f32 %v3463_v5, %v6710_v8  ;;  %v2796_v47 = vpop.f32.mrf.mxu1  ;;  %v5066_v31 = vpop.eup %5065  ;;  %v3171_v7 = vadd.f32 1.0, %v5064_v19 }
 0x2d0   : > { %5075 = vtanh.f32 %v2988_v55  ;;  %v2787_v12 = vadd.f32 %v2786_v29, %v2594_v15  ;;  %v3173_v38 = vadd.f32 1.0, %v5066_v31  ;;  %v3354_v42 = vmul.f32 %v6651_v43, %v6960_v20  ;;  %v2605_v49 = vpop.f32.mrf.mxu0 }
 0x2d1   : > { %5077 = vtanh.f32 %v2990_v10  ;;  %v3575_v21 = vadd.f32 %v3574_v52, %v3464_v22  ;;  %v7003_v3 = vpop.f32.mrf.mxu1  ;;  %v3267_v8 = vmul.f32 0.5, %v3171_v7  ;;  %v2991_v39 = vmul.f32 0.5, %v2785_v54 }
 0x2d2   : > { %v2993_v45 = vmul.f32 0.5, %v2787_v12  ;;  %v3466_v59 = vmul.f32 %v6593_v53, %v3353_v2  ;;  %v7006_v41 = vmul.f32 0.5, %v3173_v38  ;;  %v3467_v51 = vmul.f32 %v6597_v48, %v3354_v42  ;;  %v2609_v56 = vpop.f32.mrf.mxu0 }
 0x2d3   : > { %3576 = vadd.xlane.f32.xlu0 %v3575_v21  ;;  %v2596_v29 = vadd.f32 %v2595_v27, %v6579_v62  ;;  %v2600_v60 = vadd.f32 %v2599_v46, %v6577_v18  ;;  %v2802_v40 = vpop.f32.mrf.mxu1  ;;  %5079 = vtanh.f32 %v2991_v39  ;;  %v3356_v4 = vmul.f32 %v7656_v63, %v6966_v11 }
 0x2d4   : > { %v5068_v43 = vpop.eup %5067  ;;  %v3578_v20 = vadd.f32 %v3466_v59, %v6721_v30  ;;  %v3357_v36 = vmul.f32 %v6666_v13, %v6973_v37  ;;  %5081 = vtanh.f32 %v2993_v45  ;;  %v2611_v5 = vpop.f32.mrf.mxu0  ;;  %v2602_v11 = vadd.f32 %v2601_v14, %v6579_v62 }
 0x2d5   : > { %v5070_v32 = vpop.eup %5069  ;;  %v3174_v26 = vadd.f32 1.0, %v5068_v43  ;;  %v2789_v58 = vadd.f32 %v6976_v25, %v2596_v29  ;;  %v2793_v27 = vadd.f32 %v2792_v1, %v2600_v60  ;;  %v3469_v22 = vmul.f32 %v6593_v53, %v3356_v4  ;;  %v2804_v10 = vpop.f32.mrf.mxu1  ;;  %v7658_v29 = vld [vmem:[#allocation26_spill] sm:$0xff] }
 0x2d6   : > { %v3176_v46 = vadd.f32 1.0, %v5070_v32  ;;  %v3579_v55 = vadd.f32 %v3578_v20, %v3467_v51  ;;  %v3470_v61 = vmul.f32 %v6597_v48, %v3357_v36  ;;  %v2613_v13 = vpop.f32.mrf.mxu0  ;;  %v2604_v1 = vadd.f32 %v2603_v33, %v6577_v18  ;;  %v7659_v43 = vld [vmem:[#allocation62_spill] sm:$0xff] }
 0x2d7   : > { %v3270_v30 = vmul.f32 0.5, %v3174_v26  ;;  %v2994_v15 = vmul.f32 0.5, %v2789_v58  ;;  %v2996_v19 = vmul.f32 0.5, %v2793_v27  ;;  %v5072_v37 = vpop.eup %5071  ;;  %v3582_v25 = vadd.f32 %v3469_v22, %v6725_v57  ;;  %v2806_v45 = vpop.f32.mrf.mxu1 }
 0x2d8   : > { %v7020_v52 = vmul.f32 0.5, %v3176_v46  ;;  %3580 = vadd.xlane.f32.xlu1 %v3579_v55  ;;  %v3359_v2 = vmul.f32 %v7657_v35, %v6978_v9  ;;  %v5074_v31 = vpop.eup %5073  ;;  %v3177_v7 = vadd.f32 1.0, %v5072_v37  ;;  %v2795_v54 = vadd.f32 %v6991_v28, %v2602_v11  ;;  %v2615_v9 = vpop.f32.mrf.mxu0 }
 0x2d9   : > { %5083 = vtanh.f32 %v2994_v15  ;;  %v3360_v14 = vmul.f32 %v6678_v50, %v6986_v17  ;;  %v3179_v12 = vadd.f32 1.0, %v5074_v31  ;;  %v3583_v38 = vadd.f32 %v3582_v25, %v3470_v61  ;;  %v2808_v27 = vpop.f32.mrf.mxu1  ;;  %v7660_v15 = vld [vmem:[#allocation27_spill] sm:$0xff] }
 0x2da   : > { %5085 = vtanh.f32 %v2996_v19  ;;  %v2797_v21 = vadd.f32 %v2796_v47, %v2604_v1  ;;  %v3273_v42 = vmul.f32 0.5, %v3177_v7  ;;  %v2997_v39 = vmul.f32 0.5, %v2795_v54  ;;  %v2619_v46 = vpop.f32.mrf.mxu0  ;;  %v7661_v1 = vld [vmem:[#allocation35_spill] sm:$0xff] }
 0x2db   : > { %v3472_v57 = vmul.f32 %v6593_v53, %v3359_v2  ;;  %v3473_v33 = vmul.f32 %v6597_v48, %v3360_v14  ;;  %v7031_v59 = vmul.f32 0.5, %v3179_v12  ;;  %3584 = vadd.xlane.f32.xlu0 %v3583_v38  ;;  %v2606_v28 = vadd.f32 %v2605_v49, %v6579_v62  ;;  %v2812_v7 = vpop.f32.mrf.mxu1 }
 0x2dc   : > { %v2999_v51 = vmul.f32 0.5, %v2797_v21  ;;  %v2610_v50 = vadd.f32 %v2609_v56, %v6577_v18  ;;  %5087 = vtanh.f32 %v2997_v39  ;;  %v3362_v60 = vmul.f32 %v7658_v29, %v6996_v16  ;;  %v2621_v54 = vpop.f32.mrf.mxu0 }
 0x2dd   : > { %v5076_v17 = vpop.eup %5075  ;;  %v3586_v47 = vadd.f32 %v3472_v57, %v6733_v6  ;;  %v3363_v20 = vmul.f32 %v7659_v43, %v3267_v8  ;;  %v2799_v36 = vadd.f32 %v7003_v3, %v2606_v28  ;;  %v2612_v16 = vadd.f32 %v2611_v5, %v6579_v62  ;;  %v7662_v57 = vld [vmem:[#allocation58_spill] sm:$0xff] }
 0x2de   : > { %v5078_v63 = vpop.eup %5077  ;;  %v3180_v4 = vadd.f32 1.0, %v5076_v17  ;;  %5089 = vtanh.f32 %v2999_v51  ;;  %v2803_v32 = vadd.f32 %v2802_v40, %v2610_v50  ;;  %v3475_v49 = vmul.f32 %v6593_v53, %v3362_v60  ;;  %v2623_v29 = vpop.f32.mrf.mxu0 }
 0x2df   : > { %v3182_v26 = vadd.f32 1.0, %v5078_v63  ;;  %v3587_v58 = vadd.f32 %v3586_v47, %v3473_v33  ;;  %v3476_v56 = vmul.f32 %v6597_v48, %v3363_v20  ;;  %v3000_v55 = vmul.f32 0.5, %v2799_v36  ;;  %v2814_v47 = vpop.f32.mrf.mxu1 }
 0x2e0   : > { %v3276_v6 = vmul.f32 0.5, %v3180_v4  ;;  %v3002_v22 = vmul.f32 0.5, %v2803_v32  ;;  %v5080_v8 = vpop.eup %5079  ;;  %v3590_v3 = vadd.f32 %v3475_v49, %v6744_v44  ;;  %v2614_v40 = vadd.f32 %v2613_v13, %v6577_v18 }
 0x2e1   : > { %v7043_v61 = vmul.f32 0.5, %v3182_v26  ;;  %3588 = vadd.xlane.f32.xlu1 %v3587_v58  ;;  %v3365_v19 = vmul.f32 %v7660_v15, %v7006_v41  ;;  %v5082_v11 = vpop.eup %5081  ;;  %v3183_v37 = vadd.f32 1.0, %v5080_v8  ;;  %5091 = vtanh.f32 %v3000_v55  ;;  %v7663_v26 = vld [vmem:[#allocation28_spill] sm:$0xff]  ;;  %v7664_v55 = vld [vmem:[#allocation33_spill] sm:$0xff] }
 0x2e2   : > { %v2805_v25 = vadd.f32 %v2804_v10, %v2612_v16  ;;  %v3366_v35 = vmul.f32 %v7661_v1, %v3270_v30  ;;  %v3185_v2 = vadd.f32 1.0, %v5082_v11  ;;  %5093 = vtanh.f32 %v3002_v22  ;;  %v2625_v16 = vpop.f32.mrf.mxu0 }
 0x2e3   : > { %v3591_v5 = vadd.f32 %v3590_v3, %v3476_v56  ;;  %v2807_v31 = vadd.f32 %v2806_v45, %v2614_v40  ;;  %v3279_v14 = vmul.f32 0.5, %v3183_v37  ;;  %v3478_v44 = vmul.f32 %v6593_v53, %v3365_v19 }
 0x2e4   : > { %v3003_v12 = vmul.f32 0.5, %v2805_v25  ;;  %v3479_v13 = vmul.f32 %v6597_v48, %v3366_v35  ;;  %v3281_v38 = vmul.f32 0.5, %v3185_v2  ;;  %v2616_v21 = vadd.f32 %v2615_v9, %v6579_v62  ;;  %v7665_v25 = vld [vmem:[#allocation29_spill] sm:$0xff] }
 0x2e5   : > { %3592 = vadd.xlane.f32.xlu0 %v3591_v5  ;;  %v3005_v41 = vmul.f32 0.5, %v2807_v31  ;;  %v2620_v10 = vadd.f32 %v2619_v46, %v6577_v18  ;;  %v3594_v39 = vadd.f32 %v3478_v44, %v6748_v0  ;;  %v3368_v33 = vmul.f32 %v7662_v57, %v7020_v52  ;;  %v2816_v46 = vpop.f32.mrf.mxu1  ;;  %v7666_v35 = vld [vmem:[#allocation65_spill] sm:$0xff]  ;;  %v7667_v31 = vld [vmem:[#allocation63_spill] sm:$0xff] }
 0x2e6   : > { %v5084_v30 = vpop.eup %5083  ;;  %5095 = vtanh.f32 %v3003_v12  ;;  %v3369_v45 = vmul.f32 %v6715_v24, %v3273_v42  ;;  %v2809_v50 = vadd.f32 %v2808_v27, %v2616_v21  ;;  %v2622_v52 = vadd.f32 %v2621_v54, %v6579_v62  ;;  %v7668_v54 = vld [vmem:[#allocation30_spill] sm:$0xff] }
 0x2e7   : > { %v5086_v51 = vpop.eup %5085  ;;  %v3186_v28 = vadd.f32 1.0, %v5084_v30  ;;  %5097 = vtanh.f32 %v3005_v41  ;;  %v2813_v17 = vadd.f32 %v2812_v7, %v2620_v10  ;;  %v3595_v9 = vadd.f32 %v3594_v39, %v3479_v13  ;;  %v2818_v5 = vpop.f32.mrf.mxu1 }
 0x2e8   : > { %v3188_v60 = vadd.f32 1.0, %v5086_v51  ;;  %v3481_v43 = vmul.f32 %v6593_v53, %v3368_v33  ;;  %v3482_v20 = vmul.f32 %v6597_v48, %v3369_v45  ;;  %v3006_v0 = vmul.f32 0.5, %v2809_v50  ;;  %v7670_v45 = vld [vmem:[#allocation67_spill] sm:$0xff] }
 0x2e9   : > { %v3282_v63 = vmul.f32 0.5, %v3186_v28  ;;  %v3008_v4 = vmul.f32 0.5, %v2813_v17  ;;  %v5088_v36 = vpop.eup %5087  ;;  %3596 = vadd.xlane.f32.xlu1 %v3595_v9  ;;  %v2624_v32 = vadd.f32 %v2623_v29, %v6577_v18  ;;  %v3371_v58 = vmul.f32 %v7663_v26, %v7031_v59  ;;  %v7671_v17 = vld [vmem:[#allocation31_spill] sm:$0xff]  ;;  %v7672_v29 = vld [vmem:[#allocation66_spill] sm:$0xff] }
 0x2ea   : > { %v3284_v24 = vmul.f32 0.5, %v3188_v60  ;;  %v3598_v42 = vadd.f32 %v3481_v43, %v6755_v23  ;;  %v3189_v56 = vadd.f32 1.0, %v5088_v36  ;;  %5099 = vtanh.f32 %v3006_v0 }
 0x2eb   : > { %v5090_v49 = vpop.eup %5089  ;;  %v2815_v27 = vadd.f32 %v2814_v47, %v2622_v52  ;;  %v3372_v22 = vmul.f32 %v7664_v55, %v3276_v6  ;;  %5101 = vtanh.f32 %v3008_v4  ;;  %v2817_v40 = vadd.f32 %v2816_v46, %v2624_v32  ;;  %v7677_v55 = vld [vmem:[#allocation11_spill] sm:$0xff] }
 0x2ec   : > { %v3191_v8 = vadd.f32 1.0, %v5090_v49  ;;  %v3599_v3 = vadd.f32 %v3598_v42, %v3482_v20  ;;  %v3285_v15 = vmul.f32 0.5, %v3189_v56  ;;  %v3484_v23 = vmul.f32 %v6593_v53, %v3371_v58  ;;  %v7674_v42 = vld [vmem:[#allocation32_spill] sm:$0xff]  ;;  %v7676_v56 = vld [vmem:[#allocation34_spill] sm:$0xff] }
 0x2ed   : > { %v3009_v19 = vmul.f32 0.5, %v2815_v27  ;;  %v3485_v18 = vmul.f32 %v6597_v48, %v3372_v22  ;;  %v3011_v59 = vmul.f32 0.5, %v2817_v40  ;;  %v2626_v37 = vadd.f32 %v2625_v16, %v6579_v62  ;;  %v7675_v49 = vld [vmem:[#allocation68_spill] sm:$0xff]  ;;  %v7678_v16 = vld [vmem:[#allocation61_spill] sm:$0xff] }
 0x2ee   : > { %v3287_v11 = vmul.f32 0.5, %v3191_v8  ;;  %3600 = vadd.xlane.f32.xlu0 %v3599_v3  ;;  %v3374_v1 = vmul.f32 %v7665_v25, %v7043_v61  ;;  %v5092_v6 = vpop.eup %5091  ;;  %v3602_v2 = vadd.f32 %v3484_v23, %v7666_v35  ;;  %v3375_v7 = vmul.f32 %v7667_v31, %v3279_v14  ;;  %v7669_v61 = vld [vmem:[#allocation64_spill] sm:$0xff]  ;;  %v7679_v8 = vld [vmem:[#allocation59_spill] sm:$0xff]  ;;  %v7680_v23 = vld [vmem:[#allocation70_spill] sm:$0xff] }
 0x2ef   : > { %5103 = vtanh.f32 %v3009_v19  ;;  %v3377_v12 = vmul.f32 %v7668_v54, %v3281_v38  ;;  %v5094_v44 = vpop.eup %5093  ;;  %v3192_v13 = vadd.f32 1.0, %v5092_v6  ;;  %v2819_v41 = vadd.f32 %v2818_v5, %v2626_v37 }
 0x2f0   : > { %5105 = vtanh.f32 %v3011_v59  ;;  %v3487_v21 = vmul.f32 %v6593_v53, %v3374_v1  ;;  %v3194_v10 = vadd.f32 1.0, %v5094_v44  ;;  %v3603_v62 = vadd.f32 %v3602_v2, %v3485_v18  ;;  %v7682_v2 = vld [vmem:[#allocation37_spill] sm:$0xff] }
 0x2f1   : > { %v3488_v30 = vmul.f32 %v6597_v48, %v3375_v7  ;;  %v3378_v39 = vmul.f32 %v7669_v61, %v3282_v63  ;;  %v3288_v57 = vmul.f32 0.5, %v3192_v13  ;;  %v3012_v33 = vmul.f32 0.5, %v2819_v41  ;;  %v7673_v63 = vld [vmem:[#allocation69_spill] sm:$0xff]  ;;  %v7683_v13 = vld [vmem:[#allocation36_spill] sm:$0xff] }
 0x2f2   : > { %v3606_v51 = vadd.f32 %v3487_v21, %v7670_v45  ;;  %v3490_v14 = vmul.f32 %v6593_v53, %v3377_v12  ;;  %v3290_v38 = vmul.f32 0.5, %v3194_v10  ;;  %3604 = vadd.xlane.f32.xlu1 %v3603_v62  ;;  %v3380_v47 = vmul.f32 %v7671_v17, %v3284_v24 }
 0x2f3   : > { %v5096_v28 = vpop.eup %5095  ;;  %v3491_v50 = vmul.f32 %v6597_v48, %v3378_v39  ;;  %v3381_v60 = vmul.f32 %v7672_v29, %v3285_v15  ;;  %5107 = vtanh.f32 %v3012_v33  ;;  %v3383_v32 = vmul.f32 %v7674_v42, %v3287_v11  ;;  %v7681_v11 = vld [vmem:[#allocation38_spill] sm:$0xff] }
 0x2f4   : > { %v5098_v9 = vpop.eup %5097  ;;  %v3195_v43 = vadd.f32 1.0, %v5096_v28  ;;  %v3607_v20 = vadd.f32 %v3606_v51, %v3488_v30  ;;  %v3610_v0 = vadd.f32 %v3490_v14, %v7673_v63  ;;  %v3493_v52 = vmul.f32 %v6593_v53, %v3380_v47  ;;  %v7685_v14 = vld [vmem:[#allocation40_spill] sm:$0xff]  ;;  %v7686_v47 = vld [vmem:[#allocation39_spill] sm:$0xff] }
 0x2f5   : > { %v3197_v4 = vadd.f32 1.0, %v5098_v9  ;;  %v3494_v36 = vmul.f32 %v6597_v48, %v3381_v60  ;;  %v3384_v24 = vmul.f32 %v7675_v49, %v3288_v57  ;;  %v3386_v27 = vmul.f32 %v7676_v56, %v3290_v38  ;;  %v7684_v57 = vld [vmem:[#allocation71_spill] sm:$0xff] }
 0x2f6   : > { %v3291_v26 = vmul.f32 0.5, %v3195_v43  ;;  %3608 = vadd.xlane.f32.xlu0 %v3607_v20  ;;  %v3611_v58 = vadd.f32 %v3610_v0, %v3491_v50  ;;  %v3614_v22 = vadd.f32 %v3493_v52, %v7677_v55  ;;  %v3495_v3 = vmul.f32 %v7679_v8, %v7678_v16  ;;  %v7687_v20 = vld [vmem:[#allocation72_spill] sm:$0xff]  ;;  %v7688_v52 = vld [vmem:[#allocation42_spill] sm:$0xff] }
 0x2f7   : > { %v3293_v46 = vmul.f32 0.5, %v3197_v4  ;;  %v3496_v40 = vmul.f32 %v6593_v53, %v3383_v32  ;;  %v5100_v15 = vpop.eup %5099  ;;  %v3497_v19 = vmul.f32 %v6597_v48, %v3384_v24  ;;  %v3498_v59 = vmul.f32 %v7679_v8, %v7681_v11 }
 0x2f8   : > { %3612 = vadd.xlane.f32.xlu1 %v3611_v58  ;;  %v3387_v18 = vmul.f32 %v7680_v23, %v3291_v26  ;;  %v3499_v37 = vmul.f32 %v6593_v53, %v3386_v27  ;;  %v5102_v25 = vpop.eup %5101  ;;  %v3198_v1 = vadd.f32 1.0, %v5100_v15  ;;  %v3615_v6 = vadd.f32 %v3614_v22, %v3494_v36  ;;  %v7689_v26 = vld [vmem:[#allocation41_spill] sm:$0xff]  ;;  %v7117_v22 = vld [vmem:[#allocation2] ss:$0 sm:$0xff] }
 0x2f9   : > { %v3618_v35 = vadd.f32 %v3496_v40, %v3495_v3  ;;  %v3389_v5 = vmul.f32 %v7682_v2, %v3293_v46  ;;  %v3200_v31 = vadd.f32 1.0, %v5102_v25  ;;  %v3501_v41 = vmul.f32 %v7679_v8, %v7683_v13 }
 0x2fa   : > { %v3500_v7 = vmul.f32 %v6597_v48, %v3387_v18  ;;  %v3622_v54 = vadd.f32 %v3499_v37, %v3498_v59  ;;  %v3294_v12 = vmul.f32 0.5, %v3198_v1  ;;  %3616 = vadd.xlane.f32.xlu0 %v3615_v6  ;;  %v3504_v29 = vmul.f32 %v7679_v8, %v7686_v47 }
 0x2fb   : > { %v3619_v44 = vadd.f32 %v3618_v35, %v3497_v19  ;;  %v3502_v21 = vmul.f32 %v6593_v53, %v3389_v5  ;;  %v3296_v62 = vmul.f32 0.5, %v3200_v31  ;;  %v3507_v58 = vmul.f32 %v7679_v8, %v7689_v26 }
 0x2fc   : > { %v5104_v10 = vpop.eup %5103  ;;  %v3623_v30 = vadd.f32 %v3622_v54, %v3500_v7  ;;  %v3390_v33 = vmul.f32 %v7684_v57, %v3294_v12 }
 0x2fd   : > { %v5106_v61 = vpop.eup %5105  ;;  %v3201_v39 = vadd.f32 1.0, %v5104_v10  ;;  %3620 = vadd.xlane.f32.xlu1 %v3619_v44  ;;  %v3626_v45 = vadd.f32 %v3502_v21, %v3501_v41  ;;  %v3392_v28 = vmul.f32 %v7685_v14, %v3296_v62 }
 0x2fe   : > { %v3203_v51 = vadd.f32 1.0, %v5106_v61  ;;  %3624 = vadd.xlane.f32.xlu0 %v3623_v30  ;;  %v3503_v50 = vmul.f32 %v6597_v48, %v3390_v33 }
 0x2ff   : > { %v3297_v38 = vmul.f32 0.5, %v3201_v39  ;;  %v3505_v60 = vmul.f32 %v6593_v53, %v3392_v28 }
 0x300   : > { %v3299_v17 = vmul.f32 0.5, %v3203_v51  ;;  %v5108_v9 = vpop.eup %5107  ;;  %v3627_v43 = vadd.f32 %v3626_v45, %v3503_v50 }
 0x301   : > { %v3393_v63 = vmul.f32 %v7687_v20, %v3297_v38  ;;  %v3204_v0 = vadd.f32 1.0, %v5108_v9  ;;  %v3630_v4 = vadd.f32 %v3505_v60, %v3504_v29 }
 0x302   : > { %v3395_v36 = vmul.f32 %v7688_v52, %v3299_v17  ;;  %3628 = vadd.xlane.f32.xlu1 %v3627_v43 }
 0x303   : > { %v3506_v42 = vmul.f32 %v6597_v48, %v3393_v63  ;;  %v3300_v32 = vmul.f32 0.5, %v3204_v0 }
 0x304   : > { %v3508_v49 = vmul.f32 %v6593_v53, %v3395_v36 }
 0x305   : > { %v3631_v24 = vadd.f32 %v3630_v4, %v3506_v42  ;;  %v3396_v56 = vmul.f32 %v6805_v34, %v3300_v32 }
 0x306   : > { %v3634_v27 = vadd.f32 %v3508_v49, %v3507_v58 }
 0x307   : > { %3632 = vadd.xlane.f32.xlu0 %v3631_v24  ;;  %v3509_v46 = vmul.f32 %v6597_v48, %v3396_v56 }
 0x309   : > { %v3635_v55 = vadd.f32 %v3634_v27, %v3509_v46 }
 0x30b   : > { %3636 = vadd.xlane.f32.xlu1 %v3635_v55 }
 0x30e   : > { %v3513_v16 = vpop.xlane.xlu0 %3512 }
 0x30f   : > { %v3645_v3 = vadd.f32 %v7117_v22, %v3513_v16 }
 0x311   : > { %3678 = vst.msk [vmem:[%s7120_s10] sm:$0xff] %vm3677_vm0, %v3645_v3 }
 0x314   : > { %v3517_v53 = vpop.xlane.xlu0 %3516 }
 0x315   : > { %v3646_v48 = vadd.f32 %v7117_v22, %v3517_v53 }
 0x317   : > { %3679 = vst.msk [vmem:[%s7120_s10 + $0x8] sm:$0xff] %vm3677_vm0, %v3646_v48 }
 0x31b   : > { %v3521_v34 = vpop.xlane.xlu1 %3520 }
 0x31c   : > { %v3647_v8 = vadd.f32 %v7117_v22, %v3521_v34 }
 0x31e   : > { %3680 = vst.msk [vmem:[%s7120_s10 + $0x10] sm:$0xff] %vm3677_vm0, %v3647_v8 }
 0x320   : > { %v3525_v40 = vpop.xlane.xlu1 %3524 }
 0x321   : > { %v3648_v15 = vadd.f32 %v7117_v22, %v3525_v40 }
 0x323   : > { %3681 = vst.msk [vmem:[%s7120_s10 + $0x18] sm:$0xff] %vm3677_vm0, %v3648_v15 }
 0x325   : > { %v3529_v19 = vpop.xlane.xlu0 %3528 }
 0x326   : > { %v3649_v23 = vadd.f32 %v7117_v22, %v3529_v19 }
 0x328   : > { %3682 = vst.msk [vmem:[%s7120_s10 + $0x20] sm:$0xff] %vm3677_vm0, %v3649_v23 }
 0x32a   : > { %v3533_v18 = vpop.xlane.xlu1 %3532 }
 0x32b   : > { %v3650_v11 = vadd.f32 %v7117_v22, %v3533_v18 }
 0x32d   : > { %3683 = vst.msk [vmem:[%s7120_s10 + $0x28] sm:$0xff] %vm3677_vm0, %v3650_v11 }
 0x32f   : > { %v3537_v59 = vpop.xlane.xlu0 %3536 }
 0x330   : > { %v3651_v37 = vadd.f32 %v7117_v22, %v3537_v59 }
 0x332   : > { %3684 = vst.msk [vmem:[%s7120_s10 + $0x30] sm:$0xff] %vm3677_vm0, %v3651_v37 }
 0x333   : > { %v3541_v25 = vpop.xlane.xlu1 %3540 }
 0x334   : > { %v3652_v1 = vadd.f32 %v7117_v22, %v3541_v25 }
 0x336   : > { %3685 = vst.msk [vmem:[%s7120_s10 + $0x38] sm:$0xff] %vm3677_vm0, %v3652_v1 }
 0x338   : > { %v3545_v6 = vpop.xlane.xlu0 %3544 }
 0x339   : > { %v3653_v35 = vadd.f32 %v7117_v22, %v3545_v6 }
 0x33b   : > { %3686 = vst.msk [vmem:[%s7120_s10 + $0x40] sm:$0xff] %vm3677_vm0, %v3653_v35  ;;  %v3549_v2 = vpop.xlane.xlu1 %3548 }
 0x33c   : > { %v3654_v5 = vadd.f32 %v7117_v22, %v3549_v2 }
 0x33e   : > { %3687 = vst.msk [vmem:[%s7120_s10 + $0x48] sm:$0xff] %vm3677_vm0, %v3654_v5 }
 0x343   : > { %v3553_v31 = vpop.xlane.xlu0 %3552 }
 0x344   : > { %v3655_v7 = vadd.f32 %v7117_v22, %v3553_v31  ;;  %v3557_v54 = vpop.xlane.xlu1 %3556 }
 0x345   : > { %v3656_v12 = vadd.f32 %v7117_v22, %v3557_v54 }
 0x346   : > { %3688 = vst.msk [vmem:[%s7120_s10 + $0x50] sm:$0xff] %vm3677_vm0, %v3655_v7 }
 0x347   : > { %3689 = vst.msk [vmem:[%s7120_s10 + $0x58] sm:$0xff] %vm3677_vm0, %v3656_v12 }
 0x34a   : > { %v3561_v44 = vpop.xlane.xlu0 %3560 }
 0x34b   : > { %v3657_v13 = vadd.f32 %v7117_v22, %v3561_v44 }
 0x34d   : > { %3690 = vst.msk [vmem:[%s7120_s10 + $0x60] sm:$0xff] %vm3677_vm0, %v3657_v13  ;;  %v3565_v41 = vpop.xlane.xlu1 %3564 }
 0x34e   : > { %v3658_v21 = vadd.f32 %v7117_v22, %v3565_v41 }
 0x350   : > { %3691 = vst.msk [vmem:[%s7120_s10 + $0x68] sm:$0xff] %vm3677_vm0, %v3658_v21 }
 0x353   : > { %v3569_v10 = vpop.xlane.xlu0 %3568 }
 0x354   : > { %v3659_v62 = vadd.f32 %v7117_v22, %v3569_v10 }
 0x356   : > { %3692 = vst.msk [vmem:[%s7120_s10 + $0x70] sm:$0xff] %vm3677_vm0, %v3659_v62 }
 0x357   : > { %v3573_v30 = vpop.xlane.xlu1 %3572 }
 0x358   : > { %v3660_v61 = vadd.f32 %v7117_v22, %v3573_v30 }
 0x35a   : > { %3693 = vst.msk [vmem:[%s7120_s10 + $0x78] sm:$0xff] %vm3677_vm0, %v3660_v61 }
 0x35c   : > { %v3577_v39 = vpop.xlane.xlu0 %3576 }
 0x35d   : > { %v3661_v57 = vadd.f32 %v7117_v22, %v3577_v39 }
 0x35f   : > { %3694 = vst.msk [vmem:[%s7120_s10 + $0x80] sm:$0xff] %vm3677_vm0, %v3661_v57 }
 0x361   : > { %v3581_v33 = vpop.xlane.xlu1 %3580 }
 0x362   : > { %v3662_v45 = vadd.f32 %v7117_v22, %v3581_v33 }
 0x364   : > { %3695 = vst.msk [vmem:[%s7120_s10 + $0x88] sm:$0xff] %vm3677_vm0, %v3662_v45  ;;  %v3585_v51 = vpop.xlane.xlu0 %3584 }
 0x365   : > { %v3663_v14 = vadd.f32 %v7117_v22, %v3585_v51 }
 0x367   : > { %3696 = vst.msk [vmem:[%s7120_s10 + $0x90] sm:$0xff] %vm3677_vm0, %v3663_v14 }
 0x36a   : > { %v3589_v28 = vpop.xlane.xlu1 %3588 }
 0x36b   : > { %v3664_v38 = vadd.f32 %v7117_v22, %v3589_v28 }
 0x36d   : > { %3697 = vst.msk [vmem:[%s7120_s10 + $0x98] sm:$0xff] %vm3677_vm0, %v3664_v38 }
 0x36e   : > { %v3593_v50 = vpop.xlane.xlu0 %3592 }
 0x36f   : > { %v3665_v17 = vadd.f32 %v7117_v22, %v3593_v50 }
 0x371   : > { %3698 = vst.msk [vmem:[%s7120_s10 + $0xa0] sm:$0xff] %vm3677_vm0, %v3665_v17 }
 0x372   : > { %v3597_v47 = vpop.xlane.xlu1 %3596 }
 0x373   : > { %v3666_v29 = vadd.f32 %v7117_v22, %v3597_v47 }
 0x375   : > { %3699 = vst.msk [vmem:[%s7120_s10 + $0xa8] sm:$0xff] %vm3677_vm0, %v3666_v29 }
 0x377   : > { %v3601_v60 = vpop.xlane.xlu0 %3600 }
 0x378   : > { %v3667_v9 = vadd.f32 %v7117_v22, %v3601_v60 }
 0x37a   : > { %3700 = vst.msk [vmem:[%s7120_s10 + $0xb0] sm:$0xff] %vm3677_vm0, %v3667_v9 }
 0x37b   : > { %v3605_v43 = vpop.xlane.xlu1 %3604 }
 0x37c   : > { %v3668_v20 = vadd.f32 %v7117_v22, %v3605_v43 }
 0x37e   : > { %3701 = vst.msk [vmem:[%s7120_s10 + $0xb8] sm:$0xff] %vm3677_vm0, %v3668_v20 }
 0x37f   : > { %v3609_v63 = vpop.xlane.xlu0 %3608 }
 0x380   : > { %v3669_v0 = vadd.f32 %v7117_v22, %v3609_v63 }
 0x381   : > { %v3613_v4 = vpop.xlane.xlu1 %3612 }
 0x382   : > { %3702 = vst.msk [vmem:[%s7120_s10 + $0xc0] sm:$0xff] %vm3677_vm0, %v3669_v0  ;;  %v3670_v52 = vadd.f32 %v7117_v22, %v3613_v4 }
 0x383   : > { %v3617_v36 = vpop.xlane.xlu0 %3616 }
 0x384   : > { %3703 = vst.msk [vmem:[%s7120_s10 + $0xc8] sm:$0xff] %vm3677_vm0, %v3670_v52  ;;  %v3671_v42 = vadd.f32 %v7117_v22, %v3617_v36 }
 0x386   : > { %v3621_v32 = vpop.xlane.xlu1 %3620  ;;  %3704 = vst.msk [vmem:[%s7120_s10 + $0xd0] sm:$0xff] %vm3677_vm0, %v3671_v42 }
 0x387   : > { %v3672_v26 = vadd.f32 %v7117_v22, %v3621_v32  ;;  %v3625_v58 = vpop.xlane.xlu0 %3624 }
 0x388   : > { %v3673_v49 = vadd.f32 %v7117_v22, %v3625_v58 }
 0x389   : > { %3705 = vst.msk [vmem:[%s7120_s10 + $0xd8] sm:$0xff] %vm3677_vm0, %v3672_v26 }
 0x38a   : > { %3706 = vst.msk [vmem:[%s7120_s10 + $0xe0] sm:$0xff] %vm3677_vm0, %v3673_v49 }
 0x38b   : > { %v3629_v24 = vpop.xlane.xlu1 %3628 }
 0x38c   : > { %v3674_v56 = vadd.f32 %v7117_v22, %v3629_v24 }
 0x38e   : > { %3707 = vst.msk [vmem:[%s7120_s10 + $0xe8] sm:$0xff] %vm3677_vm0, %v3674_v56 }
 0x390   : > { %v3633_v27 = vpop.xlane.xlu0 %3632 }
 0x391   : > { %v3675_v46 = vadd.f32 %v7117_v22, %v3633_v27 }
 0x393   : > { %3708 = vst.msk [vmem:[%s7120_s10 + $0xf0] sm:$0xff] %vm3677_vm0, %v3675_v46  ;;  %3716 = sbr.rel (!%p7690_p0) target bundleno = 968 (0x3c8), region = 56 }
 0x394   : > { %v3637_v55 = vpop.xlane.xlu1 %3636 }
 0x395   : > { %v3676_v16 = vadd.f32 %v7117_v22, %v3637_v55 }
 0x397   : > { %3709 = vst.msk [vmem:[%s7120_s10 + $0xf8] sm:$0xff] %vm3677_vm0, %v3676_v16 }
 0x398   : > { %s7703_s18 = smov (!%p3719_p9, %s3718_s18), 32 }
 0x399   : > { %s4294_s25 = sshll.u32 %s7703_s18, 7 }
 0x39a   : > { %p4297_p12 = scmp.eq.s32.totalorder %s4294_s25, 0 }
 0x39b   : > { %s7230_s30 = sshrl.u32 (!%p4297_p12), %s7703_s18, 5 }
 0x39c   : > { %3727 = sbr.rel (%p4297_p12) target bundleno = 968 (0x3c8), region = 60  ;;  %p4298_p1 = scmp.le.s32.totalorder (!%p4297_p12), %s7230_s30, 0 }
 0x3a1   : > { %4015 = sbr.rel (%p4298_p1) target bundleno = 951 (0x3b7), region = 142  ;;  %s7691_s4 = smov (!%p4298_p1), %s7224_s20 }
 0x3a2   : > { %s7692_s26 = smov (!%p4298_p1), %s7120_s10  ;;  %s7239_s7 = smov (!%p4298_p1), 0  }
 0x3a3   : > { %s7241_s9 = smov (!%p4298_p1), 0  }
 0x3a6 LB: >> { %v3852_v22 = vld [vmem:[%s5266_s26] sm:$0xff]  ;;  %v3854_v3 = vld [vmem:[%s5266_s26 + $0x8] sm:$0xff]  ;;  %v3856_v53 = vld [vmem:[%s5266_s26 + $0x10] sm:$0xff]  ;;  %s3916_s11 = sadd.s32 1, %s5270_s7  ;;  %s3846_s9 = sadd.s32 1, %s5274_s9   ;;  %s5274_s9 = sphi %s7241_s9, %s3846_s9   ;;  %s5270_s7 = sphi %s7239_s7, %s7695_s7   ;;  %s5266_s26 = sphi %s7692_s26, %s7694_s26   ;;  %s5262_s4 = sphi %s7691_s4, %s7693_s4  }
 0x3a7   : >> { %3853 = vst [vmem:[%s5262_s4] sm:$0xff] %v3852_v22  ;;  %3855 = vst [vmem:[%s5262_s4 + $0x8] sm:$0xff] %v3854_v3  ;;  %v3858_v48 = vld [vmem:[%s5266_s26 + $0x18] sm:$0xff]  ;;  %v3860_v34 = vld [vmem:[%s5266_s26 + $0x20] sm:$0xff]  ;;  %p3917_p2 = scmp.ge.s32.totalorder %s3916_s11, %s7230_s30  ;;  %p3845_p6 = scmp.ge.s32.totalorder %s3846_s9, %s7230_s30 }
 0x3a8   : >> { %3857 = vst [vmem:[%s5262_s4 + $0x10] sm:$0xff] %v3856_v53  ;;  %v3862_v8 = vld [vmem:[%s5266_s26 + $0x28] sm:$0xff]  ;;  %3859 = vst [vmem:[%s5262_s4 + $0x18] sm:$0xff] %v3858_v48  ;;  %v3864_v40 = vld [vmem:[%s5266_s26 + $0x30] sm:$0xff] }
 0x3a9   : >> { %3861 = vst [vmem:[%s5262_s4 + $0x20] sm:$0xff] %v3860_v34  ;;  %3863 = vst [vmem:[%s5262_s4 + $0x28] sm:$0xff] %v3862_v8  ;;  %v3866_v15 = vld [vmem:[%s5266_s26 + $0x38] sm:$0xff]  ;;  %v3868_v19 = vld [vmem:[%s5266_s26 + $0x40] sm:$0xff]  ;;  %s7705_s11 = smov (%p3917_p2, %s3916_s11), 0 }
 0x3aa   : >> { %3865 = vst [vmem:[%s5262_s4 + $0x30] sm:$0xff] %v3864_v40  ;;  %3867 = vst [vmem:[%s5262_s4 + $0x38] sm:$0xff] %v3866_v15  ;;  %v3870_v23 = vld [vmem:[%s5266_s26 + $0x48] sm:$0xff]  ;;  %v3872_v18 = vld [vmem:[%s5266_s26 + $0x50] sm:$0xff]  ;;  %s4299_s28 = sshll.u32 %s7705_s11, 8  ;;  %s7695_s7 = smov %s7705_s11 }
 0x3ab   : >> { %3869 = vst [vmem:[%s5262_s4 + $0x40] sm:$0xff] %v3868_v19  ;;  %v3874_v11 = vld [vmem:[%s5266_s26 + $0x58] sm:$0xff]  ;;  %3871 = vst [vmem:[%s5262_s4 + $0x48] sm:$0xff] %v3870_v23  ;;  %v3876_v59 = vld [vmem:[%s5266_s26 + $0x60] sm:$0xff]  ;;  %s7297_s12 = scalar_lea.vmem %s7120_s10, %s4299_s28 [#allocation8]   ;;  %s3922_s13 = scalar_lea.vmem %s7224_s20, %s4299_s28  }
 0x3ac   : >> { %3873 = vst [vmem:[%s5262_s4 + $0x50] sm:$0xff] %v3872_v18  ;;  %3875 = vst [vmem:[%s5262_s4 + $0x58] sm:$0xff] %v3874_v11  ;;  %v3878_v37 = vld [vmem:[%s5266_s26 + $0x68] sm:$0xff]  ;;  %v3880_v25 = vld [vmem:[%s5266_s26 + $0x70] sm:$0xff] }
 0x3ad   : >> { %3877 = vst [vmem:[%s5262_s4 + $0x60] sm:$0xff] %v3876_v59  ;;  %3879 = vst [vmem:[%s5262_s4 + $0x68] sm:$0xff] %v3878_v37  ;;  %v3882_v1 = vld [vmem:[%s5266_s26 + $0x78] sm:$0xff]  ;;  %v3884_v6 = vld [vmem:[%s5266_s26 + $0x80] sm:$0xff] }
 0x3ae   : >> { %3881 = vst [vmem:[%s5262_s4 + $0x70] sm:$0xff] %v3880_v25  ;;  %v3886_v35 = vld [vmem:[%s5266_s26 + $0x88] sm:$0xff]  ;;  %3883 = vst [vmem:[%s5262_s4 + $0x78] sm:$0xff] %v3882_v1  ;;  %v3888_v2 = vld [vmem:[%s5266_s26 + $0x90] sm:$0xff] }
 0x3af   : >> { %3885 = vst [vmem:[%s5262_s4 + $0x80] sm:$0xff] %v3884_v6  ;;  %3887 = vst [vmem:[%s5262_s4 + $0x88] sm:$0xff] %v3886_v35  ;;  %v3890_v5 = vld [vmem:[%s5266_s26 + $0x98] sm:$0xff]  ;;  %v3892_v31 = vld [vmem:[%s5266_s26 + $0xa0] sm:$0xff] }
 0x3b0   : >> { %3889 = vst [vmem:[%s5262_s4 + $0x90] sm:$0xff] %v3888_v2  ;;  %3891 = vst [vmem:[%s5262_s4 + $0x98] sm:$0xff] %v3890_v5  ;;  %v3894_v7 = vld [vmem:[%s5266_s26 + $0xa8] sm:$0xff]  ;;  %v3896_v54 = vld [vmem:[%s5266_s26 + $0xb0] sm:$0xff] }
 0x3b1   : >> { %3893 = vst [vmem:[%s5262_s4 + $0xa0] sm:$0xff] %v3892_v31  ;;  %v3898_v12 = vld [vmem:[%s5266_s26 + $0xb8] sm:$0xff]  ;;  %3895 = vst [vmem:[%s5262_s4 + $0xa8] sm:$0xff] %v3894_v7  ;;  %v3900_v44 = vld [vmem:[%s5266_s26 + $0xc0] sm:$0xff] }
 0x3b2   : >> { %3897 = vst [vmem:[%s5262_s4 + $0xb0] sm:$0xff] %v3896_v54  ;;  %3899 = vst [vmem:[%s5262_s4 + $0xb8] sm:$0xff] %v3898_v12  ;;  %v3902_v13 = vld [vmem:[%s5266_s26 + $0xc8] sm:$0xff]  ;;  %v3904_v41 = vld [vmem:[%s5266_s26 + $0xd0] sm:$0xff]  ;;  %3848 = sbr.rel (!%p3845_p6) target bundleno = 934 (0x3a6), region = 148 }
 0x3b3   : >> { %3901 = vst [vmem:[%s5262_s4 + $0xc0] sm:$0xff] %v3900_v44  ;;  %3903 = vst [vmem:[%s5262_s4 + $0xc8] sm:$0xff] %v3902_v13  ;;  %v3906_v21 = vld [vmem:[%s5266_s26 + $0xd8] sm:$0xff]  ;;  %v3908_v10 = vld [vmem:[%s5266_s26 + $0xe0] sm:$0xff] }
 0x3b4   : >> { %3905 = vst [vmem:[%s5262_s4 + $0xd0] sm:$0xff] %v3904_v41  ;;  %v3910_v62 = vld [vmem:[%s5266_s26 + $0xe8] sm:$0xff]  ;;  %3907 = vst [vmem:[%s5262_s4 + $0xd8] sm:$0xff] %v3906_v21  ;;  %v3912_v30 = vld [vmem:[%s5266_s26 + $0xf0] sm:$0xff] }
 0x3b5   : >> { %3909 = vst [vmem:[%s5262_s4 + $0xe0] sm:$0xff] %v3908_v10  ;;  %3911 = vst [vmem:[%s5262_s4 + $0xe8] sm:$0xff] %v3910_v62  ;;  %v3914_v61 = vld [vmem:[%s5266_s26 + $0xf8] sm:$0xff]  ;;  %s7694_s26 = smov %s7297_s12 }
 0x3b6   : >> { %3913 = vst [vmem:[%s5262_s4 + $0xf0] sm:$0xff] %v3912_v30  ;;  %3915 = vst [vmem:[%s5262_s4 + $0xf8] sm:$0xff] %v3914_v61  ;;  %s7693_s4 = smov %s3922_s13 }
 0x3b7 PF: > { %s7338_s16 = sand.u32 31, %s7703_s18   ;;  %s4313_s17 = sshll.u32 %s7230_s30, 8 }
 0x3b8   : > { %s3927_s29 = scalar_lea.vmem %s7120_s10, %s4313_s17 [#allocation8]   ;;  %s3929_s6 = scalar_lea.vmem %s7224_s20, %s4313_s17  }
 0x3b9   : > { %p4304_p3 = scmp.le.s32.totalorder %s7338_s16, 0 }
 0x3ba   : > { %s5276_s8 = smov (!%p4304_p3), %s3929_s6   ;;  %s5280_s14 = smov (!%p4304_p3), %s3927_s29  }
 0x3bb   : > { %4029 = sbr.rel (%p4304_p3) target bundleno = 968 (0x3c8), region = 153  ;;  %s5284_s15 = smov (!%p4304_p3), 0  }
 0x3bc   : > { %s5288_s23 = smov (!%p4304_p3), 0  }
 0x3c0 LB: >> { %v3939_v39 = vld [vmem:[%s5282_s14] sm:$0xff]  ;;  %s3941_s18 = sadd.s32 1, %s5286_s15  ;;  %s3933_s23 = sadd.s32 1, %s5290_s23   ;;  %s5290_s23 = sphi %s5288_s23, %s3933_s23   ;;  %s5286_s15 = sphi %s5284_s15, %s5285_s15   ;;  %s5282_s14 = sphi %s5280_s14, %s3946_s14   ;;  %s5278_s8 = sphi %s5276_s8, %s3947_s8  }
 0x3c1   : >> { %3940 = vst [vmem:[%s5278_s8] sm:$0xff] %v3939_v39  ;;  %p3942_p7 = scmp.ge.s32.totalorder %s3941_s18, %s7338_s16  ;;  %p3932_p5 = scmp.ge.s32.totalorder %s3933_s23, %s7338_s16 }
 0x3c3   : >> { %s7707_s18 = smov (%p3942_p7, %s3941_s18), 0  ;;  %3935 = sbr.rel (!%p3932_p5) target bundleno = 960 (0x3c0), region = 159 }
 0x3c4   : >> { %s4305_s10 = sshll.u32 %s7707_s18, 3  ;;  %s5285_s15 = smov %s7707_s18  }
 0x3c5   : >> { %s3946_s14 = scalar_lea.vmem %s3927_s29, %s4305_s10 [#allocation8]   ;;  %s3947_s8 = scalar_lea.vmem %s3929_s6, %s4305_s10  }
 0x3c8 PF: > { %p18_p8 = scmp.ge.s32.totalorder %s5354_s24, 4   ;;  %s7696_s20 = smov %s5250_s21 }
 0x3c9   : > { %s7697_s21 = smov %s5254_s22  ;;  %s7698_s22 = smov %s5364_s27 }
 0x3ca   : > { %s7699_s23 = smov %s5354_s24  ;;  %20 = sbr.rel (!%p18_p8) target bundleno = 7 (0x7), region = 170 }
 0x3cf   :  { %3963 = vsyncpa [#allocation4], 1 }
 0x3d0   :  { %3965 = vsyncpa [#allocation4 + $0x1], 1 }
 0x3d1   :  { %3966 = vsyncpa [#allocation6], 1 }

</bundles_post_ra>
